<compile_context>
chip_gen: v7x
topology: tpu7x:2x2x1
jax: 0.10.0
libtpu: 0.0.40
codegen_flags: <defaults>
</compile_context>

<pallas_src>
import functools
import math

import jax
import jax.numpy as jnp
import numpy as np
from jax.experimental import pallas as pl
from jax.experimental.pallas import tpu as pltpu


# ---------------------------------------------------------------------------
# In-kernel helpers
# ---------------------------------------------------------------------------
def _mm(x, w):
    """MXU matmul: cast LHS to the (bf16) weight dtype, accumulate in f32."""
    return jnp.dot(x.astype(w.dtype), w, preferred_element_type=jnp.float32)


def _layer_norm(y, g, b, eps=1e-5):
    mu = jnp.mean(y, axis=-1, keepdims=True)
    var = jnp.mean(jnp.square(y - mu), axis=-1, keepdims=True)
    return (y - mu) * jax.lax.rsqrt(var + eps) * g + b


def _softmax_lastdim(s):
    s = s - jnp.max(s, axis=-1, keepdims=True)
    p = jnp.exp(s)
    return p * pl.reciprocal(jnp.sum(p, axis=-1, keepdims=True), approx=True)


def _resident_spec(shape):
    """Full-array block whose index never changes -> DMA'd once, VMEM-resident."""
    zeros = (0,) * len(shape)
    return pl.BlockSpec(shape, lambda s: zeros)


# ---------------------------------------------------------------------------
# Encoder kernels
# ---------------------------------------------------------------------------
def _patch_embed_kernel(x_ref, w_ref, b_ref, pos_ref, o_ref):
    # tok = patches @ W + b + pos_embed, fused in one kernel.
    o_ref[...] = _mm(x_ref[...], w_ref[...]) + b_ref[...] + pos_ref[...]


def _enc_layer_kernel(x_ref, wqkv_ref, bqkv_ref, wo_ref, bo_ref, g1_ref, bln1_ref,
                      w1_ref, b1_ref, w2_ref, b2_ref, g2_ref, bln2_ref, o_ref,
                      *, B, N, H, Dh):
    """One full transformer encoder layer (post-LN) fused in a single kernel."""
    De = H * Dh
    scale = 1.0 / math.sqrt(Dh)
    x = x_ref[...]                                             # [B*N, De] f32

    qkv = _mm(x, wqkv_ref[...]) + bqkv_ref[...]                # [B*N, 3De]
    head_ctx = []
    for h in range(H):
        rows = []
        for b in range(B):
            r0, r1 = b * N, (b + 1) * N
            q = qkv[r0:r1, h * Dh:(h + 1) * Dh]                # [N, Dh]
            k = qkv[r0:r1, De + h * Dh:De + (h + 1) * Dh]
            v = qkv[r0:r1, 2 * De + h * Dh:2 * De + (h + 1) * Dh]
            sc = jnp.sum(q[:, None, :] * k[None, :, :], axis=-1) * scale   # [N, N]
            p = _softmax_lastdim(sc)
            rows.append(jnp.dot(p, v, preferred_element_type=jnp.float32))  # [N, Dh]
        head_ctx.append(jnp.concatenate(rows, axis=0))         # [B*N, Dh]
    ctx = jnp.concatenate(head_ctx, axis=-1)                   # [B*N, De]

    x = _layer_norm(x + _mm(ctx, wo_ref[...]) + bo_ref[...],
                    g1_ref[...], bln1_ref[...])
    hid = jnp.maximum(_mm(x, w1_ref[...]) + b1_ref[...], 0.0)
    x = _layer_norm(x + _mm(hid, w2_ref[...]) + b2_ref[...],
                    g2_ref[...], bln2_ref[...])
    o_ref[...] = x


# ---------------------------------------------------------------------------
# Whole greedy decode loop: ONE pallas_call, grid over decode steps
# ---------------------------------------------------------------------------
def _greedy_decode_kernel(
        # resident inputs
        x_enc_ref, proj_w_ref, proj_b_ref, embed_ref, pos_ref,
        wqkv_ref, bqkv_ref, wo_ref, bo_ref, g1_ref, bln1_ref,
        wq_c_ref, bq_c_ref, wkv_c_ref, bkv_c_ref, wo_c_ref, bo_c_ref,
        g2_ref, bln2_ref,
        ffw1_ref, ffb1_ref, ffw2_ref, ffb2_ref, g3_ref, bln3_ref,
        fc_w_ref, fc_b_ref,
        # output: one-hot token record (row t = token at position t)
        oh_out_ref,
        # scratch (persist across grid steps)
        onehot_ref, kcache_ref, vcache_ref, kmem_ref, vmem_ref,
        *, B, S, H, Dh, L, V, Lmax):
    Dd = H * Dh
    scale = 1.0 / math.sqrt(Dh)
    s_idx = pl.program_id(0)                 # decode step == position of current token

    # ---- one-time init at step 0: SOS one-hot, zeroed KV cache, and the
    # ---- enc_to_dec_proj + per-layer cross-attention K/V (memory is static).
    @pl.when(s_idx == 0)
    def _():
        col0 = jax.lax.broadcasted_iota(jnp.int32, (B, V), 1)
        sos = (col0 == 1).astype(jnp.float32)
        onehot_ref[...] = sos
        oh_out_ref[0, :, :] = sos
        kcache_ref[...] = jnp.zeros_like(kcache_ref)
        vcache_ref[...] = jnp.zeros_like(vcache_ref)
        mem = _mm(x_enc_ref[...], proj_w_ref[...]) + proj_b_ref[...]   # [B*S, Dd]
        for l in range(L):
            kv = _mm(mem, wkv_c_ref[l]) + bkv_c_ref[l]                 # [B*S, 2Dd]
            for h in range(H):
                for b in range(B):
                    r0, r1 = b * S, (b + 1) * S
                    kmem_ref[l, h, b, :, :] = kv[r0:r1, h * Dh:(h + 1) * Dh]
                    vmem_ref[l, h, b, :, :] = kv[r0:r1, Dd + h * Dh:Dd + (h + 1) * Dh]

    # ---- embed current token (one-hot @ embed) + positional encoding -------
    x = _mm(onehot_ref[...], embed_ref[...]) * math.sqrt(256.0)        # [B, Dd]
    x = x + pos_ref[pl.ds(s_idx, 1), :]

    for l in range(L):
        # ---- causal self-attention with in-VMEM KV cache (slot write only) --
        qkv = _mm(x, wqkv_ref[l]) + bqkv_ref[l]                        # [B, 3Dd]
        kidx = jax.lax.broadcasted_iota(jnp.int32, (B, Lmax), 1)
        heads = []
        for h in range(H):
            qh = qkv[:, h * Dh:(h + 1) * Dh]
            kh = qkv[:, Dd + h * Dh:Dd + (h + 1) * Dh]
            vh = qkv[:, 2 * Dd + h * Dh:2 * Dd + (h + 1) * Dh]
            kcache_ref[l, h, :, pl.ds(s_idx, 1), :] = kh[:, None, :]
            vcache_ref[l, h, :, pl.ds(s_idx, 1), :] = vh[:, None, :]
            kc = kcache_ref[l, h]                                      # [B, Lmax, Dh]
            vc = vcache_ref[l, h]
            sc = jnp.sum(qh[:, None, :] * kc, axis=-1) * scale         # [B, Lmax]
            sc = jnp.where(kidx <= s_idx, sc, -1e30)
            p = _softmax_lastdim(sc)
            heads.append(jnp.sum(p[:, :, None] * vc, axis=1))          # [B, Dh]
        ctx = jnp.concatenate(heads, axis=-1)                          # [B, Dd]
        x = _layer_norm(x + _mm(ctx, wo_ref[l]) + bo_ref[l],
                        g1_ref[l], bln1_ref[l])

        # ---- cross-attention over the precomputed encoder memory K/V -------
        qc = _mm(x, wq_c_ref[l]) + bq_c_ref[l]                         # [B, Dd]
        heads = []
        for h in range(H):
            qh = qc[:, h * Dh:(h + 1) * Dh]
            km = kmem_ref[l, h]                                        # [B, S, Dh]
            vm = vmem_ref[l, h]
            sc = jnp.sum(qh[:, None, :] * km, axis=-1) * scale         # [B, S]
            p = _softmax_lastdim(sc)
            heads.append(jnp.sum(p[:, :, None] * vm, axis=1))          # [B, Dh]
        ctx = jnp.concatenate(heads, axis=-1)
        x = _layer_norm(x + _mm(ctx, wo_c_ref[l]) + bo_c_ref[l],
                        g2_ref[l], bln2_ref[l])

        # ---- feed-forward ----------------------------------------------------
        hid = jnp.maximum(_mm(x, ffw1_ref[l]) + ffb1_ref[l], 0.0)
        x = _layer_norm(x + _mm(hid, ffw2_ref[l]) + ffb2_ref[l],
                        g3_ref[l], bln3_ref[l])

    # ---- fused vocab projection + greedy argmax (as a one-hot) --------------
    # (softmax before topk in the reference is monotone -> argmax of logits.)
    logits = _mm(x, fc_w_ref[...]) + fc_b_ref[...]                     # [B, V]
    col = jax.lax.broadcasted_iota(jnp.int32, (B, V), 1)
    mx = jnp.max(logits, axis=-1, keepdims=True)
    first = jnp.min(jnp.where(logits >= mx, col, V), axis=-1, keepdims=True)
    nxt_oh = (col == first).astype(jnp.float32)                        # [B, V]
    onehot_ref[...] = nxt_oh
    oh_out_ref[pl.ds(s_idx + 1, 1), :, :] = nxt_oh[None]


# ---------------------------------------------------------------------------
# Full forward (single jit: encoder kernels + one decode kernel + length calc)
# ---------------------------------------------------------------------------
def build_forward(cfg):
    patch = cfg["patch_size"]
    He, Hd = cfg["enc_heads"], cfg["dec_heads"]
    L = cfg["dec_layers"]
    Lmax = cfg["max_decode_len"]
    eos = cfg["eos_token"]

    def forward(params, pixel_values):
        B, C, Himg, Wimg = pixel_values.shape
        ph, pw = Himg // patch, Wimg // patch
        N = ph * pw
        ep = params["encoder"]
        De = ep["patch_w"].shape[1]
        Dd = params["fc_w"].shape[0]
        V = params["fc_w"].shape[1]
        Dhe, Dhd = De // He, Dd // Hd

        # -- patchify (one-time layout plumbing in XLA) -----------------------
        x = pixel_values.reshape(B, C, ph, patch, pw, patch)
        x = x.transpose(0, 2, 4, 1, 3, 5).reshape(B * N, C * patch * patch)
        pos_tiled = jnp.tile(ep["pos_embed"], (B, 1))                  # [B*N, De]

        # -- patch embedding (fused matmul + bias + pos add) ------------------
        x = pl.pallas_call(
            _patch_embed_kernel,
            out_shape=jax.ShapeDtypeStruct((B * N, De), jnp.float32),
        )(x, ep["patch_w"], ep["patch_b"].reshape(1, De), pos_tiled)

        # -- fused encoder layers (one pallas_call per layer) -----------------
        for lp in ep["layers"]:
            x = pl.pallas_call(
                functools.partial(_enc_layer_kernel, B=B, N=N, H=He, Dh=Dhe),
                out_shape=jax.ShapeDtypeStruct((B * N, De), jnp.float32),
            )(x, lp["wqkv"], lp["bqkv"].reshape(1, -1),
              lp["wo"], lp["bo"].reshape(1, -1),
              lp["ln1_g"].reshape(1, -1), lp["ln1_b"].reshape(1, -1),
              lp["ff_w1"], lp["ff_b1"].reshape(1, -1),
              lp["ff_w2"], lp["ff_b2"].reshape(1, -1),
              lp["ln2_g"].reshape(1, -1), lp["ln2_b"].reshape(1, -1))

        # -- whole greedy decode: ONE pallas_call, grid over steps ------------
        dp = params["decoder"]
        in_arrays = (
            x,
            params["enc_to_dec_proj_w"], params["enc_to_dec_proj_b"].reshape(1, Dd),
            params["embed_tgt"], params["pos_enc"],
            dp["wqkv"], dp["bqkv"], dp["wo"], dp["bo"], dp["ln1_g"], dp["ln1_b"],
            dp["wq_c"], dp["bq_c"], dp["wkv_c"], dp["bkv_c"],
            dp["wo_c"], dp["bo_c"], dp["ln2_g"], dp["ln2_b"],
            dp["ff_w1"], dp["ff_b1"], dp["ff_w2"], dp["ff_b2"],
            dp["ln3_g"], dp["ln3_b"],
            params["fc_w"], params["fc_b"].reshape(1, V),
        )
        in_specs = [_resident_spec(a.shape) for a in in_arrays]

        oh = pl.pallas_call(
            functools.partial(_greedy_decode_kernel,
                              B=B, S=N, H=Hd, Dh=Dhd, L=L, V=V, Lmax=Lmax),
            grid=(Lmax - 1,),
            in_specs=in_specs,
            out_specs=pl.BlockSpec((Lmax, B, V), lambda s: (0, 0, 0)),
            out_shape=jax.ShapeDtypeStruct((Lmax, B, V), jnp.float32),
            scratch_shapes=[
                pltpu.VMEM((B, V), jnp.float32),                 # next-token one-hot
                pltpu.VMEM((L, Hd, B, Lmax, Dhd), jnp.float32),  # self-attn K cache
                pltpu.VMEM((L, Hd, B, Lmax, Dhd), jnp.float32),  # self-attn V cache
                pltpu.VMEM((L, Hd, B, N, Dhd), jnp.float32),     # cross-attn K (memory)
                pltpu.VMEM((L, Hd, B, N, Dhd), jnp.float32),     # cross-attn V (memory)
            ],
            compiler_params=pltpu.CompilerParams(
                dimension_semantics=("arbitrary",)),
        )(*in_arrays)

        # token ids + reference stopping length ("all columns contain EOS").
        tokens = jnp.argmax(oh, axis=-1).astype(jnp.int32)             # [Lmax, B]
        seen = jnp.cumsum((tokens == eos).astype(jnp.int32), axis=0) > 0
        all_seen = jnp.all(seen, axis=1)                               # [Lmax]
        length = jnp.where(jnp.any(all_seen),
                           jnp.argmax(all_seen).astype(jnp.int32) + 1,
                           jnp.int32(Lmax))
        return tokens, length

    return jax.jit(forward)


def encoder_decoder_forward(forward_jit, params, pixel_values):
    tokens, length = forward_jit(params, pixel_values)
    # TODO(synk): the reference loops strictly until every column contains EOS;
    # here a hard cap (max_decode_len) bounds the fixed-shape buffers.  The
    # single readback below is the one unavoidable host sync (output length is
    # data-dependent).
    n = int(jax.device_get(length))
    translated = tokens[:n]                                            # [T, B]
    if translated.shape[1] == 1:                                       # .squeeze(1)
        translated = jnp.squeeze(translated, axis=1)
    return translated


# ---------------------------------------------------------------------------
# Deterministic synthetic parameters (bf16 MXU weights, f32 everything else)
# ---------------------------------------------------------------------------
def init_params(key, cfg):
    C, p = cfg["channels"], cfg["patch_size"]
    De, Dd, Dff, V = cfg["d_enc"], cfg["d_dec"], cfg["d_ff"], cfg["vocab"]
    N = (cfg["height"] // p) * (cfg["width"] // p)
    L = cfg["dec_layers"]
    Lmax = cfg["max_decode_len"]

    keys = iter(jax.random.split(key, 256))

    def nrm(shape, s=0.05, dtype=jnp.bfloat16):
        return (s * jax.random.normal(next(keys), shape, dtype=jnp.float32)).astype(dtype)

    zeros = lambda *shape: jnp.zeros(shape, jnp.float32)
    ones = lambda *shape: jnp.ones(shape, jnp.float32)

    def enc_layer():
        return {"wqkv": nrm((De, 3 * De)), "bqkv": zeros(3 * De),
                "wo": nrm((De, De)), "bo": zeros(De),
                "ln1_g": ones(De), "ln1_b": zeros(De),
                "ff_w1": nrm((De, Dff)), "ff_b1": zeros(Dff),
                "ff_w2": nrm((Dff, De)), "ff_b2": zeros(De),
                "ln2_g": ones(De), "ln2_b": zeros(De)}

    dec = {"wqkv": nrm((L, Dd, 3 * Dd)), "bqkv": zeros(L, 1, 3 * Dd),
           "wo": nrm((L, Dd, Dd)), "bo": zeros(L, 1, Dd),
           "ln1_g": ones(L, 1, Dd), "ln1_b": zeros(L, 1, Dd),
           "wq_c": nrm((L, Dd, Dd)), "bq_c": zeros(L, 1, Dd),
           "wkv_c": nrm((L, Dd, 2 * Dd)), "bkv_c": zeros(L, 1, 2 * Dd),
           "wo_c": nrm((L, Dd, Dd)), "bo_c": zeros(L, 1, Dd),
           "ln2_g": ones(L, 1, Dd), "ln2_b": zeros(L, 1, Dd),
           "ff_w1": nrm((L, Dd, Dff)), "ff_b1": zeros(L, 1, Dff),
           "ff_w2": nrm((L, Dff, Dd)), "ff_b2": zeros(L, 1, Dd),
           "ln3_g": ones(L, 1, Dd), "ln3_b": zeros(L, 1, Dd)}

    # sinusoidal positional encoding (pos_enc module; eval -> no dropout)
    pos = np.arange(Lmax)[:, None].astype(np.float32)
    idx = np.arange(0, Dd, 2).astype(np.float32)
    angle = pos / np.power(10000.0, idx / Dd)
    pe = np.zeros((Lmax, Dd), dtype=np.float32)
    pe[:, 0::2] = np.sin(angle)
    pe[:, 1::2] = np.cos(angle)

    return {
        "encoder": {"patch_w": nrm((C * p * p, De)), "patch_b": zeros(De),
                    "pos_embed": nrm((N, De), dtype=jnp.float32),
                    "layers": [enc_layer() for _ in range(cfg["enc_layers"])]},
        "enc_to_dec_proj_w": nrm((De, Dd)),
        "enc_to_dec_proj_b": zeros(Dd),
        "embed_tgt": nrm((V, Dd)),
        "pos_enc": jnp.asarray(pe),
        "decoder": dec,
        "fc_w": nrm((Dd, V)),
        "fc_b": zeros(V),
    }


if __name__ == "__main__":
    # Lane-friendly small config: d_model / ffn / vocab are multiples of 128.
    cfg = dict(channels=3, height=16, width=16, patch_size=8,
               d_enc=128, d_dec=128, d_ff=256, vocab=128,
               enc_heads=2, dec_heads=2, enc_layers=1, dec_layers=1,
               eos_token=2, max_decode_len=8)

    key = jax.random.PRNGKey(0)
    pkey, xkey = jax.random.split(key)
    params = init_params(pkey, cfg)
    pixel_values = jax.random.normal(
        xkey, (2, cfg["channels"], cfg["height"], cfg["width"]),
        dtype=jnp.float32)

    forward_jit = build_forward(cfg)
    translated = encoder_decoder_forward(forward_jit, params, pixel_values)
    translated = jax.block_until_ready(translated)

    assert translated.dtype == jnp.int32
    assert translated.ndim == 2 and translated.shape[1] == pixel_values.shape[0]
    assert bool(jnp.all(translated[0] == 1))     # first row is the SOS tokens
    print("KERNEL_OK")
</pallas_src>

<mosaic_0001>
module attributes {stable_mosaic.version = 11 : i64} {
  func.func @_patch_embed_kernel(%arg0: memref<8x192xf32, #tpu.memory_space<vmem>>, %arg1: memref<192x128xbf16, #tpu.memory_space<vmem>>, %arg2: memref<1x128xf32, #tpu.memory_space<vmem>>, %arg3: memref<8x128xf32, #tpu.memory_space<vmem>>, %arg4: memref<8x128xf32, #tpu.memory_space<vmem>>) attributes {dimension_semantics = [], scalar_prefetch = 0 : i64, scratch_operands = 0 : i64, tpu.core_type = #tpu.core_type<tc>} {
    %c0 = arith.constant 0 : index
    %c0_0 = arith.constant 0 : index
    %0 = vector.load %arg0[%c0, %c0_0] : memref<8x192xf32, #tpu.memory_space<vmem>>, vector<8x192xf32>
    %c0_1 = arith.constant 0 : index
    %c0_2 = arith.constant 0 : index
    %1 = vector.load %arg1[%c0_1, %c0_2] : memref<192x128xbf16, #tpu.memory_space<vmem>>, vector<192x128xbf16>
    %2 = arith.truncf %0 : vector<8x192xf32> to vector<8x192xbf16>
    %cst = arith.constant dense<0.000000e+00> : vector<8x128xf32>
    %3 = tpu.matmul %2, %1, %cst {dimension_numbers = #tpu.dot_dimension_numbers<[1], [0], [0], [1], [0, 0, 1, 1], [], []>} : vector<8x192xbf16>, vector<192x128xbf16>, vector<8x128xf32> -> vector<8x128xf32>
    %c0_3 = arith.constant 0 : index
    %c0_4 = arith.constant 0 : index
    %4 = vector.load %arg2[%c0_3, %c0_4] : memref<1x128xf32, #tpu.memory_space<vmem>>, vector<1x128xf32>
    %5 = vector.broadcast %4 : vector<1x128xf32> to vector<8x128xf32>
    %6 = arith.addf %3, %5 : vector<8x128xf32>
    %c0_5 = arith.constant 0 : index
    %c0_6 = arith.constant 0 : index
    %7 = vector.load %arg3[%c0_5, %c0_6] : memref<8x128xf32, #tpu.memory_space<vmem>>, vector<8x128xf32>
    %8 = arith.addf %6, %7 : vector<8x128xf32>
    %c0_7 = arith.constant 0 : index
    %c0_8 = arith.constant 0 : index
    %9 = vector.load %arg4[%c0_7, %c0_8] : memref<8x128xf32, #tpu.memory_space<vmem>>, vector<8x128xf32>
    tpu.vector_store %arg4[%c0_7, %c0_8], %8 {strides = array<i32>} : memref<8x128xf32, #tpu.memory_space<vmem>>, vector<8x128xf32>,
    return
  }
}

module attributes {stable_mosaic.version = 11 : i64} {
  func.func @_enc_layer_kernel(%arg0: memref<8x128xf32, #tpu.memory_space<vmem>>, %arg1: memref<128x384xbf16, #tpu.memory_space<vmem>>, %arg2: memref<1x384xf32, #tpu.memory_space<vmem>>, %arg3: memref<128x128xbf16, #tpu.memory_space<vmem>>, %arg4: memref<1x128xf32, #tpu.memory_space<vmem>>, %arg5: memref<1x128xf32, #tpu.memory_space<vmem>>, %arg6: memref<1x128xf32, #tpu.memory_space<vmem>>, %arg7: memref<128x256xbf16, #tpu.memory_space<vmem>>, %arg8: memref<1x256xf32, #tpu.memory_space<vmem>>, %arg9: memref<256x128xbf16, #tpu.memory_space<vmem>>, %arg10: memref<1x128xf32, #tpu.memory_space<vmem>>, %arg11: memref<1x128xf32, #tpu.memory_space<vmem>>, %arg12: memref<1x128xf32, #tpu.memory_space<vmem>>, %arg13: memref<8x128xf32, #tpu.memory_space<vmem>>) attributes {dimension_semantics = [], scalar_prefetch = 0 : i64, scratch_operands = 0 : i64, tpu.core_type = #tpu.core_type<tc>} {
    %c0 = arith.constant 0 : index
    %c0_0 = arith.constant 0 : index
    %0 = vector.load %arg0[%c0, %c0_0] : memref<8x128xf32, #tpu.memory_space<vmem>>, vector<8x128xf32>
    %c0_1 = arith.constant 0 : index
    %c0_2 = arith.constant 0 : index
    %1 = vector.load %arg1[%c0_1, %c0_2] : memref<128x384xbf16, #tpu.memory_space<vmem>>, vector<128x384xbf16>
    %2 = arith.truncf %0 : vector<8x128xf32> to vector<8x128xbf16>
    %cst = arith.constant dense<0.000000e+00> : vector<8x384xf32>
    %3 = tpu.matmul %2, %1, %cst {dimension_numbers = #tpu.dot_dimension_numbers<[1], [0], [0], [1], [0, 0, 1, 1], [], []>} : vector<8x128xbf16>, vector<128x384xbf16>, vector<8x384xf32> -> vector<8x384xf32>
    %c0_3 = arith.constant 0 : index
    %c0_4 = arith.constant 0 : index
    %4 = vector.load %arg2[%c0_3, %c0_4] : memref<1x384xf32, #tpu.memory_space<vmem>>, vector<1x384xf32>
    %5 = vector.broadcast %4 : vector<1x384xf32> to vector<8x384xf32>
    %6 = arith.addf %3, %5 : vector<8x384xf32>
    %7 = vector.extract_strided_slice %6 {offsets = [0, 0], sizes = [4, 64], strides = [1, 1]} : vector<8x384xf32> to vector<4x64xf32>
    %8 = vector.extract_strided_slice %6 {offsets = [0, 128], sizes = [4, 64], strides = [1, 1]} : vector<8x384xf32> to vector<4x64xf32>
    %9 = vector.extract_strided_slice %6 {offsets = [0, 256], sizes = [4, 64], strides = [1, 1]} : vector<8x384xf32> to vector<4x64xf32>
    %10 = vector.shape_cast %7 : vector<4x64xf32> to vector<4x1x64xf32>
    %11 = vector.shape_cast %8 : vector<4x64xf32> to vector<1x4x64xf32>
    %12 = vector.broadcast %10 : vector<4x1x64xf32> to vector<4x4x64xf32>
    %13 = vector.broadcast %11 : vector<1x4x64xf32> to vector<4x4x64xf32>
    %14 = arith.mulf %12, %13 : vector<4x4x64xf32>
    %cst_5 = arith.constant dense<0.000000e+00> : vector<4x4xf32>
    %15 = vector.multi_reduction <add>, %14, %cst_5 [2] : vector<4x4x64xf32> to vector<4x4xf32>
    %cst_6 = arith.constant 1.250000e-01 : f32
    %16 = vector.broadcast %cst_6 : f32 to vector<4x4xf32>
    %17 = arith.mulf %15, %16 : vector<4x4xf32>
    %cst_7 = arith.constant dense<0xFF800000> : vector<4xf32>
    %18 = vector.multi_reduction <maximumf>, %17, %cst_7 [1] : vector<4x4xf32> to vector<4xf32>
    %19 = vector.shape_cast %18 : vector<4xf32> to vector<4x1xf32>
    %20 = vector.broadcast %19 : vector<4x1xf32> to vector<4x4xf32>
    %21 = arith.subf %17, %20 : vector<4x4xf32>
    %22 = math.exp %21 : vector<4x4xf32>
    %cst_8 = arith.constant dense<0.000000e+00> : vector<4xf32>
    %23 = vector.multi_reduction <add>, %22, %cst_8 [1] : vector<4x4xf32> to vector<4xf32>
    %24 = vector.shape_cast %23 : vector<4xf32> to vector<4x1xf32>
    %25 = tpu.reciprocal %24 {approx = true} : vector<4x1xf32> -> vector<4x1xf32>
    %26 = vector.broadcast %25 : vector<4x1xf32> to vector<4x4xf32>
    %27 = arith.mulf %22, %26 : vector<4x4xf32>
    %cst_9 = arith.constant dense<0.000000e+00> : vector<4x64xf32>
    %28 = tpu.matmul %27, %9, %cst_9 {dimension_numbers = #tpu.dot_dimension_numbers<[1], [0], [0], [1], [0, 0, 1, 1], [], []>} : vector<4x4xf32>, vector<4x64xf32>, vector<4x64xf32> -> vector<4x64xf32>
    %29 = vector.extract_strided_slice %6 {offsets = [4, 0], sizes = [4, 64], strides = [1, 1]} : vector<8x384xf32> to vector<4x64xf32>
    %30 = vector.extract_strided_slice %6 {offsets = [4, 128], sizes = [4, 64], strides = [1, 1]} : vector<8x384xf32> to vector<4x64xf32>
    %31 = vector.extract_strided_slice %6 {offsets = [4, 256], sizes = [4, 64], strides = [1, 1]} : vector<8x384xf32> to vector<4x64xf32>
    %32 = vector.shape_cast %29 : vector<4x64xf32> to vector<4x1x64xf32>
    %33 = vector.shape_cast %30 : vector<4x64xf32> to vector<1x4x64xf32>
    %34 = vector.broadcast %32 : vector<4x1x64xf32> to vector<4x4x64xf32>
    %35 = vector.broadcast %33 : vector<1x4x64xf32> to vector<4x4x64xf32>
    %36 = arith.mulf %34, %35 : vector<4x4x64xf32>
    %cst_10 = arith.constant dense<0.000000e+00> : vector<4x4xf32>
    %37 = vector.multi_reduction <add>, %36, %cst_10 [2] : vector<4x4x64xf32> to vector<4x4xf32>
    %cst_11 = arith.constant 1.250000e-01 : f32
    %38 = vector.broadcast %cst_11 : f32 to vector<4x4xf32>
    %39 = arith.mulf %37, %38 : vector<4x4xf32>
    %cst_12 = arith.constant dense<0xFF800000> : vector<4xf32>
    %40 = vector.multi_reduction <maximumf>, %39, %cst_12 [1] : vector<4x4xf32> to vector<4xf32>
    %41 = vector.shape_cast %40 : vector<4xf32> to vector<4x1xf32>
    %42 = vector.broadcast %41 : vector<4x1xf32> to vector<4x4xf32>
    %43 = arith.subf %39, %42 : vector<4x4xf32>
    %44 = math.exp %43 : vector<4x4xf32>
    %cst_13 = arith.constant dense<0.000000e+00> : vector<4xf32>
    %45 = vector.multi_reduction <add>, %44, %cst_13 [1] : vector<4x4xf32> to vector<4xf32>
    %46 = vector.shape_cast %45 : vector<4xf32> to vector<4x1xf32>
    %47 = tpu.reciprocal %46 {approx = true} : vector<4x1xf32> -> vector<4x1xf32>
    %48 = vector.broadcast %47 : vector<4x1xf32> to vector<4x4xf32>
    %49 = arith.mulf %44, %48 : vector<4x4xf32>
    %cst_14 = arith.constant dense<0.000000e+00> : vector<4x64xf32>
    %50 = tpu.matmul %49, %31, %cst_14 {dimension_numbers = #tpu.dot_dimension_numbers<[1], [0], [0], [1], [0, 0, 1, 1], [], []>} : vector<4x4xf32>, vector<4x64xf32>, vector<4x64xf32> -> vector<4x64xf32>
    %51 = tpu.concatenate %28, %50 in 0 : vector<4x64xf32>, vector<4x64xf32> -> vector<8x64xf32>
    %52 = vector.extract_strided_slice %6 {offsets = [0, 64], sizes = [4, 64], strides = [1, 1]} : vector<8x384xf32> to vector<4x64xf32>
    %53 = vector.extract_strided_slice %6 {offsets = [0, 192], sizes = [4, 64], strides = [1, 1]} : vector<8x384xf32> to vector<4x64xf32>
    %54 = vector.extract_strided_slice %6 {offsets = [0, 320], sizes = [4, 64], strides = [1, 1]} : vector<8x384xf32> to vector<4x64xf32>
    %55 = vector.shape_cast %52 : vector<4x64xf32> to vector<4x1x64xf32>
    %56 = vector.shape_cast %53 : vector<4x64xf32> to vector<1x4x64xf32>
    %57 = vector.broadcast %55 : vector<4x1x64xf32> to vector<4x4x64xf32>
    %58 = vector.broadcast %56 : vector<1x4x64xf32> to vector<4x4x64xf32>
    %59 = arith.mulf %57, %58 : vector<4x4x64xf32>
    %cst_15 = arith.constant dense<0.000000e+00> : vector<4x4xf32>
    %60 = vector.multi_reduction <add>, %59, %cst_15 [2] : vector<4x4x64xf32> to vector<4x4xf32>
    %cst_16 = arith.constant 1.250000e-01 : f32
    %61 = vector.broadcast %cst_16 : f32 to vector<4x4xf32>
    %62 = arith.mulf %60, %61 : vector<4x4xf32>
    %cst_17 = arith.constant dense<0xFF800000> : vector<4xf32>
    %63 = vector.multi_reduction <maximumf>, %62, %cst_17 [1] : vector<4x4xf32> to vector<4xf32>
    %64 = vector.shape_cast %63 : vector<4xf32> to vector<4x1xf32>
    %65 = vector.broadcast %64 : vector<4x1xf32> to vector<4x4xf32>
    %66 = arith.subf %62, %65 : vector<4x4xf32>
    %67 = math.exp %66 : vector<4x4xf32>
    %cst_18 = arith.constant dense<0.000000e+00> : vector<4xf32>
    %68 = vector.multi_reduction <add>, %67, %cst_18 [1] : vector<4x4xf32> to vector<4xf32>
    %69 = vector.shape_cast %68 : vector<4xf32> to vector<4x1xf32>
    %70 = tpu.reciprocal %69 {approx = true} : vector<4x1xf32> -> vector<4x1xf32>
    %71 = vector.broadcast %70 : vector<4x1xf32> to vector<4x4xf32>
    %72 = arith.mulf %67, %71 : vector<4x4xf32>
    %cst_19 = arith.constant dense<0.000000e+00> : vector<4x64xf32>
    %73 = tpu.matmul %72, %54, %cst_19 {dimension_numbers = #tpu.dot_dimension_numbers<[1], [0], [0], [1], [0, 0, 1, 1], [], []>} : vector<4x4xf32>, vector<4x64xf32>, vector<4x64xf32> -> vector<4x64xf32>
    %74 = vector.extract_strided_slice %6 {offsets = [4, 64], sizes = [4, 64], strides = [1, 1]} : vector<8x384xf32> to vector<4x64xf32>
    %75 = vector.extract_strided_slice %6 {offsets = [4, 192], sizes = [4, 64], strides = [1, 1]} : vector<8x384xf32> to vector<4x64xf32>
    %76 = vector.extract_strided_slice %6 {offsets = [4, 320], sizes = [4, 64], strides = [1, 1]} : vector<8x384xf32> to vector<4x64xf32>
    %77 = vector.shape_cast %74 : vector<4x64xf32> to vector<4x1x64xf32>
    %78 = vector.shape_cast %75 : vector<4x64xf32> to vector<1x4x64xf32>
    %79 = vector.broadcast %77 : vector<4x1x64xf32> to vector<4x4x64xf32>
    %80 = vector.broadcast %78 : vector<1x4x64xf32> to vector<4x4x64xf32>
    %81 = arith.mulf %79, %80 : vector<4x4x64xf32>
    %cst_20 = arith.constant dense<0.000000e+00> : vector<4x4xf32>
    %82 = vector.multi_reduction <add>, %81, %cst_20 [2] : vector<4x4x64xf32> to vector<4x4xf32>
    %cst_21 = arith.constant 1.250000e-01 : f32
    %83 = vector.broadcast %cst_21 : f32 to vector<4x4xf32>
    %84 = arith.mulf %82, %83 : vector<4x4xf32>
    %cst_22 = arith.constant dense<0xFF800000> : vector<4xf32>
    %85 = vector.multi_reduction <maximumf>, %84, %cst_22 [1] : vector<4x4xf32> to vector<4xf32>
    %86 = vector.shape_cast %85 : vector<4xf32> to vector<4x1xf32>
    %87 = vector.broadcast %86 : vector<4x1xf32> to vector<4x4xf32>
    %88 = arith.subf %84, %87 : vector<4x4xf32>
    %89 = math.exp %88 : vector<4x4xf32>
    %cst_23 = arith.constant dense<0.000000e+00> : vector<4xf32>
    %90 = vector.multi_reduction <add>, %89, %cst_23 [1] : vector<4x4xf32> to vector<4xf32>
    %91 = vector.shape_cast %90 : vector<4xf32> to vector<4x1xf32>
    %92 = tpu.reciprocal %91 {approx = true} : vector<4x1xf32> -> vector<4x1xf32>
    %93 = vector.broadcast %92 : vector<4x1xf32> to vector<4x4xf32>
    %94 = arith.mulf %89, %93 : vector<4x4xf32>
    %cst_24 = arith.constant dense<0.000000e+00> : vector<4x64xf32>
    %95 = tpu.matmul %94, %76, %cst_24 {dimension_numbers = #tpu.dot_dimension_numbers<[1], [0], [0], [1], [0, 0, 1, 1], [], []>} : vector<4x4xf32>, vector<4x64xf32>, vector<4x64xf32> -> vector<4x64xf32>
    %96 = tpu.concatenate %73, %95 in 0 : vector<4x64xf32>, vector<4x64xf32> -> vector<8x64xf32>
    %97 = tpu.concatenate %51, %96 in 1 : vector<8x64xf32>, vector<8x64xf32> -> vector<8x128xf32>
    %c0_25 = arith.constant 0 : index
    %c0_26 = arith.constant 0 : index
    %98 = vector.load %arg3[%c0_25, %c0_26] : memref<128x128xbf16, #tpu.memory_space<vmem>>, vector<128x128xbf16>
    %99 = arith.truncf %97 : vector<8x128xf32> to vector<8x128xbf16>
    %cst_27 = arith.constant dense<0.000000e+00> : vector<8x128xf32>
    %100 = tpu.matmul %99, %98, %cst_27 {dimension_numbers = #tpu.dot_dimension_numbers<[1], [0], [0], [1], [0, 0, 1, 1], [], []>} : vector<8x128xbf16>, vector<128x128xbf16>, vector<8x128xf32> -> vector<8x128xf32>
    %101 = arith.addf %0, %100 : vector<8x128xf32>
    %c0_28 = arith.constant 0 : index
    %c0_29 = arith.constant 0 : index
    %102 = vector.load %arg4[%c0_28, %c0_29] : memref<1x128xf32, #tpu.memory_space<vmem>>, vector<1x128xf32>
    %103 = vector.broadcast %102 : vector<1x128xf32> to vector<8x128xf32>
    %104 = arith.addf %101, %103 : vector<8x128xf32>
    %c0_30 = arith.constant 0 : index
    %c0_31 = arith.constant 0 : index
    %105 = vector.load %arg5[%c0_30, %c0_31] : memref<1x128xf32, #tpu.memory_space<vmem>>, vector<1x128xf32>
    %c0_32 = arith.constant 0 : index
    %c0_33 = arith.constant 0 : index
    %106 = vector.load %arg6[%c0_32, %c0_33] : memref<1x128xf32, #tpu.memory_space<vmem>>, vector<1x128xf32>
    %cst_34 = arith.constant dense<0.000000e+00> : vector<8xf32>
    %107 = vector.multi_reduction <add>, %104, %cst_34 [1] : vector<8x128xf32> to vector<8xf32>
    %108 = vector.shape_cast %107 : vector<8xf32> to vector<8x1xf32>
    %cst_35 = arith.constant 1.280000e+02 : f32
    %109 = vector.broadcast %cst_35 : f32 to vector<8x1xf32>
    %110 = arith.divf %108, %109 : vector<8x1xf32>
    %111 = vector.broadcast %110 : vector<8x1xf32> to vector<8x128xf32>
    %112 = arith.subf %104, %111 : vector<8x128xf32>
    %113 = arith.mulf %112, %112 : vector<8x128xf32>
    %cst_36 = arith.constant dense<0.000000e+00> : vector<8xf32>
    %114 = vector.multi_reduction <add>, %113, %cst_36 [1] : vector<8x128xf32> to vector<8xf32>
    %115 = vector.shape_cast %114 : vector<8xf32> to vector<8x1xf32>
    %cst_37 = arith.constant 1.280000e+02 : f32
    %116 = vector.broadcast %cst_37 : f32 to vector<8x1xf32>
    %117 = arith.divf %115, %116 : vector<8x1xf32>
    %118 = vector.broadcast %110 : vector<8x1xf32> to vector<8x128xf32>
    %119 = arith.subf %104, %118 : vector<8x128xf32>
    %cst_38 = arith.constant 9.99999974E-6 : f32
    %120 = vector.broadcast %cst_38 : f32 to vector<8x1xf32>
    %121 = arith.addf %117, %120 : vector<8x1xf32>
    %122 = math.rsqrt %121 : vector<8x1xf32>
    %123 = vector.broadcast %122 : vector<8x1xf32> to vector<8x128xf32>
    %124 = arith.mulf %119, %123 : vector<8x128xf32>
    %125 = vector.broadcast %105 : vector<1x128xf32> to vector<8x128xf32>
    %126 = arith.mulf %124, %125 : vector<8x128xf32>
    %127 = vector.broadcast %106 : vector<1x128xf32> to vector<8x128xf32>
    %128 = arith.addf %126, %127 : vector<8x128xf32>
    %c0_39 = arith.constant 0 : index
    %c0_40 = arith.constant 0 : index
    %129 = vector.load %arg7[%c0_39, %c0_40] : memref<128x256xbf16, #tpu.memory_space<vmem>>, vector<128x256xbf16>
    %130 = arith.truncf %128 : vector<8x128xf32> to vector<8x128xbf16>
    %cst_41 = arith.constant dense<0.000000e+00> : vector<8x256xf32>
    %131 = tpu.matmul %130, %129, %cst_41 {dimension_numbers = #tpu.dot_dimension_numbers<[1], [0], [0], [1], [0, 0, 1, 1], [], []>} : vector<8x128xbf16>, vector<128x256xbf16>, vector<8x256xf32> -> vector<8x256xf32>
    %c0_42 = arith.constant 0 : index
    %c0_43 = arith.constant 0 : index
    %132 = vector.load %arg8[%c0_42, %c0_43] : memref<1x256xf32, #tpu.memory_space<vmem>>, vector<1x256xf32>
    %133 = vector.broadcast %132 : vector<1x256xf32> to vector<8x256xf32>
    %134 = arith.addf %131, %133 : vector<8x256xf32>
    %cst_44 = arith.constant 0.000000e+00 : f32
    %135 = vector.broadcast %cst_44 : f32 to vector<8x256xf32>
    %136 = arith.maximumf %134, %135 : vector<8x256xf32>
    %c0_45 = arith.constant 0 : index
    %c0_46 = arith.constant 0 : index
    %137 = vector.load %arg9[%c0_45, %c0_46] : memref<256x128xbf16, #tpu.memory_space<vmem>>, vector<256x128xbf16>
    %138 = arith.truncf %136 : vector<8x256xf32> to vector<8x256xbf16>
    %cst_47 = arith.constant dense<0.000000e+00> : vector<8x128xf32>
    %139 = tpu.matmul %138, %137, %cst_47 {dimension_numbers = #tpu.dot_dimension_numbers<[1], [0], [0], [1], [0, 0, 1, 1], [], []>} : vector<8x256xbf16>, vector<256x128xbf16>, vector<8x128xf32> -> vector<8x128xf32>
    %140 = arith.addf %128, %139 : vector<8x128xf32>
    %c0_48 = arith.constant 0 : index
    %c0_49 = arith.constant 0 : index
    %141 = vector.load %arg10[%c0_48, %c0_49] : memref<1x128xf32, #tpu.memory_space<vmem>>, vector<1x128xf32>
    %142 = vector.broadcast %141 : vector<1x128xf32> to vector<8x128xf32>
    %143 = arith.addf %140, %142 : vector<8x128xf32>
    %c0_50 = arith.constant 0 : index
    %c0_51 = arith.constant 0 : index
    %144 = vector.load %arg11[%c0_50, %c0_51] : memref<1x128xf32, #tpu.memory_space<vmem>>, vector<1x128xf32>
    %c0_52 = arith.constant 0 : index
    %c0_53 = arith.constant 0 : index
    %145 = vector.load %arg12[%c0_52, %c0_53] : memref<1x128xf32, #tpu.memory_space<vmem>>, vector<1x128xf32>
    %cst_54 = arith.constant dense<0.000000e+00> : vector<8xf32>
    %146 = vector.multi_reduction <add>, %143, %cst_54 [1] : vector<8x128xf32> to vector<8xf32>
    %147 = vector.shape_cast %146 : vector<8xf32> to vector<8x1xf32>
    %cst_55 = arith.constant 1.280000e+02 : f32
    %148 = vector.broadcast %cst_55 : f32 to vector<8x1xf32>
    %149 = arith.divf %147, %148 : vector<8x1xf32>
    %150 = vector.broadcast %149 : vector<8x1xf32> to vector<8x128xf32>
    %151 = arith.subf %143, %150 : vector<8x128xf32>
    %152 = arith.mulf %151, %151 : vector<8x128xf32>
    %cst_56 = arith.constant dense<0.000000e+00> : vector<8xf32>
    %153 = vector.multi_reduction <add>, %152, %cst_56 [1] : vector<8x128xf32> to vector<8xf32>
    %154 = vector.shape_cast %153 : vector<8xf32> to vector<8x1xf32>
    %cst_57 = arith.constant 1.280000e+02 : f32
    %155 = vector.broadcast %cst_57 : f32 to vector<8x1xf32>
    %156 = arith.divf %154, %155 : vector<8x1xf32>
    %157 = vector.broadcast %149 : vector<8x1xf32> to vector<8x128xf32>
    %158 = arith.subf %143, %157 : vector<8x128xf32>
    %cst_58 = arith.constant 9.99999974E-6 : f32
    %159 = vector.broadcast %cst_58 : f32 to vector<8x1xf32>
    %160 = arith.addf %156, %159 : vector<8x1xf32>
    %161 = math.rsqrt %160 : vector<8x1xf32>
    %162 = vector.broadcast %161 : vector<8x1xf32> to vector<8x128xf32>
    %163 = arith.mulf %158, %162 : vector<8x128xf32>
    %164 = vector.broadcast %144 : vector<1x128xf32> to vector<8x128xf32>
    %165 = arith.mulf %163, %164 : vector<8x128xf32>
    %166 = vector.broadcast %145 : vector<1x128xf32> to vector<8x128xf32>
    %167 = arith.addf %165, %166 : vector<8x128xf32>
    %c0_59 = arith.constant 0 : index
    %c0_60 = arith.constant 0 : index
    %168 = vector.load %arg13[%c0_59, %c0_60] : memref<8x128xf32, #tpu.memory_space<vmem>>, vector<8x128xf32>
    tpu.vector_store %arg13[%c0_59, %c0_60], %167 {strides = array<i32>} : memref<8x128xf32, #tpu.memory_space<vmem>>, vector<8x128xf32>,
    return
  }
}

module attributes {stable_mosaic.version = 11 : i64} {
  func.func @_greedy_decode_kernel(%arg0: i32, %arg1: memref<8x128xf32, #tpu.memory_space<vmem>>, %arg2: memref<128x128xbf16, #tpu.memory_space<vmem>>, %arg3: memref<1x128xf32, #tpu.memory_space<vmem>>, %arg4: memref<128x128xbf16, #tpu.memory_space<vmem>>, %arg5: memref<8x128xf32, #tpu.memory_space<vmem>>, %arg6: memref<1x128x384xbf16, #tpu.memory_space<vmem>>, %arg7: memref<1x1x384xf32, #tpu.memory_space<vmem>>, %arg8: memref<1x128x128xbf16, #tpu.memory_space<vmem>>, %arg9: memref<1x1x128xf32, #tpu.memory_space<vmem>>, %arg10: memref<1x1x128xf32, #tpu.memory_space<vmem>>, %arg11: memref<1x1x128xf32, #tpu.memory_space<vmem>>, %arg12: memref<1x128x128xbf16, #tpu.memory_space<vmem>>, %arg13: memref<1x1x128xf32, #tpu.memory_space<vmem>>, %arg14: memref<1x128x256xbf16, #tpu.memory_space<vmem>>, %arg15: memref<1x1x256xf32, #tpu.memory_space<vmem>>, %arg16: memref<1x128x128xbf16, #tpu.memory_space<vmem>>, %arg17: memref<1x1x128xf32, #tpu.memory_space<vmem>>, %arg18: memref<1x1x128xf32, #tpu.memory_space<vmem>>, %arg19: memref<1x1x128xf32, #tpu.memory_space<vmem>>, %arg20: memref<1x128x256xbf16, #tpu.memory_space<vmem>>, %arg21: memref<1x1x256xf32, #tpu.memory_space<vmem>>, %arg22: memref<1x256x128xbf16, #tpu.memory_space<vmem>>, %arg23: memref<1x1x128xf32, #tpu.memory_space<vmem>>, %arg24: memref<1x1x128xf32, #tpu.memory_space<vmem>>, %arg25: memref<1x1x128xf32, #tpu.memory_space<vmem>>, %arg26: memref<128x128xbf16, #tpu.memory_space<vmem>>, %arg27: memref<1x128xf32, #tpu.memory_space<vmem>>, %arg28: memref<8x2x128xf32, #tpu.memory_space<vmem>>, %arg29: memref<2x128xf32, #tpu.memory_space<vmem>>, %arg30: memref<1x2x2x8x64xf32, #tpu.memory_space<vmem>>, %arg31: memref<1x2x2x8x64xf32, #tpu.memory_space<vmem>>, %arg32: memref<1x2x2x4x64xf32, #tpu.memory_space<vmem>>, %arg33: memref<1x2x2x4x64xf32, #tpu.memory_space<vmem>>) attributes {dimension_semantics = [#tpu.dimension_semantics<arbitrary>], iteration_bounds = array<i64: 7>, scalar_prefetch = 0 : i64, scratch_operands = 5 : i64, tpu.core_type = #tpu.core_type<tc>, window_params = [{pipeline_mode = #tpu.pipeline_mode<synchronous>, transform_indices = @transform_0, window_bounds = array<i64: 8, 128>}, {pipeline_mode = #tpu.pipeline_mode<synchronous>, transform_indices = @transform_1, window_bounds = array<i64: 128, 128>}, {pipeline_mode = #tpu.pipeline_mode<synchronous>, transform_indices = @transform_2, window_bounds = array<i64: 1, 128>}, {pipeline_mode = #tpu.pipeline_mode<synchronous>, transform_indices = @transform_3, window_bounds = array<i64: 128, 128>}, {pipeline_mode = #tpu.pipeline_mode<synchronous>, transform_indices = @transform_4, window_bounds = array<i64: 8, 128>}, {pipeline_mode = #tpu.pipeline_mode<synchronous>, transform_indices = @transform_5, window_bounds = array<i64: 1, 128, 384>}, {pipeline_mode = #tpu.pipeline_mode<synchronous>, transform_indices = @transform_6, window_bounds = array<i64: 1, 1, 384>}, {pipeline_mode = #tpu.pipeline_mode<synchronous>, transform_indices = @transform_7, window_bounds = array<i64: 1, 128, 128>}, {pipeline_mode = #tpu.pipeline_mode<synchronous>, transform_indices = @transform_8, window_bounds = array<i64: 1, 1, 128>}, {pipeline_mode = #tpu.pipeline_mode<synchronous>, transform_indices = @transform_9, window_bounds = array<i64: 1, 1, 128>}, {pipeline_mode = #tpu.pipeline_mode<synchronous>, transform_indices = @transform_10, window_bounds = array<i64: 1, 1, 128>}, {pipeline_mode = #tpu.pipeline_mode<synchronous>, transform_indices = @transform_11, window_bounds = array<i64: 1, 128, 128>}, {pipeline_mode = #tpu.pipeline_mode<synchronous>, transform_indices = @transform_12, window_bounds = array<i64: 1, 1, 128>}, {pipeline_mode = #tpu.pipeline_mode<synchronous>, transform_indices = @transform_13, window_bounds = array<i64: 1, 128, 256>}, {pipeline_mode = #tpu.pipeline_mode<synchronous>, transform_indices = @transform_14, window_bounds = array<i64: 1, 1, 256>}, {pipeline_mode = #tpu.pipeline_mode<synchronous>, transform_indices = @transform_15, window_bounds = array<i64: 1, 128, 128>}, {pipeline_mode = #tpu.pipeline_mode<synchronous>, transform_indices = @transform_16, window_bounds = array<i64: 1, 1, 128>}, {pipeline_mode = #tpu.pipeline_mode<synchronous>, transform_indices = @transform_17, window_bounds = array<i64: 1, 1, 128>}, {pipeline_mode = #tpu.pipeline_mode<synchronous>, transform_indices = @transform_18, window_bounds = array<i64: 1, 1, 128>}, {pipeline_mode = #tpu.pipeline_mode<synchronous>, transform_indices = @transform_19, window_bounds = array<i64: 1, 128, 256>}, {pipeline_mode = #tpu.pipeline_mode<synchronous>, transform_indices = @transform_20, window_bounds = array<i64: 1, 1, 256>}, {pipeline_mode = #tpu.pipeline_mode<synchronous>, transform_indices = @transform_21, window_bounds = array<i64: 1, 256, 128>}, {pipeline_mode = #tpu.pipeline_mode<synchronous>, transform_indices = @transform_22, window_bounds = array<i64: 1, 1, 128>}, {pipeline_mode = #tpu.pipeline_mode<synchronous>, transform_indices = @transform_23, window_bounds = array<i64: 1, 1, 128>}, {pipeline_mode = #tpu.pipeline_mode<synchronous>, transform_indices = @transform_24, window_bounds = array<i64: 1, 1, 128>}, {pipeline_mode = #tpu.pipeline_mode<synchronous>, transform_indices = @transform_25, window_bounds = array<i64: 128, 128>}, {pipeline_mode = #tpu.pipeline_mode<synchronous>, transform_indices = @transform_26, window_bounds = array<i64: 1, 128>}, {pipeline_mode = #tpu.pipeline_mode<synchronous>, transform_indices = @transform_27, window_bounds = array<i64: 8, 2, 128>}]} {
    %c0_i32 = arith.constant 0 : i32
    %0 = arith.cmpi eq, %arg0, %c0_i32 : i32
    %1 = arith.extui %0 : i1 to i32
    %c0_i32_0 = arith.constant 0 : i32
    %2 = arith.cmpi ne, %1, %c0_i32_0 : i32
    scf.if %2 {
      %303 = tpu.iota {dimensions = array<i32: 1>} : vector<2x128xi32>
      %c1_i32_170 = arith.constant 1 : i32
      %304 = vector.broadcast %c1_i32_170 : i32 to vector<2x128xi32>
      %305 = arith.cmpi eq, %303, %304 : vector<2x128xi32>
      %306 = arith.extui %305 : vector<2x128xi1> to vector<2x128xi32>
      %307 = arith.sitofp %306 : vector<2x128xi32> to vector<2x128xf32>
      %c0_171 = arith.constant 0 : index
      %c0_172 = arith.constant 0 : index
      %308 = vector.load %arg29[%c0_171, %c0_172] : memref<2x128xf32, #tpu.memory_space<vmem>>, vector<2x128xf32>
      tpu.vector_store %arg29[%c0_171, %c0_172], %307 {strides = array<i32>} : memref<2x128xf32, #tpu.memory_space<vmem>>, vector<2x128xf32>,
      %c0_173 = arith.constant 0 : index
      %c0_174 = arith.constant 0 : index
      %c0_175 = arith.constant 0 : index
      %309 = vector.load %arg28[%c0_173, %c0_174, %c0_175] : memref<8x2x128xf32, #tpu.memory_space<vmem>>, vector<1x2x128xf32>
      %310 = vector.shape_cast %309 : vector<1x2x128xf32> to vector<2x128xf32>
      %311 = vector.shape_cast %307 : vector<2x128xf32> to vector<1x2x128xf32>
      tpu.vector_store %arg28[%c0_173, %c0_174, %c0_175], %311 {strides = array<i32>} : memref<8x2x128xf32, #tpu.memory_space<vmem>>, vector<1x2x128xf32>,
      %cst_176 = arith.constant 0.000000e+00 : f32
      %312 = vector.broadcast %cst_176 : f32 to vector<1x2x2x8x64xf32>
      %c0_177 = arith.constant 0 : index
      %c0_178 = arith.constant 0 : index
      %c0_179 = arith.constant 0 : index
      %c0_180 = arith.constant 0 : index
      %c0_181 = arith.constant 0 : index
      %313 = vector.load %arg30[%c0_177, %c0_178, %c0_179, %c0_180, %c0_181] : memref<1x2x2x8x64xf32, #tpu.memory_space<vmem>>, vector<1x2x2x8x64xf32>
      tpu.vector_store %arg30[%c0_177, %c0_178, %c0_179, %c0_180, %c0_181], %312 {strides = array<i32>} : memref<1x2x2x8x64xf32, #tpu.memory_space<vmem>>, vector<1x2x2x8x64xf32>,
      %cst_182 = arith.constant 0.000000e+00 : f32
      %314 = vector.broadcast %cst_182 : f32 to vector<1x2x2x8x64xf32>
      %c0_183 = arith.constant 0 : index
      %c0_184 = arith.constant 0 : index
      %c0_185 = arith.constant 0 : index
      %c0_186 = arith.constant 0 : index
      %c0_187 = arith.constant 0 : index
      %315 = vector.load %arg31[%c0_183, %c0_184, %c0_185, %c0_186, %c0_187] : memref<1x2x2x8x64xf32, #tpu.memory_space<vmem>>, vector<1x2x2x8x64xf32>
      tpu.vector_store %arg31[%c0_183, %c0_184, %c0_185, %c0_186, %c0_187], %314 {strides = array<i32>} : memref<1x2x2x8x64xf32, #tpu.memory_space<vmem>>, vector<1x2x2x8x64xf32>,
      %c0_188 = arith.constant 0 : index
      %c0_189 = arith.constant 0 : index
      %316 = vector.load %arg1[%c0_188, %c0_189] : memref<8x128xf32, #tpu.memory_space<vmem>>, vector<8x128xf32>
      %c0_190 = arith.constant 0 : index
      %c0_191 = arith.constant 0 : index
      %317 = vector.load %arg2[%c0_190, %c0_191] : memref<128x128xbf16, #tpu.memory_space<vmem>>, vector<128x128xbf16>
      %318 = arith.truncf %316 : vector<8x128xf32> to vector<8x128xbf16>
      %cst_192 = arith.constant dense<0.000000e+00> : vector<8x128xf32>
      %319 = tpu.matmul %318, %317, %cst_192 {dimension_numbers = #tpu.dot_dimension_numbers<[1], [0], [0], [1], [0, 0, 1, 1], [], []>} : vector<8x128xbf16>, vector<128x128xbf16>, vector<8x128xf32> -> vector<8x128xf32>
      %c0_193 = arith.constant 0 : index
      %c0_194 = arith.constant 0 : index
      %320 = vector.load %arg3[%c0_193, %c0_194] : memref<1x128xf32, #tpu.memory_space<vmem>>, vector<1x128xf32>
      %321 = vector.broadcast %320 : vector<1x128xf32> to vector<8x128xf32>
      %322 = arith.addf %319, %321 : vector<8x128xf32>
      %c0_195 = arith.constant 0 : index
      %c0_196 = arith.constant 0 : index
      %c0_197 = arith.constant 0 : index
      %323 = vector.load %arg14[%c0_195, %c0_196, %c0_197] : memref<1x128x256xbf16, #tpu.memory_space<vmem>>, vector<1x128x256xbf16>
      %324 = vector.shape_cast %323 : vector<1x128x256xbf16> to vector<128x256xbf16>
      %325 = arith.truncf %322 : vector<8x128xf32> to vector<8x128xbf16>
      %cst_198 = arith.constant dense<0.000000e+00> : vector<8x256xf32>
      %326 = tpu.matmul %325, %324, %cst_198 {dimension_numbers = #tpu.dot_dimension_numbers<[1], [0], [0], [1], [0, 0, 1, 1], [], []>} : vector<8x128xbf16>, vector<128x256xbf16>, vector<8x256xf32> -> vector<8x256xf32>
      %c0_199 = arith.constant 0 : index
      %c0_200 = arith.constant 0 : index
      %c0_201 = arith.constant 0 : index
      %327 = vector.load %arg15[%c0_199, %c0_200, %c0_201] : memref<1x1x256xf32, #tpu.memory_space<vmem>>, vector<1x1x256xf32>
      %328 = vector.shape_cast %327 : vector<1x1x256xf32> to vector<1x256xf32>
      %329 = vector.broadcast %328 : vector<1x256xf32> to vector<8x256xf32>
      %330 = arith.addf %326, %329 : vector<8x256xf32>
      %331 = vector.extract_strided_slice %330 {offsets = [0, 0], sizes = [4, 64], strides = [1, 1]} : vector<8x256xf32> to vector<4x64xf32>
      %c0_202 = arith.constant 0 : index
      %c0_203 = arith.constant 0 : index
      %c0_204 = arith.constant 0 : index
      %c0_205 = arith.constant 0 : index
      %c0_206 = arith.constant 0 : index
      %332 = vector.load %arg32[%c0_202, %c0_203, %c0_204, %c0_205, %c0_206] : memref<1x2x2x4x64xf32, #tpu.memory_space<vmem>>, vector<1x1x1x4x64xf32>
      %333 = vector.shape_cast %332 : vector<1x1x1x4x64xf32> to vector<4x64xf32>
      %334 = vector.shape_cast %331 : vector<4x64xf32> to vector<1x1x1x4x64xf32>
      tpu.vector_store %arg32[%c0_202, %c0_203, %c0_204, %c0_205, %c0_206], %334 {strides = array<i32>} : memref<1x2x2x4x64xf32, #tpu.memory_space<vmem>>, vector<1x1x1x4x64xf32>,
      %335 = vector.extract_strided_slice %330 {offsets = [0, 128], sizes = [4, 64], strides = [1, 1]} : vector<8x256xf32> to vector<4x64xf32>
      %c0_207 = arith.constant 0 : index
      %c0_208 = arith.constant 0 : index
      %c0_209 = arith.constant 0 : index
      %c0_210 = arith.constant 0 : index
      %c0_211 = arith.constant 0 : index
      %336 = vector.load %arg33[%c0_207, %c0_208, %c0_209, %c0_210, %c0_211] : memref<1x2x2x4x64xf32, #tpu.memory_space<vmem>>, vector<1x1x1x4x64xf32>
      %337 = vector.shape_cast %336 : vector<1x1x1x4x64xf32> to vector<4x64xf32>
      %338 = vector.shape_cast %335 : vector<4x64xf32> to vector<1x1x1x4x64xf32>
      tpu.vector_store %arg33[%c0_207, %c0_208, %c0_209, %c0_210, %c0_211], %338 {strides = array<i32>} : memref<1x2x2x4x64xf32, #tpu.memory_space<vmem>>, vector<1x1x1x4x64xf32>,
      %339 = vector.extract_strided_slice %330 {offsets = [4, 0], sizes = [4, 64], strides = [1, 1]} : vector<8x256xf32> to vector<4x64xf32>
      %c0_212 = arith.constant 0 : index
      %c0_213 = arith.constant 0 : index
      %c1_214 = arith.constant 1 : index
      %c0_215 = arith.constant 0 : index
      %c0_216 = arith.constant 0 : index
      %340 = vector.load %arg32[%c0_212, %c0_213, %c1_214, %c0_215, %c0_216] : memref<1x2x2x4x64xf32, #tpu.memory_space<vmem>>, vector<1x1x1x4x64xf32>
      %341 = vector.shape_cast %340 : vector<1x1x1x4x64xf32> to vector<4x64xf32>
      %342 = vector.shape_cast %339 : vector<4x64xf32> to vector<1x1x1x4x64xf32>
      tpu.vector_store %arg32[%c0_212, %c0_213, %c1_214, %c0_215, %c0_216], %342 {strides = array<i32>} : memref<1x2x2x4x64xf32, #tpu.memory_space<vmem>>, vector<1x1x1x4x64xf32>,
      %343 = vector.extract_strided_slice %330 {offsets = [4, 128], sizes = [4, 64], strides = [1, 1]} : vector<8x256xf32> to vector<4x64xf32>
      %c0_217 = arith.constant 0 : index
      %c0_218 = arith.constant 0 : index
      %c1_219 = arith.constant 1 : index
      %c0_220 = arith.constant 0 : index
      %c0_221 = arith.constant 0 : index
      %344 = vector.load %arg33[%c0_217, %c0_218, %c1_219, %c0_220, %c0_221] : memref<1x2x2x4x64xf32, #tpu.memory_space<vmem>>, vector<1x1x1x4x64xf32>
      %345 = vector.shape_cast %344 : vector<1x1x1x4x64xf32> to vector<4x64xf32>
      %346 = vector.shape_cast %343 : vector<4x64xf32> to vector<1x1x1x4x64xf32>
      tpu.vector_store %arg33[%c0_217, %c0_218, %c1_219, %c0_220, %c0_221], %346 {strides = array<i32>} : memref<1x2x2x4x64xf32, #tpu.memory_space<vmem>>, vector<1x1x1x4x64xf32>,
      %347 = vector.extract_strided_slice %330 {offsets = [0, 64], sizes = [4, 64], strides = [1, 1]} : vector<8x256xf32> to vector<4x64xf32>
      %c0_222 = arith.constant 0 : index
      %c1_223 = arith.constant 1 : index
      %c0_224 = arith.constant 0 : index
      %c0_225 = arith.constant 0 : index
      %c0_226 = arith.constant 0 : index
      %348 = vector.load %arg32[%c0_222, %c1_223, %c0_224, %c0_225, %c0_226] : memref<1x2x2x4x64xf32, #tpu.memory_space<vmem>>, vector<1x1x1x4x64xf32>
      %349 = vector.shape_cast %348 : vector<1x1x1x4x64xf32> to vector<4x64xf32>
      %350 = vector.shape_cast %347 : vector<4x64xf32> to vector<1x1x1x4x64xf32>
      tpu.vector_store %arg32[%c0_222, %c1_223, %c0_224, %c0_225, %c0_226], %350 {strides = array<i32>} : memref<1x2x2x4x64xf32, #tpu.memory_space<vmem>>, vector<1x1x1x4x64xf32>,
      %351 = vector.extract_strided_slice %330 {offsets = [0, 192], sizes = [4, 64], strides = [1, 1]} : vector<8x256xf32> to vector<4x64xf32>
      %c0_227 = arith.constant 0 : index
      %c1_228 = arith.constant 1 : index
      %c0_229 = arith.constant 0 : index
      %c0_230 = arith.constant 0 : index
      %c0_231 = arith.constant 0 : index
      %352 = vector.load %arg33[%c0_227, %c1_228, %c0_229, %c0_230, %c0_231] : memref<1x2x2x4x64xf32, #tpu.memory_space<vmem>>, vector<1x1x1x4x64xf32>
      %353 = vector.shape_cast %352 : vector<1x1x1x4x64xf32> to vector<4x64xf32>
      %354 = vector.shape_cast %351 : vector<4x64xf32> to vector<1x1x1x4x64xf32>
      tpu.vector_store %arg33[%c0_227, %c1_228, %c0_229, %c0_230, %c0_231], %354 {strides = array<i32>} : memref<1x2x2x4x64xf32, #tpu.memory_space<vmem>>, vector<1x1x1x4x64xf32>,
      %355 = vector.extract_strided_slice %330 {offsets = [4, 64], sizes = [4, 64], strides = [1, 1]} : vector<8x256xf32> to vector<4x64xf32>
      %c0_232 = arith.constant 0 : index
      %c1_233 = arith.constant 1 : index
      %c1_234 = arith.constant 1 : index
      %c0_235 = arith.constant 0 : index
      %c0_236 = arith.constant 0 : index
      %356 = vector.load %arg32[%c0_232, %c1_233, %c1_234, %c0_235, %c0_236] : memref<1x2x2x4x64xf32, #tpu.memory_space<vmem>>, vector<1x1x1x4x64xf32>
      %357 = vector.shape_cast %356 : vector<1x1x1x4x64xf32> to vector<4x64xf32>
      %358 = vector.shape_cast %355 : vector<4x64xf32> to vector<1x1x1x4x64xf32>
      tpu.vector_store %arg32[%c0_232, %c1_233, %c1_234, %c0_235, %c0_236], %358 {strides = array<i32>} : memref<1x2x2x4x64xf32, #tpu.memory_space<vmem>>, vector<1x1x1x4x64xf32>,
      %359 = vector.extract_strided_slice %330 {offsets = [4, 192], sizes = [4, 64], strides = [1, 1]} : vector<8x256xf32> to vector<4x64xf32>
      %c0_237 = arith.constant 0 : index
      %c1_238 = arith.constant 1 : index
      %c1_239 = arith.constant 1 : index
      %c0_240 = arith.constant 0 : index
      %c0_241 = arith.constant 0 : index
      %360 = vector.load %arg33[%c0_237, %c1_238, %c1_239, %c0_240, %c0_241] : memref<1x2x2x4x64xf32, #tpu.memory_space<vmem>>, vector<1x1x1x4x64xf32>
      %361 = vector.shape_cast %360 : vector<1x1x1x4x64xf32> to vector<4x64xf32>
      %362 = vector.shape_cast %359 : vector<4x64xf32> to vector<1x1x1x4x64xf32>
      tpu.vector_store %arg33[%c0_237, %c1_238, %c1_239, %c0_240, %c0_241], %362 {strides = array<i32>} : memref<1x2x2x4x64xf32, #tpu.memory_space<vmem>>, vector<1x1x1x4x64xf32>,
    } else {
    }
    %c0 = arith.constant 0 : index
    %c0_1 = arith.constant 0 : index
    %3 = vector.load %arg29[%c0, %c0_1] : memref<2x128xf32, #tpu.memory_space<vmem>>, vector<2x128xf32>
    %c0_2 = arith.constant 0 : index
    %c0_3 = arith.constant 0 : index
    %4 = vector.load %arg4[%c0_2, %c0_3] : memref<128x128xbf16, #tpu.memory_space<vmem>>, vector<128x128xbf16>
    %5 = arith.truncf %3 : vector<2x128xf32> to vector<2x128xbf16>
    %cst = arith.constant dense<0.000000e+00> : vector<2x128xf32>
    %6 = tpu.matmul %5, %4, %cst {dimension_numbers = #tpu.dot_dimension_numbers<[1], [0], [0], [1], [0, 0, 1, 1], [], []>} : vector<2x128xbf16>, vector<128x128xbf16>, vector<2x128xf32> -> vector<2x128xf32>
    %cst_4 = arith.constant 1.600000e+01 : f32
    %7 = vector.broadcast %cst_4 : f32 to vector<2x128xf32>
    %8 = arith.mulf %6, %7 : vector<2x128xf32>
    %9 = arith.index_cast %arg0 : i32 to index
    %c0_5 = arith.constant 0 : index
    %10 = vector.load %arg5[%9, %c0_5] : memref<8x128xf32, #tpu.memory_space<vmem>>, vector<1x128xf32>
    %11 = vector.broadcast %10 : vector<1x128xf32> to vector<2x128xf32>
    %12 = arith.addf %8, %11 : vector<2x128xf32>
    %c0_6 = arith.constant 0 : index
    %c0_7 = arith.constant 0 : index
    %c0_8 = arith.constant 0 : index
    %13 = vector.load %arg6[%c0_6, %c0_7, %c0_8] : memref<1x128x384xbf16, #tpu.memory_space<vmem>>, vector<1x128x384xbf16>
    %14 = vector.shape_cast %13 : vector<1x128x384xbf16> to vector<128x384xbf16>
    %15 = arith.truncf %12 : vector<2x128xf32> to vector<2x128xbf16>
    %cst_9 = arith.constant dense<0.000000e+00> : vector<2x384xf32>
    %16 = tpu.matmul %15, %14, %cst_9 {dimension_numbers = #tpu.dot_dimension_numbers<[1], [0], [0], [1], [0, 0, 1, 1], [], []>} : vector<2x128xbf16>, vector<128x384xbf16>, vector<2x384xf32> -> vector<2x384xf32>
    %c0_10 = arith.constant 0 : index
    %c0_11 = arith.constant 0 : index
    %c0_12 = arith.constant 0 : index
    %17 = vector.load %arg7[%c0_10, %c0_11, %c0_12] : memref<1x1x384xf32, #tpu.memory_space<vmem>>, vector<1x1x384xf32>
    %18 = vector.shape_cast %17 : vector<1x1x384xf32> to vector<1x384xf32>
    %19 = vector.broadcast %18 : vector<1x384xf32> to vector<2x384xf32>
    %20 = arith.addf %16, %19 : vector<2x384xf32>
    %21 = tpu.iota {dimensions = array<i32: 1>} : vector<2x8xi32>
    %22 = vector.extract_strided_slice %20 {offsets = [0, 0], sizes = [2, 64], strides = [1, 1]} : vector<2x384xf32> to vector<2x64xf32>
    %23 = vector.extract_strided_slice %20 {offsets = [0, 128], sizes = [2, 64], strides = [1, 1]} : vector<2x384xf32> to vector<2x64xf32>
    %24 = vector.extract_strided_slice %20 {offsets = [0, 256], sizes = [2, 64], strides = [1, 1]} : vector<2x384xf32> to vector<2x64xf32>
    %25 = vector.shape_cast %23 : vector<2x64xf32> to vector<2x1x64xf32>
    %c0_13 = arith.constant 0 : index
    %c0_14 = arith.constant 0 : index
    %c0_15 = arith.constant 0 : index
    %26 = arith.index_cast %arg0 : i32 to index
    %c0_16 = arith.constant 0 : index
    %27 = vector.load %arg30[%c0_13, %c0_14, %c0_15, %26, %c0_16] : memref<1x2x2x8x64xf32, #tpu.memory_space<vmem>>, vector<1x1x2x1x64xf32>
    %28 = vector.shape_cast %27 : vector<1x1x2x1x64xf32> to vector<2x1x64xf32>
    %29 = vector.shape_cast %25 : vector<2x1x64xf32> to vector<1x1x2x1x64xf32>
    tpu.vector_store %arg30[%c0_13, %c0_14, %c0_15, %26, %c0_16], %29 {strides = array<i32>} : memref<1x2x2x8x64xf32, #tpu.memory_space<vmem>>, vector<1x1x2x1x64xf32>,
    %30 = vector.shape_cast %24 : vector<2x64xf32> to vector<2x1x64xf32>
    %c0_17 = arith.constant 0 : index
    %c0_18 = arith.constant 0 : index
    %c0_19 = arith.constant 0 : index
    %31 = arith.index_cast %arg0 : i32 to index
    %c0_20 = arith.constant 0 : index
    %32 = vector.load %arg31[%c0_17, %c0_18, %c0_19, %31, %c0_20] : memref<1x2x2x8x64xf32, #tpu.memory_space<vmem>>, vector<1x1x2x1x64xf32>
    %33 = vector.shape_cast %32 : vector<1x1x2x1x64xf32> to vector<2x1x64xf32>
    %34 = vector.shape_cast %30 : vector<2x1x64xf32> to vector<1x1x2x1x64xf32>
    tpu.vector_store %arg31[%c0_17, %c0_18, %c0_19, %31, %c0_20], %34 {strides = array<i32>} : memref<1x2x2x8x64xf32, #tpu.memory_space<vmem>>, vector<1x1x2x1x64xf32>,
    %c0_21 = arith.constant 0 : index
    %c0_22 = arith.constant 0 : index
    %c0_23 = arith.constant 0 : index
    %c0_24 = arith.constant 0 : index
    %c0_25 = arith.constant 0 : index
    %35 = vector.load %arg30[%c0_21, %c0_22, %c0_23, %c0_24, %c0_25] : memref<1x2x2x8x64xf32, #tpu.memory_space<vmem>>, vector<1x1x2x8x64xf32>
    %36 = vector.shape_cast %35 : vector<1x1x2x8x64xf32> to vector<2x8x64xf32>
    %c0_26 = arith.constant 0 : index
    %c0_27 = arith.constant 0 : index
    %c0_28 = arith.constant 0 : index
    %c0_29 = arith.constant 0 : index
    %c0_30 = arith.constant 0 : index
    %37 = vector.load %arg31[%c0_26, %c0_27, %c0_28, %c0_29, %c0_30] : memref<1x2x2x8x64xf32, #tpu.memory_space<vmem>>, vector<1x1x2x8x64xf32>
    %38 = vector.shape_cast %37 : vector<1x1x2x8x64xf32> to vector<2x8x64xf32>
    %39 = vector.shape_cast %22 : vector<2x64xf32> to vector<2x1x64xf32>
    %40 = vector.broadcast %39 : vector<2x1x64xf32> to vector<2x8x64xf32>
    %41 = arith.mulf %40, %36 : vector<2x8x64xf32>
    %cst_31 = arith.constant dense<0.000000e+00> : vector<2x8xf32>
    %42 = vector.multi_reduction <add>, %41, %cst_31 [2] : vector<2x8x64xf32> to vector<2x8xf32>
    %cst_32 = arith.constant 1.250000e-01 : f32
    %43 = vector.broadcast %cst_32 : f32 to vector<2x8xf32>
    %44 = arith.mulf %42, %43 : vector<2x8xf32>
    %45 = vector.broadcast %arg0 : i32 to vector<2x8xi32>
    %46 = arith.cmpi sle, %21, %45 : vector<2x8xi32>
    %cst_33 = arith.constant -1.000000e+30 : f32
    %47 = vector.broadcast %cst_33 : f32 to vector<2x8xf32>
    %48 = arith.select %46, %44, %47 : vector<2x8xi1>, vector<2x8xf32>
    %cst_34 = arith.constant dense<0xFF800000> : vector<2xf32>
    %49 = vector.multi_reduction <maximumf>, %48, %cst_34 [1] : vector<2x8xf32> to vector<2xf32>
    %50 = vector.shape_cast %49 : vector<2xf32> to vector<2x1xf32>
    %51 = vector.broadcast %50 : vector<2x1xf32> to vector<2x8xf32>
    %52 = arith.subf %48, %51 : vector<2x8xf32>
    %53 = math.exp %52 : vector<2x8xf32>
    %cst_35 = arith.constant dense<0.000000e+00> : vector<2xf32>
    %54 = vector.multi_reduction <add>, %53, %cst_35 [1] : vector<2x8xf32> to vector<2xf32>
    %55 = vector.shape_cast %54 : vector<2xf32> to vector<2x1xf32>
    %56 = tpu.reciprocal %55 {approx = true} : vector<2x1xf32> -> vector<2x1xf32>
    %57 = vector.broadcast %56 : vector<2x1xf32> to vector<2x8xf32>
    %58 = arith.mulf %53, %57 : vector<2x8xf32>
    %59 = vector.shape_cast %58 : vector<2x8xf32> to vector<2x8x1xf32>
    %60 = vector.broadcast %59 : vector<2x8x1xf32> to vector<2x8x64xf32>
    %61 = arith.mulf %60, %38 : vector<2x8x64xf32>
    %cst_36 = arith.constant dense<0.000000e+00> : vector<2x64xf32>
    %62 = vector.multi_reduction <add>, %61, %cst_36 [1] : vector<2x8x64xf32> to vector<2x64xf32>
    %63 = vector.extract_strided_slice %20 {offsets = [0, 64], sizes = [2, 64], strides = [1, 1]} : vector<2x384xf32> to vector<2x64xf32>
    %64 = vector.extract_strided_slice %20 {offsets = [0, 192], sizes = [2, 64], strides = [1, 1]} : vector<2x384xf32> to vector<2x64xf32>
    %65 = vector.extract_strided_slice %20 {offsets = [0, 320], sizes = [2, 64], strides = [1, 1]} : vector<2x384xf32> to vector<2x64xf32>
    %66 = vector.shape_cast %64 : vector<2x64xf32> to vector<2x1x64xf32>
    %c0_37 = arith.constant 0 : index
    %c1 = arith.constant 1 : index
    %c0_38 = arith.constant 0 : index
    %67 = arith.index_cast %arg0 : i32 to index
    %c0_39 = arith.constant 0 : index
    %68 = vector.load %arg30[%c0_37, %c1, %c0_38, %67, %c0_39] : memref<1x2x2x8x64xf32, #tpu.memory_space<vmem>>, vector<1x1x2x1x64xf32>
    %69 = vector.shape_cast %68 : vector<1x1x2x1x64xf32> to vector<2x1x64xf32>
    %70 = vector.shape_cast %66 : vector<2x1x64xf32> to vector<1x1x2x1x64xf32>
    tpu.vector_store %arg30[%c0_37, %c1, %c0_38, %67, %c0_39], %70 {strides = array<i32>} : memref<1x2x2x8x64xf32, #tpu.memory_space<vmem>>, vector<1x1x2x1x64xf32>,
    %71 = vector.shape_cast %65 : vector<2x64xf32> to vector<2x1x64xf32>
    %c0_40 = arith.constant 0 : index
    %c1_41 = arith.constant 1 : index
    %c0_42 = arith.constant 0 : index
    %72 = arith.index_cast %arg0 : i32 to index
    %c0_43 = arith.constant 0 : index
    %73 = vector.load %arg31[%c0_40, %c1_41, %c0_42, %72, %c0_43] : memref<1x2x2x8x64xf32, #tpu.memory_space<vmem>>, vector<1x1x2x1x64xf32>
    %74 = vector.shape_cast %73 : vector<1x1x2x1x64xf32> to vector<2x1x64xf32>
    %75 = vector.shape_cast %71 : vector<2x1x64xf32> to vector<1x1x2x1x64xf32>
    tpu.vector_store %arg31[%c0_40, %c1_41, %c0_42, %72, %c0_43], %75 {strides = array<i32>} : memref<1x2x2x8x64xf32, #tpu.memory_space<vmem>>, vector<1x1x2x1x64xf32>,
    %c0_44 = arith.constant 0 : index
    %c1_45 = arith.constant 1 : index
    %c0_46 = arith.constant 0 : index
    %c0_47 = arith.constant 0 : index
    %c0_48 = arith.constant 0 : index
    %76 = vector.load %arg30[%c0_44, %c1_45, %c0_46, %c0_47, %c0_48] : memref<1x2x2x8x64xf32, #tpu.memory_space<vmem>>, vector<1x1x2x8x64xf32>
    %77 = vector.shape_cast %76 : vector<1x1x2x8x64xf32> to vector<2x8x64xf32>
    %c0_49 = arith.constant 0 : index
    %c1_50 = arith.constant 1 : index
    %c0_51 = arith.constant 0 : index
    %c0_52 = arith.constant 0 : index
    %c0_53 = arith.constant 0 : index
    %78 = vector.load %arg31[%c0_49, %c1_50, %c0_51, %c0_52, %c0_53] : memref<1x2x2x8x64xf32, #tpu.memory_space<vmem>>, vector<1x1x2x8x64xf32>
    %79 = vector.shape_cast %78 : vector<1x1x2x8x64xf32> to vector<2x8x64xf32>
    %80 = vector.shape_cast %63 : vector<2x64xf32> to vector<2x1x64xf32>
    %81 = vector.broadcast %80 : vector<2x1x64xf32> to vector<2x8x64xf32>
    %82 = arith.mulf %81, %77 : vector<2x8x64xf32>
    %cst_54 = arith.constant dense<0.000000e+00> : vector<2x8xf32>
    %83 = vector.multi_reduction <add>, %82, %cst_54 [2] : vector<2x8x64xf32> to vector<2x8xf32>
    %cst_55 = arith.constant 1.250000e-01 : f32
    %84 = vector.broadcast %cst_55 : f32 to vector<2x8xf32>
    %85 = arith.mulf %83, %84 : vector<2x8xf32>
    %86 = vector.broadcast %arg0 : i32 to vector<2x8xi32>
    %87 = arith.cmpi sle, %21, %86 : vector<2x8xi32>
    %cst_56 = arith.constant -1.000000e+30 : f32
    %88 = vector.broadcast %cst_56 : f32 to vector<2x8xf32>
    %89 = arith.select %87, %85, %88 : vector<2x8xi1>, vector<2x8xf32>
    %cst_57 = arith.constant dense<0xFF800000> : vector<2xf32>
    %90 = vector.multi_reduction <maximumf>, %89, %cst_57 [1] : vector<2x8xf32> to vector<2xf32>
    %91 = vector.shape_cast %90 : vector<2xf32> to vector<2x1xf32>
    %92 = vector.broadcast %91 : vector<2x1xf32> to vector<2x8xf32>
    %93 = arith.subf %89, %92 : vector<2x8xf32>
    %94 = math.exp %93 : vector<2x8xf32>
    %cst_58 = arith.constant dense<0.000000e+00> : vector<2xf32>
    %95 = vector.multi_reduction <add>, %94, %cst_58 [1] : vector<2x8xf32> to vector<2xf32>
    %96 = vector.shape_cast %95 : vector<2xf32> to vector<2x1xf32>
    %97 = tpu.reciprocal %96 {approx = true} : vector<2x1xf32> -> vector<2x1xf32>
    %98 = vector.broadcast %97 : vector<2x1xf32> to vector<2x8xf32>
    %99 = arith.mulf %94, %98 : vector<2x8xf32>
    %100 = vector.shape_cast %99 : vector<2x8xf32> to vector<2x8x1xf32>
    %101 = vector.broadcast %100 : vector<2x8x1xf32> to vector<2x8x64xf32>
    %102 = arith.mulf %101, %79 : vector<2x8x64xf32>
    %cst_59 = arith.constant dense<0.000000e+00> : vector<2x64xf32>
    %103 = vector.multi_reduction <add>, %102, %cst_59 [1] : vector<2x8x64xf32> to vector<2x64xf32>
    %104 = tpu.concatenate %62, %103 in 1 : vector<2x64xf32>, vector<2x64xf32> -> vector<2x128xf32>
    %c0_60 = arith.constant 0 : index
    %c0_61 = arith.constant 0 : index
    %c0_62 = arith.constant 0 : index
    %105 = vector.load %arg8[%c0_60, %c0_61, %c0_62] : memref<1x128x128xbf16, #tpu.memory_space<vmem>>, vector<1x128x128xbf16>
    %106 = vector.shape_cast %105 : vector<1x128x128xbf16> to vector<128x128xbf16>
    %107 = arith.truncf %104 : vector<2x128xf32> to vector<2x128xbf16>
    %cst_63 = arith.constant dense<0.000000e+00> : vector<2x128xf32>
    %108 = tpu.matmul %107, %106, %cst_63 {dimension_numbers = #tpu.dot_dimension_numbers<[1], [0], [0], [1], [0, 0, 1, 1], [], []>} : vector<2x128xbf16>, vector<128x128xbf16>, vector<2x128xf32> -> vector<2x128xf32>
    %109 = arith.addf %12, %108 : vector<2x128xf32>
    %c0_64 = arith.constant 0 : index
    %c0_65 = arith.constant 0 : index
    %c0_66 = arith.constant 0 : index
    %110 = vector.load %arg9[%c0_64, %c0_65, %c0_66] : memref<1x1x128xf32, #tpu.memory_space<vmem>>, vector<1x1x128xf32>
    %111 = vector.shape_cast %110 : vector<1x1x128xf32> to vector<1x128xf32>
    %112 = vector.broadcast %111 : vector<1x128xf32> to vector<2x128xf32>
    %113 = arith.addf %109, %112 : vector<2x128xf32>
    %c0_67 = arith.constant 0 : index
    %c0_68 = arith.constant 0 : index
    %c0_69 = arith.constant 0 : index
    %114 = vector.load %arg10[%c0_67, %c0_68, %c0_69] : memref<1x1x128xf32, #tpu.memory_space<vmem>>, vector<1x1x128xf32>
    %115 = vector.shape_cast %114 : vector<1x1x128xf32> to vector<1x128xf32>
    %c0_70 = arith.constant 0 : index
    %c0_71 = arith.constant 0 : index
    %c0_72 = arith.constant 0 : index
    %116 = vector.load %arg11[%c0_70, %c0_71, %c0_72] : memref<1x1x128xf32, #tpu.memory_space<vmem>>, vector<1x1x128xf32>
    %117 = vector.shape_cast %116 : vector<1x1x128xf32> to vector<1x128xf32>
    %cst_73 = arith.constant dense<0.000000e+00> : vector<2xf32>
    %118 = vector.multi_reduction <add>, %113, %cst_73 [1] : vector<2x128xf32> to vector<2xf32>
    %119 = vector.shape_cast %118 : vector<2xf32> to vector<2x1xf32>
    %cst_74 = arith.constant 1.280000e+02 : f32
    %120 = vector.broadcast %cst_74 : f32 to vector<2x1xf32>
    %121 = arith.divf %119, %120 : vector<2x1xf32>
    %122 = vector.broadcast %121 : vector<2x1xf32> to vector<2x128xf32>
    %123 = arith.subf %113, %122 : vector<2x128xf32>
    %124 = arith.mulf %123, %123 : vector<2x128xf32>
    %cst_75 = arith.constant dense<0.000000e+00> : vector<2xf32>
    %125 = vector.multi_reduction <add>, %124, %cst_75 [1] : vector<2x128xf32> to vector<2xf32>
    %126 = vector.shape_cast %125 : vector<2xf32> to vector<2x1xf32>
    %cst_76 = arith.constant 1.280000e+02 : f32
    %127 = vector.broadcast %cst_76 : f32 to vector<2x1xf32>
    %128 = arith.divf %126, %127 : vector<2x1xf32>
    %129 = vector.broadcast %121 : vector<2x1xf32> to vector<2x128xf32>
    %130 = arith.subf %113, %129 : vector<2x128xf32>
    %cst_77 = arith.constant 9.99999974E-6 : f32
    %131 = vector.broadcast %cst_77 : f32 to vector<2x1xf32>
    %132 = arith.addf %128, %131 : vector<2x1xf32>
    %133 = math.rsqrt %132 : vector<2x1xf32>
    %134 = vector.broadcast %133 : vector<2x1xf32> to vector<2x128xf32>
    %135 = arith.mulf %130, %134 : vector<2x128xf32>
    %136 = vector.broadcast %115 : vector<1x128xf32> to vector<2x128xf32>
    %137 = arith.mulf %135, %136 : vector<2x128xf32>
    %138 = vector.broadcast %117 : vector<1x128xf32> to vector<2x128xf32>
    %139 = arith.addf %137, %138 : vector<2x128xf32>
    %c0_78 = arith.constant 0 : index
    %c0_79 = arith.constant 0 : index
    %c0_80 = arith.constant 0 : index
    %140 = vector.load %arg12[%c0_78, %c0_79, %c0_80] : memref<1x128x128xbf16, #tpu.memory_space<vmem>>, vector<1x128x128xbf16>
    %141 = vector.shape_cast %140 : vector<1x128x128xbf16> to vector<128x128xbf16>
    %142 = arith.truncf %139 : vector<2x128xf32> to vector<2x128xbf16>
    %cst_81 = arith.constant dense<0.000000e+00> : vector<2x128xf32>
    %143 = tpu.matmul %142, %141, %cst_81 {dimension_numbers = #tpu.dot_dimension_numbers<[1], [0], [0], [1], [0, 0, 1, 1], [], []>} : vector<2x128xbf16>, vector<128x128xbf16>, vector<2x128xf32> -> vector<2x128xf32>
    %c0_82 = arith.constant 0 : index
    %c0_83 = arith.constant 0 : index
    %c0_84 = arith.constant 0 : index
    %144 = vector.load %arg13[%c0_82, %c0_83, %c0_84] : memref<1x1x128xf32, #tpu.memory_space<vmem>>, vector<1x1x128xf32>
    %145 = vector.shape_cast %144 : vector<1x1x128xf32> to vector<1x128xf32>
    %146 = vector.broadcast %145 : vector<1x128xf32> to vector<2x128xf32>
    %147 = arith.addf %143, %146 : vector<2x128xf32>
    %148 = vector.extract_strided_slice %147 {offsets = [0, 0], sizes = [2, 64], strides = [1, 1]} : vector<2x128xf32> to vector<2x64xf32>
    %c0_85 = arith.constant 0 : index
    %c0_86 = arith.constant 0 : index
    %c0_87 = arith.constant 0 : index
    %c0_88 = arith.constant 0 : index
    %c0_89 = arith.constant 0 : index
    %149 = vector.load %arg32[%c0_85, %c0_86, %c0_87, %c0_88, %c0_89] : memref<1x2x2x4x64xf32, #tpu.memory_space<vmem>>, vector<1x1x2x4x64xf32>
    %150 = vector.shape_cast %149 : vector<1x1x2x4x64xf32> to vector<2x4x64xf32>
    %c0_90 = arith.constant 0 : index
    %c0_91 = arith.constant 0 : index
    %c0_92 = arith.constant 0 : index
    %c0_93 = arith.constant 0 : index
    %c0_94 = arith.constant 0 : index
    %151 = vector.load %arg33[%c0_90, %c0_91, %c0_92, %c0_93, %c0_94] : memref<1x2x2x4x64xf32, #tpu.memory_space<vmem>>, vector<1x1x2x4x64xf32>
    %152 = vector.shape_cast %151 : vector<1x1x2x4x64xf32> to vector<2x4x64xf32>
    %153 = vector.shape_cast %148 : vector<2x64xf32> to vector<2x1x64xf32>
    %154 = vector.broadcast %153 : vector<2x1x64xf32> to vector<2x4x64xf32>
    %155 = arith.mulf %154, %150 : vector<2x4x64xf32>
    %cst_95 = arith.constant dense<0.000000e+00> : vector<2x4xf32>
    %156 = vector.multi_reduction <add>, %155, %cst_95 [2] : vector<2x4x64xf32> to vector<2x4xf32>
    %cst_96 = arith.constant 1.250000e-01 : f32
    %157 = vector.broadcast %cst_96 : f32 to vector<2x4xf32>
    %158 = arith.mulf %156, %157 : vector<2x4xf32>
    %cst_97 = arith.constant dense<0xFF800000> : vector<2xf32>
    %159 = vector.multi_reduction <maximumf>, %158, %cst_97 [1] : vector<2x4xf32> to vector<2xf32>
    %160 = vector.shape_cast %159 : vector<2xf32> to vector<2x1xf32>
    %161 = vector.broadcast %160 : vector<2x1xf32> to vector<2x4xf32>
    %162 = arith.subf %158, %161 : vector<2x4xf32>
    %163 = math.exp %162 : vector<2x4xf32>
    %cst_98 = arith.constant dense<0.000000e+00> : vector<2xf32>
    %164 = vector.multi_reduction <add>, %163, %cst_98 [1] : vector<2x4xf32> to vector<2xf32>
    %165 = vector.shape_cast %164 : vector<2xf32> to vector<2x1xf32>
    %166 = tpu.reciprocal %165 {approx = true} : vector<2x1xf32> -> vector<2x1xf32>
    %167 = vector.broadcast %166 : vector<2x1xf32> to vector<2x4xf32>
    %168 = arith.mulf %163, %167 : vector<2x4xf32>
    %169 = vector.shape_cast %168 : vector<2x4xf32> to vector<2x4x1xf32>
    %170 = vector.broadcast %169 : vector<2x4x1xf32> to vector<2x4x64xf32>
    %171 = arith.mulf %170, %152 : vector<2x4x64xf32>
    %cst_99 = arith.constant dense<0.000000e+00> : vector<2x64xf32>
    %172 = vector.multi_reduction <add>, %171, %cst_99 [1] : vector<2x4x64xf32> to vector<2x64xf32>
    %173 = vector.extract_strided_slice %147 {offsets = [0, 64], sizes = [2, 64], strides = [1, 1]} : vector<2x128xf32> to vector<2x64xf32>
    %c0_100 = arith.constant 0 : index
    %c1_101 = arith.constant 1 : index
    %c0_102 = arith.constant 0 : index
    %c0_103 = arith.constant 0 : index
    %c0_104 = arith.constant 0 : index
    %174 = vector.load %arg32[%c0_100, %c1_101, %c0_102, %c0_103, %c0_104] : memref<1x2x2x4x64xf32, #tpu.memory_space<vmem>>, vector<1x1x2x4x64xf32>
    %175 = vector.shape_cast %174 : vector<1x1x2x4x64xf32> to vector<2x4x64xf32>
    %c0_105 = arith.constant 0 : index
    %c1_106 = arith.constant 1 : index
    %c0_107 = arith.constant 0 : index
    %c0_108 = arith.constant 0 : index
    %c0_109 = arith.constant 0 : index
    %176 = vector.load %arg33[%c0_105, %c1_106, %c0_107, %c0_108, %c0_109] : memref<1x2x2x4x64xf32, #tpu.memory_space<vmem>>, vector<1x1x2x4x64xf32>
    %177 = vector.shape_cast %176 : vector<1x1x2x4x64xf32> to vector<2x4x64xf32>
    %178 = vector.shape_cast %173 : vector<2x64xf32> to vector<2x1x64xf32>
    %179 = vector.broadcast %178 : vector<2x1x64xf32> to vector<2x4x64xf32>
    %180 = arith.mulf %179, %175 : vector<2x4x64xf32>
    %cst_110 = arith.constant dense<0.000000e+00> : vector<2x4xf32>
    %181 = vector.multi_reduction <add>, %180, %cst_110 [2] : vector<2x4x64xf32> to vector<2x4xf32>
    %cst_111 = arith.constant 1.250000e-01 : f32
    %182 = vector.broadcast %cst_111 : f32 to vector<2x4xf32>
    %183 = arith.mulf %181, %182 : vector<2x4xf32>
    %cst_112 = arith.constant dense<0xFF800000> : vector<2xf32>
    %184 = vector.multi_reduction <maximumf>, %183, %cst_112 [1] : vector<2x4xf32> to vector<2xf32>
    %185 = vector.shape_cast %184 : vector<2xf32> to vector<2x1xf32>
    %186 = vector.broadcast %185 : vector<2x1xf32> to vector<2x4xf32>
    %187 = arith.subf %183, %186 : vector<2x4xf32>
    %188 = math.exp %187 : vector<2x4xf32>
    %cst_113 = arith.constant dense<0.000000e+00> : vector<2xf32>
    %189 = vector.multi_reduction <add>, %188, %cst_113 [1] : vector<2x4xf32> to vector<2xf32>
    %190 = vector.shape_cast %189 : vector<2xf32> to vector<2x1xf32>
    %191 = tpu.reciprocal %190 {approx = true} : vector<2x1xf32> -> vector<2x1xf32>
    %192 = vector.broadcast %191 : vector<2x1xf32> to vector<2x4xf32>
    %193 = arith.mulf %188, %192 : vector<2x4xf32>
    %194 = vector.shape_cast %193 : vector<2x4xf32> to vector<2x4x1xf32>
    %195 = vector.broadcast %194 : vector<2x4x1xf32> to vector<2x4x64xf32>
    %196 = arith.mulf %195, %177 : vector<2x4x64xf32>
    %cst_114 = arith.constant dense<0.000000e+00> : vector<2x64xf32>
    %197 = vector.multi_reduction <add>, %196, %cst_114 [1] : vector<2x4x64xf32> to vector<2x64xf32>
    %198 = tpu.concatenate %172, %197 in 1 : vector<2x64xf32>, vector<2x64xf32> -> vector<2x128xf32>
    %c0_115 = arith.constant 0 : index
    %c0_116 = arith.constant 0 : index
    %c0_117 = arith.constant 0 : index
    %199 = vector.load %arg16[%c0_115, %c0_116, %c0_117] : memref<1x128x128xbf16, #tpu.memory_space<vmem>>, vector<1x128x128xbf16>
    %200 = vector.shape_cast %199 : vector<1x128x128xbf16> to vector<128x128xbf16>
    %201 = arith.truncf %198 : vector<2x128xf32> to vector<2x128xbf16>
    %cst_118 = arith.constant dense<0.000000e+00> : vector<2x128xf32>
    %202 = tpu.matmul %201, %200, %cst_118 {dimension_numbers = #tpu.dot_dimension_numbers<[1], [0], [0], [1], [0, 0, 1, 1], [], []>} : vector<2x128xbf16>, vector<128x128xbf16>, vector<2x128xf32> -> vector<2x128xf32>
    %203 = arith.addf %139, %202 : vector<2x128xf32>
    %c0_119 = arith.constant 0 : index
    %c0_120 = arith.constant 0 : index
    %c0_121 = arith.constant 0 : index
    %204 = vector.load %arg17[%c0_119, %c0_120, %c0_121] : memref<1x1x128xf32, #tpu.memory_space<vmem>>, vector<1x1x128xf32>
    %205 = vector.shape_cast %204 : vector<1x1x128xf32> to vector<1x128xf32>
    %206 = vector.broadcast %205 : vector<1x128xf32> to vector<2x128xf32>
    %207 = arith.addf %203, %206 : vector<2x128xf32>
    %c0_122 = arith.constant 0 : index
    %c0_123 = arith.constant 0 : index
    %c0_124 = arith.constant 0 : index
    %208 = vector.load %arg18[%c0_122, %c0_123, %c0_124] : memref<1x1x128xf32, #tpu.memory_space<vmem>>, vector<1x1x128xf32>
    %209 = vector.shape_cast %208 : vector<1x1x128xf32> to vector<1x128xf32>
    %c0_125 = arith.constant 0 : index
    %c0_126 = arith.constant 0 : index
    %c0_127 = arith.constant 0 : index
    %210 = vector.load %arg19[%c0_125, %c0_126, %c0_127] : memref<1x1x128xf32, #tpu.memory_space<vmem>>, vector<1x1x128xf32>
    %211 = vector.shape_cast %210 : vector<1x1x128xf32> to vector<1x128xf32>
    %cst_128 = arith.constant dense<0.000000e+00> : vector<2xf32>
    %212 = vector.multi_reduction <add>, %207, %cst_128 [1] : vector<2x128xf32> to vector<2xf32>
    %213 = vector.shape_cast %212 : vector<2xf32> to vector<2x1xf32>
    %cst_129 = arith.constant 1.280000e+02 : f32
    %214 = vector.broadcast %cst_129 : f32 to vector<2x1xf32>
    %215 = arith.divf %213, %214 : vector<2x1xf32>
    %216 = vector.broadcast %215 : vector<2x1xf32> to vector<2x128xf32>
    %217 = arith.subf %207, %216 : vector<2x128xf32>
    %218 = arith.mulf %217, %217 : vector<2x128xf32>
    %cst_130 = arith.constant dense<0.000000e+00> : vector<2xf32>
    %219 = vector.multi_reduction <add>, %218, %cst_130 [1] : vector<2x128xf32> to vector<2xf32>
    %220 = vector.shape_cast %219 : vector<2xf32> to vector<2x1xf32>
    %cst_131 = arith.constant 1.280000e+02 : f32
    %221 = vector.broadcast %cst_131 : f32 to vector<2x1xf32>
    %222 = arith.divf %220, %221 : vector<2x1xf32>
    %223 = vector.broadcast %215 : vector<2x1xf32> to vector<2x128xf32>
    %224 = arith.subf %207, %223 : vector<2x128xf32>
    %cst_132 = arith.constant 9.99999974E-6 : f32
    %225 = vector.broadcast %cst_132 : f32 to vector<2x1xf32>
    %226 = arith.addf %222, %225 : vector<2x1xf32>
    %227 = math.rsqrt %226 : vector<2x1xf32>
    %228 = vector.broadcast %227 : vector<2x1xf32> to vector<2x128xf32>
    %229 = arith.mulf %224, %228 : vector<2x128xf32>
    %230 = vector.broadcast %209 : vector<1x128xf32> to vector<2x128xf32>
    %231 = arith.mulf %229, %230 : vector<2x128xf32>
    %232 = vector.broadcast %211 : vector<1x128xf32> to vector<2x128xf32>
    %233 = arith.addf %231, %232 : vector<2x128xf32>
    %c0_133 = arith.constant 0 : index
    %c0_134 = arith.constant 0 : index
    %c0_135 = arith.constant 0 : index
    %234 = vector.load %arg20[%c0_133, %c0_134, %c0_135] : memref<1x128x256xbf16, #tpu.memory_space<vmem>>, vector<1x128x256xbf16>
    %235 = vector.shape_cast %234 : vector<1x128x256xbf16> to vector<128x256xbf16>
    %236 = arith.truncf %233 : vector<2x128xf32> to vector<2x128xbf16>
    %cst_136 = arith.constant dense<0.000000e+00> : vector<2x256xf32>
    %237 = tpu.matmul %236, %235, %cst_136 {dimension_numbers = #tpu.dot_dimension_numbers<[1], [0], [0], [1], [0, 0, 1, 1], [], []>} : vector<2x128xbf16>, vector<128x256xbf16>, vector<2x256xf32> -> vector<2x256xf32>
    %c0_137 = arith.constant 0 : index
    %c0_138 = arith.constant 0 : index
    %c0_139 = arith.constant 0 : index
    %238 = vector.load %arg21[%c0_137, %c0_138, %c0_139] : memref<1x1x256xf32, #tpu.memory_space<vmem>>, vector<1x1x256xf32>
    %239 = vector.shape_cast %238 : vector<1x1x256xf32> to vector<1x256xf32>
    %240 = vector.broadcast %239 : vector<1x256xf32> to vector<2x256xf32>
    %241 = arith.addf %237, %240 : vector<2x256xf32>
    %cst_140 = arith.constant 0.000000e+00 : f32
    %242 = vector.broadcast %cst_140 : f32 to vector<2x256xf32>
    %243 = arith.maximumf %241, %242 : vector<2x256xf32>
    %c0_141 = arith.constant 0 : index
    %c0_142 = arith.constant 0 : index
    %c0_143 = arith.constant 0 : index
    %244 = vector.load %arg22[%c0_141, %c0_142, %c0_143] : memref<1x256x128xbf16, #tpu.memory_space<vmem>>, vector<1x256x128xbf16>
    %245 = vector.shape_cast %244 : vector<1x256x128xbf16> to vector<256x128xbf16>
    %246 = arith.truncf %243 : vector<2x256xf32> to vector<2x256xbf16>
    %cst_144 = arith.constant dense<0.000000e+00> : vector<2x128xf32>
    %247 = tpu.matmul %246, %245, %cst_144 {dimension_numbers = #tpu.dot_dimension_numbers<[1], [0], [0], [1], [0, 0, 1, 1], [], []>} : vector<2x256xbf16>, vector<256x128xbf16>, vector<2x128xf32> -> vector<2x128xf32>
    %248 = arith.addf %233, %247 : vector<2x128xf32>
    %c0_145 = arith.constant 0 : index
    %c0_146 = arith.constant 0 : index
    %c0_147 = arith.constant 0 : index
    %249 = vector.load %arg23[%c0_145, %c0_146, %c0_147] : memref<1x1x128xf32, #tpu.memory_space<vmem>>, vector<1x1x128xf32>
    %250 = vector.shape_cast %249 : vector<1x1x128xf32> to vector<1x128xf32>
    %251 = vector.broadcast %250 : vector<1x128xf32> to vector<2x128xf32>
    %252 = arith.addf %248, %251 : vector<2x128xf32>
    %c0_148 = arith.constant 0 : index
    %c0_149 = arith.constant 0 : index
    %c0_150 = arith.constant 0 : index
    %253 = vector.load %arg24[%c0_148, %c0_149, %c0_150] : memref<1x1x128xf32, #tpu.memory_space<vmem>>, vector<1x1x128xf32>
    %254 = vector.shape_cast %253 : vector<1x1x128xf32> to vector<1x128xf32>
    %c0_151 = arith.constant 0 : index
    %c0_152 = arith.constant 0 : index
    %c0_153 = arith.constant 0 : index
    %255 = vector.load %arg25[%c0_151, %c0_152, %c0_153] : memref<1x1x128xf32, #tpu.memory_space<vmem>>, vector<1x1x128xf32>
    %256 = vector.shape_cast %255 : vector<1x1x128xf32> to vector<1x128xf32>
    %cst_154 = arith.constant dense<0.000000e+00> : vector<2xf32>
    %257 = vector.multi_reduction <add>, %252, %cst_154 [1] : vector<2x128xf32> to vector<2xf32>
    %258 = vector.shape_cast %257 : vector<2xf32> to vector<2x1xf32>
    %cst_155 = arith.constant 1.280000e+02 : f32
    %259 = vector.broadcast %cst_155 : f32 to vector<2x1xf32>
    %260 = arith.divf %258, %259 : vector<2x1xf32>
    %261 = vector.broadcast %260 : vector<2x1xf32> to vector<2x128xf32>
    %262 = arith.subf %252, %261 : vector<2x128xf32>
    %263 = arith.mulf %262, %262 : vector<2x128xf32>
    %cst_156 = arith.constant dense<0.000000e+00> : vector<2xf32>
    %264 = vector.multi_reduction <add>, %263, %cst_156 [1] : vector<2x128xf32> to vector<2xf32>
    %265 = vector.shape_cast %264 : vector<2xf32> to vector<2x1xf32>
    %cst_157 = arith.constant 1.280000e+02 : f32
    %266 = vector.broadcast %cst_157 : f32 to vector<2x1xf32>
    %267 = arith.divf %265, %266 : vector<2x1xf32>
    %268 = vector.broadcast %260 : vector<2x1xf32> to vector<2x128xf32>
    %269 = arith.subf %252, %268 : vector<2x128xf32>
    %cst_158 = arith.constant 9.99999974E-6 : f32
    %270 = vector.broadcast %cst_158 : f32 to vector<2x1xf32>
    %271 = arith.addf %267, %270 : vector<2x1xf32>
    %272 = math.rsqrt %271 : vector<2x1xf32>
    %273 = vector.broadcast %272 : vector<2x1xf32> to vector<2x128xf32>
    %274 = arith.mulf %269, %273 : vector<2x128xf32>
    %275 = vector.broadcast %254 : vector<1x128xf32> to vector<2x128xf32>
    %276 = arith.mulf %274, %275 : vector<2x128xf32>
    %277 = vector.broadcast %256 : vector<1x128xf32> to vector<2x128xf32>
    %278 = arith.addf %276, %277 : vector<2x128xf32>
    %c0_159 = arith.constant 0 : index
    %c0_160 = arith.constant 0 : index
    %279 = vector.load %arg26[%c0_159, %c0_160] : memref<128x128xbf16, #tpu.memory_space<vmem>>, vector<128x128xbf16>
    %280 = arith.truncf %278 : vector<2x128xf32> to vector<2x128xbf16>
    %cst_161 = arith.constant dense<0.000000e+00> : vector<2x128xf32>
    %281 = tpu.matmul %280, %279, %cst_161 {dimension_numbers = #tpu.dot_dimension_numbers<[1], [0], [0], [1], [0, 0, 1, 1], [], []>} : vector<2x128xbf16>, vector<128x128xbf16>, vector<2x128xf32> -> vector<2x128xf32>
    %c0_162 = arith.constant 0 : index
    %c0_163 = arith.constant 0 : index
    %282 = vector.load %arg27[%c0_162, %c0_163] : memref<1x128xf32, #tpu.memory_space<vmem>>, vector<1x128xf32>
    %283 = vector.broadcast %282 : vector<1x128xf32> to vector<2x128xf32>
    %284 = arith.addf %281, %283 : vector<2x128xf32>
    %285 = tpu.iota {dimensions = array<i32: 1>} : vector<2x128xi32>
    %cst_164 = arith.constant dense<0xFF800000> : vector<2xf32>
    %286 = vector.multi_reduction <maximumf>, %284, %cst_164 [1] : vector<2x128xf32> to vector<2xf32>
    %287 = vector.shape_cast %286 : vector<2xf32> to vector<2x1xf32>
    %288 = vector.broadcast %287 : vector<2x1xf32> to vector<2x128xf32>
    %289 = arith.cmpf oge, %284, %288 : vector<2x128xf32>
    %c128_i32 = arith.constant 128 : i32
    %290 = vector.broadcast %c128_i32 : i32 to vector<2x128xi32>
    %291 = arith.select %289, %285, %290 : vector<2x128xi1>, vector<2x128xi32>
    %cst_165 = arith.constant dense<2147483647> : vector<2xi32>
    %292 = vector.multi_reduction <minsi>, %291, %cst_165 [1] : vector<2x128xi32> to vector<2xi32>
    %293 = vector.shape_cast %292 : vector<2xi32> to vector<2x1xi32>
    %294 = vector.broadcast %293 : vector<2x1xi32> to vector<2x128xi32>
    %295 = arith.cmpi eq, %285, %294 : vector<2x128xi32>
    %296 = arith.extui %295 : vector<2x128xi1> to vector<2x128xi32>
    %297 = arith.sitofp %296 : vector<2x128xi32> to vector<2x128xf32>
    %c0_166 = arith.constant 0 : index
    %c0_167 = arith.constant 0 : index
    %298 = vector.load %arg29[%c0_166, %c0_167] : memref<2x128xf32, #tpu.memory_space<vmem>>, vector<2x128xf32>
    tpu.vector_store %arg29[%c0_166, %c0_167], %297 {strides = array<i32>} : memref<2x128xf32, #tpu.memory_space<vmem>>, vector<2x128xf32>,
    %299 = vector.shape_cast %297 : vector<2x128xf32> to vector<1x2x128xf32>
    %c1_i32 = arith.constant 1 : i32
    %300 = arith.addi %arg0, %c1_i32 : i32
    %301 = arith.index_cast %300 : i32 to index
    %c0_168 = arith.constant 0 : index
    %c0_169 = arith.constant 0 : index
    %302 = vector.load %arg28[%301, %c0_168, %c0_169] : memref<8x2x128xf32, #tpu.memory_space<vmem>>, vector<1x2x128xf32>
    tpu.vector_store %arg28[%301, %c0_168, %c0_169], %299 {strides = array<i32>} : memref<8x2x128xf32, #tpu.memory_space<vmem>>, vector<1x2x128xf32>,
    return
  }
  func.func @transform_0(%arg0: i32) -> (i32, i32) {
    %c0_i32 = arith.constant 0 : i32
    %c0_i32_0 = arith.constant 0 : i32
    %c0_i32_1 = arith.constant 0 : i32
    return %c0_i32, %c0_i32_0 : i32, i32
  }
  func.func @transform_1(%arg0: i32) -> (i32, i32) {
    %c0_i32 = arith.constant 0 : i32
    %c0_i32_0 = arith.constant 0 : i32
    %c0_i32_1 = arith.constant 0 : i32
    return %c0_i32, %c0_i32_0 : i32, i32
  }
  func.func @transform_2(%arg0: i32) -> (i32, i32) {
    %c0_i32 = arith.constant 0 : i32
    %c0_i32_0 = arith.constant 0 : i32
    %c0_i32_1 = arith.constant 0 : i32
    return %c0_i32, %c0_i32_0 : i32, i32
  }
  func.func @transform_3(%arg0: i32) -> (i32, i32) {
    %c0_i32 = arith.constant 0 : i32
    %c0_i32_0 = arith.constant 0 : i32
    %c0_i32_1 = arith.constant 0 : i32
    return %c0_i32, %c0_i32_0 : i32, i32
  }
  func.func @transform_4(%arg0: i32) -> (i32, i32) {
    %c0_i32 = arith.constant 0 : i32
    %c0_i32_0 = arith.constant 0 : i32
    %c0_i32_1 = arith.constant 0 : i32
    return %c0_i32, %c0_i32_0 : i32, i32
  }
  func.func @transform_5(%arg0: i32) -> (i32, i32, i32) {
    %c0_i32 = arith.constant 0 : i32
    %c0_i32_0 = arith.constant 0 : i32
    %c0_i32_1 = arith.constant 0 : i32
    %c0_i32_2 = arith.constant 0 : i32
    return %c0_i32, %c0_i32_0, %c0_i32_1 : i32, i32, i32
  }
  func.func @transform_6(%arg0: i32) -> (i32, i32, i32) {
    %c0_i32 = arith.constant 0 : i32
    %c0_i32_0 = arith.constant 0 : i32
    %c0_i32_1 = arith.constant 0 : i32
    %c0_i32_2 = arith.constant 0 : i32
    return %c0_i32, %c0_i32_0, %c0_i32_1 : i32, i32, i32
  }
  func.func @transform_7(%arg0: i32) -> (i32, i32, i32) {
    %c0_i32 = arith.constant 0 : i32
    %c0_i32_0 = arith.constant 0 : i32
    %c0_i32_1 = arith.constant 0 : i32
    %c0_i32_2 = arith.constant 0 : i32
    return %c0_i32, %c0_i32_0, %c0_i32_1 : i32, i32, i32
  }
  func.func @transform_8(%arg0: i32) -> (i32, i32, i32) {
    %c0_i32 = arith.constant 0 : i32
    %c0_i32_0 = arith.constant 0 : i32
    %c0_i32_1 = arith.constant 0 : i32
    %c0_i32_2 = arith.constant 0 : i32
    return %c0_i32, %c0_i32_0, %c0_i32_1 : i32, i32, i32
  }
  func.func @transform_9(%arg0: i32) -> (i32, i32, i32) {
    %c0_i32 = arith.constant 0 : i32
    %c0_i32_0 = arith.constant 0 : i32
    %c0_i32_1 = arith.constant 0 : i32
    %c0_i32_2 = arith.constant 0 : i32
    return %c0_i32, %c0_i32_0, %c0_i32_1 : i32, i32, i32
  }
  func.func @transform_10(%arg0: i32) -> (i32, i32, i32) {
    %c0_i32 = arith.constant 0 : i32
    %c0_i32_0 = arith.constant 0 : i32
    %c0_i32_1 = arith.constant 0 : i32
    %c0_i32_2 = arith.constant 0 : i32
    return %c0_i32, %c0_i32_0, %c0_i32_1 : i32, i32, i32
  }
  func.func @transform_11(%arg0: i32) -> (i32, i32, i32) {
    %c0_i32 = arith.constant 0 : i32
    %c0_i32_0 = arith.constant 0 : i32
    %c0_i32_1 = arith.constant 0 : i32
    %c0_i32_2 = arith.constant 0 : i32
    return %c0_i32, %c0_i32_0, %c0_i32_1 : i32, i32, i32
  }
  func.func @transform_12(%arg0: i32) -> (i32, i32, i32) {
    %c0_i32 = arith.constant 0 : i32
    %c0_i32_0 = arith.constant 0 : i32
    %c0_i32_1 = arith.constant 0 : i32
    %c0_i32_2 = arith.constant 0 : i32
    return %c0_i32, %c0_i32_0, %c0_i32_1 : i32, i32, i32
  }
  func.func @transform_13(%arg0: i32) -> (i32, i32, i32) {
    %c0_i32 = arith.constant 0 : i32
    %c0_i32_0 = arith.constant 0 : i32
    %c0_i32_1 = arith.constant 0 : i32
    %c0_i32_2 = arith.constant 0 : i32
    return %c0_i32, %c0_i32_0, %c0_i32_1 : i32, i32, i32
  }
  func.func @transform_14(%arg0: i32) -> (i32, i32, i32) {
    %c0_i32 = arith.constant 0 : i32
    %c0_i32_0 = arith.constant 0 : i32
    %c0_i32_1 = arith.constant 0 : i32
    %c0_i32_2 = arith.constant 0 : i32
    return %c0_i32, %c0_i32_0, %c0_i32_1 : i32, i32, i32
  }
  func.func @transform_15(%arg0: i32) -> (i32, i32, i32) {
    %c0_i32 = arith.constant 0 : i32
    %c0_i32_0 = arith.constant 0 : i32
    %c0_i32_1 = arith.constant 0 : i32
    %c0_i32_2 = arith.constant 0 : i32
    return %c0_i32, %c0_i32_0, %c0_i32_1 : i32, i32, i32
  }
  func.func @transform_16(%arg0: i32) -> (i32, i32, i32) {
    %c0_i32 = arith.constant 0 : i32
    %c0_i32_0 = arith.constant 0 : i32
    %c0_i32_1 = arith.constant 0 : i32
    %c0_i32_2 = arith.constant 0 : i32
    return %c0_i32, %c0_i32_0, %c0_i32_1 : i32, i32, i32
  }
  func.func @transform_17(%arg0: i32) -> (i32, i32, i32) {
    %c0_i32 = arith.constant 0 : i32
    %c0_i32_0 = arith.constant 0 : i32
    %c0_i32_1 = arith.constant 0 : i32
    %c0_i32_2 = arith.constant 0 : i32
    return %c0_i32, %c0_i32_0, %c0_i32_1 : i32, i32, i32
  }
  func.func @transform_18(%arg0: i32) -> (i32, i32, i32) {
    %c0_i32 = arith.constant 0 : i32
    %c0_i32_0 = arith.constant 0 : i32
    %c0_i32_1 = arith.constant 0 : i32
    %c0_i32_2 = arith.constant 0 : i32
    return %c0_i32, %c0_i32_0, %c0_i32_1 : i32, i32, i32
  }
  func.func @transform_19(%arg0: i32) -> (i32, i32, i32) {
    %c0_i32 = arith.constant 0 : i32
    %c0_i32_0 = arith.constant 0 : i32
    %c0_i32_1 = arith.constant 0 : i32
    %c0_i32_2 = arith.constant 0 : i32
    return %c0_i32, %c0_i32_0, %c0_i32_1 : i32, i32, i32
  }
  func.func @transform_20(%arg0: i32) -> (i32, i32, i32) {
    %c0_i32 = arith.constant 0 : i32
    %c0_i32_0 = arith.constant 0 : i32
    %c0_i32_1 = arith.constant 0 : i32
    %c0_i32_2 = arith.constant 0 : i32
    return %c0_i32, %c0_i32_0, %c0_i32_1 : i32, i32, i32
  }
  func.func @transform_21(%arg0: i32) -> (i32, i32, i32) {
    %c0_i32 = arith.constant 0 : i32
    %c0_i32_0 = arith.constant 0 : i32
    %c0_i32_1 = arith.constant 0 : i32
    %c0_i32_2 = arith.constant 0 : i32
    return %c0_i32, %c0_i32_0, %c0_i32_1 : i32, i32, i32
  }
  func.func @transform_22(%arg0: i32) -> (i32, i32, i32) {
    %c0_i32 = arith.constant 0 : i32
    %c0_i32_0 = arith.constant 0 : i32
    %c0_i32_1 = arith.constant 0 : i32
    %c0_i32_2 = arith.constant 0 : i32
    return %c0_i32, %c0_i32_0, %c0_i32_1 : i32, i32, i32
  }
  func.func @transform_23(%arg0: i32) -> (i32, i32, i32) {
    %c0_i32 = arith.constant 0 : i32
    %c0_i32_0 = arith.constant 0 : i32
    %c0_i32_1 = arith.constant 0 : i32
    %c0_i32_2 = arith.constant 0 : i32
    return %c0_i32, %c0_i32_0, %c0_i32_1 : i32, i32, i32
  }
  func.func @transform_24(%arg0: i32) -> (i32, i32, i32) {
    %c0_i32 = arith.constant 0 : i32
    %c0_i32_0 = arith.constant 0 : i32
    %c0_i32_1 = arith.constant 0 : i32
    %c0_i32_2 = arith.constant 0 : i32
    return %c0_i32, %c0_i32_0, %c0_i32_1 : i32, i32, i32
  }
  func.func @transform_25(%arg0: i32) -> (i32, i32) {
    %c0_i32 = arith.constant 0 : i32
    %c0_i32_0 = arith.constant 0 : i32
    %c0_i32_1 = arith.constant 0 : i32
    return %c0_i32, %c0_i32_0 : i32, i32
  }
  func.func @transform_26(%arg0: i32) -> (i32, i32) {
    %c0_i32 = arith.constant 0 : i32
    %c0_i32_0 = arith.constant 0 : i32
    %c0_i32_1 = arith.constant 0 : i32
    return %c0_i32, %c0_i32_0 : i32, i32
  }
  func.func @transform_27(%arg0: i32) -> (i32, i32, i32) {
    %c0_i32 = arith.constant 0 : i32
    %c0_i32_0 = arith.constant 0 : i32
    %c0_i32_1 = arith.constant 0 : i32
    %c0_i32_2 = arith.constant 0 : i32
    return %c0_i32, %c0_i32_0, %c0_i32_1 : i32, i32, i32
  }
}

</mosaic_0001>

<bundles_post_ra>
// kernel: forward.3
= control target key start
LH: loop header
LB: loop body
LE: loop exit
PB: predicated region body
PF: predicated region fallthrough
CT: control target
= control target key end

     0   :  { %v203_v0 = vmov 0   ;;  %vm125_vm0 = vcmask 523264   ;;  %s280_s1 = inlined_call_operand.vmem [shape: bf16[192,128], index: 1, kind: input, shape index: {}]   ;;  %s281_s0 = inlined_call_operand.vmem [shape: f32[8,192], index: 0, kind: input, shape index: {}]   ;;  %s282_s2 = inlined_call_operand.vmem [shape: f32[1,128], index: 2, kind: input, shape index: {}]   ;;  %s283_s3 = inlined_call_operand.vmem [shape: f32[8,128], index: 3, kind: input, shape index: {}]   ;;  %s284_s4 = inlined_call_operand.vmem [shape: f32[8,128], index: 4, kind: output, shape index: {}]  }
   0x1   :  { %129 = vmatprep.subr.bf16.mxu0 %v203_v0  ;;  %v191_v1 = vld [vmem:[%s280_s1] sm:$0xff]   ;;  %v192_v2 = vld [vmem:[%s280_s1 + $0x8] sm:$0xff]   ;;  %v193_v3 = vld [vmem:[%s280_s1 + $0x10] sm:$0xff]  }
   0x2   :  { %130 = vmatpush1.bf16.msra.mxu0 %v191_v1  ;;  %v194_v4 = vld [vmem:[%s280_s1 + $0x18] sm:$0xff]   ;;  %v19_v5 = vld [vmem:[%s281_s0 + $0x8] sm:$0xff]  ;;  %v195_v7 = vld [vmem:[%s280_s1 + $0x20] sm:$0xff]  }
   0x3   :  { %131 = vmatprep.subr.bf16.mxu0 %v203_v0  ;;  %v45_v6 = vpack.c.bf16 %v19_v5, %v19_v5  ;;  %v196_v8 = vld [vmem:[%s280_s1 + $0x28] sm:$0xff]   ;;  %v197_v9 = vld [vmem:[%s280_s1 + $0x30] sm:$0xff]   ;;  %v198_v10 = vld [vmem:[%s280_s1 + $0x38] sm:$0xff]  }
   0x4   :  { %v199_v11 = vld [vmem:[%s280_s1 + $0x40] sm:$0xff]   ;;  %v200_v12 = vld [vmem:[%s280_s1 + $0x48] sm:$0xff]   ;;  %v201_v13 = vld [vmem:[%s280_s1 + $0x50] sm:$0xff]  }
   0x5   :  { %189 = vmatprep.mubr.msk.bf16.mxu0 %vm125_vm0, %v45_v6  ;;  %v202_v14 = vld [vmem:[%s280_s1 + $0x58] sm:$0xff]   ;;  %v18_v15 = vld [vmem:[%s281_s0] sm:$0xff] }
   0x6   :  { %132 = vmatpush1.bf16.msra.mxu0 %v192_v2  ;;  %v44_v16 = vpack.c.bf16 %v18_v15, %v18_v15  ;;  %v176_v17 = vld [vmem:[%s282_s2] ss:$0 sm:$0xff] }
   0x7   :  { %133 = vmatprep.subr.bf16.mxu0 %v203_v0  ;;  %v169_v19 = vld [vmem:[%s283_s3] sm:$0xff] }
   0xa   :  { %134 = vmatpush1.bf16.msra.mxu0 %v193_v3 }
   0xb   :  { %135 = vmatprep.subr.bf16.mxu0 %v203_v0 }
   0xe   :  { %136 = vmatpush1.bf16.msra.mxu0 %v194_v4 }
   0xf   :  { %137 = vmatprep.subr.bf16.mxu0 %v203_v0 }
  0x12   :  { %138 = vmatpush1.bf16.msra.mxu0 %v195_v7 }
  0x13   :  { %139 = vmatprep.subr.bf16.mxu0 %v203_v0 }
  0x16   :  { %140 = vmatpush1.bf16.msra.mxu0 %v196_v8 }
  0x17   :  { %141 = vmatprep.subr.bf16.mxu0 %v203_v0 }
  0x1a   :  { %142 = vmatpush1.bf16.msra.mxu0 %v197_v9 }
  0x1b   :  { %143 = vmatprep.subr.bf16.mxu0 %v203_v0 }
  0x1e   :  { %144 = vmatpush1.bf16.msra.mxu0 %v198_v10 }
  0x1f   :  { %145 = vmatprep.subr.bf16.mxu0 %v203_v0 }
  0x22   :  { %146 = vmatpush1.bf16.msra.mxu0 %v199_v11 }
  0x23   :  { %147 = vmatprep.subr.bf16.mxu0 %v203_v0 }
  0x26   :  { %148 = vmatpush1.bf16.msra.mxu0 %v200_v12 }
  0x27   :  { %149 = vmatprep.subr.bf16.mxu0 %v203_v0 }
  0x2a   :  { %150 = vmatpush1.bf16.msra.mxu0 %v201_v13 }
  0x2b   :  { %151 = vmatprep.subr.bf16.mxu0 %v203_v0 }
  0x2e   :  { %152 = vmatpush1.bf16.msra.mxu0 %v202_v14 }
  0x31   :  { %162 = vmatmul.mubr.bf16.vlgmr.msra.gmra.mrb[0].mxu0 %v44_v16 }
 0x104   :  { %v163_v18 = vpop.f32.mrb[0].mxu0 }
 0x105   :  { %v164_v20 = vadd.f32 %v176_v17, %v163_v18  ;;  %v165_v21 = vpop.f32.mrb[1].mxu0 }
 0x106   :  { %v166_v22 = vpop.f32.mrb[2].mxu0 }
 0x107   :  { %v170_v23 = vadd.f32 %v169_v19, %v164_v20  ;;  %v167_v24 = vpop.f32.mrb[3].mxu0 }
 0x109   :  { %171 = vst [vmem:[%s284_s4] sm:$0xff] %v170_v23 }

// kernel: forward.4
= control target key start
LH: loop header
LB: loop body
LE: loop exit
PB: predicated region body
PF: predicated region fallthrough
CT: control target
= control target key end

     0   :  { %v2290_v1 = vmov 0   ;;  %v81_v19 = vlaneseq  ;;  %v2291_v21 = vmov 1966171168   ;;  %vm354_vm0 = vcmask 519168   ;;  %s2969_s1 = inlined_call_operand.vmem [shape: bf16[128,384], index: 1, kind: input, shape index: {}]   ;;  %s2970_s0 = inlined_call_operand.vmem [shape: f32[8,128], index: 0, kind: input, shape index: {}]   ;;  %s2971_s2 = inlined_call_operand.vmem [shape: f32[1,384], index: 2, kind: input, shape index: {}]   ;;  %s2972_s3 = inlined_call_operand.vmem [shape: bf16[128,128], index: 3, kind: input, shape index: {}]   ;;  %s2973_s4 = inlined_call_operand.vmem [shape: f32[1,128], index: 4, kind: input, shape index: {}]   ;;  %s2974_s7 = inlined_call_operand.vmem [shape: bf16[128,256], index: 7, kind: input, shape index: {}]   ;;  %s2975_s9 = inlined_call_operand.vmem [shape: bf16[256,128], index: 9, kind: input, shape index: {}]   ;;  %s2976_s5 = inlined_call_operand.vmem [shape: f32[1,128], index: 5, kind: input, shape index: {}]   ;;  %s2977_s6 = inlined_call_operand.vmem [shape: f32[1,128], index: 6, kind: input, shape index: {}]   ;;  %s2978_s8 = inlined_call_operand.vmem [shape: f32[1,256], index: 8, kind: input, shape index: {}]   ;;  %s2979_s10 = inlined_call_operand.vmem [shape: f32[1,128], index: 10, kind: input, shape index: {}]   ;;  %s2980_s11 = inlined_call_operand.vmem [shape: f32[1,128], index: 11, kind: input, shape index: {}]   ;;  %s2981_s12 = inlined_call_operand.vmem [shape: f32[1,128], index: 12, kind: input, shape index: {}]   ;;  %s2982_s13 = inlined_call_operand.vmem [shape: f32[8,128], index: 13, kind: output, shape index: {}]  }
   0x1   :  { %v2165_v0 = vld [vmem:[%s2969_s1 + $0x4] ss:$12 sps:$4 sm:$0xff]   ;;  %256 = vmatprep.mubr.bf16.mxu0 %v2290_v1  ;;  %2164 = vset.pattern.permute.xlu0 %v2290_v1  ;;  %v2167_v2 = vld [vmem:[%s2969_s1] ss:$12 sps:$4 sm:$0xff]   ;;  %v2168_v3 = vld [vmem:[%s2969_s1 + $0x1c] ss:$12 sps:$4 sm:$0xff]   ;;  %v307_v22 = vunpack.c.l.s4 %v2291_v21 }
   0x2   :  { %2163 = vset.pattern.permute.xlu1 %v2290_v1  ;;  %224 = vmatprep.subr.bf16.mxu0 %v2165_v0  ;;  %v2170_v4 = vld [vmem:[%s2969_s1 + $0x18] ss:$12 sps:$4 sm:$0xff]   ;;  %v2171_v5 = vld [vmem:[%s2969_s1 + $0x34] ss:$12 sps:$4 sm:$0xff]   ;;  %v2173_v6 = vld [vmem:[%s2969_s1 + $0x30] ss:$12 sps:$4 sm:$0xff]  }
   0x3   :  { %225 = vmatpush1.bf16.msra.mxu0 %v2167_v2  ;;  %v2174_v7 = vld [vmem:[%s2969_s1 + $0x4c] ss:$12 sps:$4 sm:$0xff]   ;;  %v2176_v8 = vld [vmem:[%s2969_s1 + $0x48] ss:$12 sps:$4 sm:$0xff]   ;;  %v2177_v9 = vld [vmem:[%s2969_s1 + $0x64] ss:$12 sps:$4 sm:$0xff]   ;;  %v308_v25 = vunpack.c.0.s8 %v307_v22 }
   0x4   :  { %226 = vmatprep.subr.bf16.mxu0 %v2168_v3  ;;  %v2179_v10 = vld [vmem:[%s2969_s1 + $0x60] ss:$12 sps:$4 sm:$0xff]   ;;  %v2180_v11 = vld [vmem:[%s2969_s1 + $0x7c] ss:$12 sps:$4 sm:$0xff]   ;;  %v2182_v12 = vld [vmem:[%s2969_s1 + $0x78] ss:$12 sps:$4 sm:$0xff]  }
   0x5   :  { %v2183_v13 = vld [vmem:[%s2969_s1 + $0x94] ss:$12 sps:$4 sm:$0xff]   ;;  %v2185_v14 = vld [vmem:[%s2969_s1 + $0x90] ss:$12 sps:$4 sm:$0xff]   ;;  %v2186_v15 = vld [vmem:[%s2969_s1 + $0xac] ss:$12 sps:$4 sm:$0xff]  }
   0x6   :  { %v2188_v16 = vld [vmem:[%s2969_s1 + $0xa8] ss:$12 sps:$4 sm:$0xff]   ;;  %v45_v17 = vld [vmem:[%s2970_s0] sm:$0xff]  ;;  %v2423_v20 = vshrl.u32 %v81_v19, 7  ;;  %vm663_vm1 = vcmask 523268   ;;  %vm393_vm2 = vcmask 1041409  }
   0x7   :  { %227 = vmatpush1.bf16.msra.mxu0 %v2170_v4  ;;  %v2419_v18 = vpack.c.bf16 %v45_v17, %v45_v17  ;;  %v2431_v24 = vld [vmem:[%s2971_s2] sm:$0x7]  ;;  %s2292_s2 = smov 64   ;;  %vm395_vm3 = vcmask 1042434   ;;  %vm397_vm4 = vcmask 1043459   ;;  %vm400_vm5 = vcmask 27648  }
   0x8   :  { %228 = vmatprep.subr.bf16.mxu0 %v2171_v5  ;;  %v2426_v23 = vsub.s32 0, %v2423_v20  ;;  %v2436_v27 = vsub.s32 1, %v2423_v20  ;;  %v311_v28 = vsub.s32 %v308_v25, %v2423_v20  ;;  %vm704_vm6 = vcmask 60448  }
   0x9   :  { %vm2294_vm7 = vmmov 0   ;;  %vm540_vm8 = vcmask 1043456   ;;  %vm537_vm9 = vcmask 31744   ;;  %vm1465_vm10 = vcmask 523264  }
   0xa   :  { %v84_v26 = vrot.slane %v2431_v24, %v2426_v23  ;;  %v88_v32 = vrot.slane %v2431_v24, %v2436_v27 }
   0xb   :  { %229 = vmatpush1.bf16.msra.mxu0 %v2173_v6 }
   0xc   :  { %230 = vmatprep.subr.bf16.mxu0 %v2174_v7 }
   0xf   :  { %231 = vmatpush1.bf16.msra.mxu0 %v2176_v8 }
  0x10   :  { %232 = vmatprep.subr.bf16.mxu0 %v2177_v9 }
  0x13   :  { %233 = vmatpush1.bf16.msra.mxu0 %v2179_v10 }
  0x14   :  { %234 = vmatprep.subr.bf16.mxu0 %v2180_v11 }
  0x17   :  { %235 = vmatpush1.bf16.msra.mxu0 %v2182_v12 }
  0x18   :  { %236 = vmatprep.subr.bf16.mxu0 %v2183_v13 }
  0x1b   :  { %237 = vmatpush1.bf16.msra.mxu0 %v2185_v14 }
  0x1c   :  { %238 = vmatprep.subr.bf16.mxu0 %v2186_v15 }
  0x1f   :  { %239 = vmatpush1.bf16.msra.mxu0 %v2188_v16 }
  0x22   :  { %257 = vmatmul.mubr.bf16.vlgmr.msra.gmra.mrb[0].mxu0 %v2419_v18 }
  0xf5   :  { %v258_v29 = vpop.f32.mrb[0].mxu0 }
  0xf6   :  { %v259_v30 = vadd.f32 %v258_v29, %v84_v26  ;;  %v260_v31 = vpop.f32.mrb[1].mxu0 }
  0xf7   :  { %v262_v33 = vpop.f32.mrb[2].mxu0  ;;  %v261_v40 = vadd.f32 %v260_v31, %v88_v32 }
  0xf8   :  { %v312_v34 = vrot.slane %v259_v30, %v311_v28  ;;  %v614_v35 = vcombine.high %v259_v30, %v259_v30  ;;  %v263_v36 = vpop.f32.mrb[3].mxu0  ;;  %v2474_v33 = vand.u32 127, %v81_v19 }
  0xfa   :  { %v313_v37 = vcombine.high %v312_v34, %v312_v34  ;;  %v320_v38 = vrot.slane %v312_v34, %v311_v28  ;;  %v621_v39 = vrot.slane %v614_v35, %v311_v28  ;;  %v2478_v35 = vsub.s32 %v2474_v33, %v2423_v20 }
  0xfc   :  { %v327_v41 = vrot.slane %v313_v37, %v311_v28  ;;  %v622_v42 = vcombine.high %v621_v39, %v621_v39  ;;  %v629_v43 = vrot.slane %v621_v39, %v311_v28  ;;  %v333_v44 = vrot.slane %v320_v38, %v2426_v23 }
  0xfd   :  { %v328_v45 = vcombine.high %v320_v38, %v320_v38 }
  0xfe   :  { %v350_v46 = vmul.f32 %v333_v44, %v261_v40  ;;  %v337_v47 = vrot.slane %v327_v41, %v2426_v23  ;;  %v329_v48 = vcombine.high %v327_v41, %v327_v41  ;;  %v642_v49 = vrot.slane %v629_v43, %v2426_v23 }
  0xff   :  { %v341_v50 = vrot.slane %v328_v45, %v2426_v23  ;;  %v636_v51 = vrot.slane %v622_v42, %v311_v28  ;;  %v637_v52 = vcombine.high %v629_v43, %v629_v43 }
 0x100   :  { %925 = vrot.lane.b32.xlu0 %v350_v46, %s2292_s2  ;;  %v351_v53 = vmul.f32 %v337_v47, %v261_v40  ;;  %v345_v54 = vrot.slane %v329_v48, %v2426_v23  ;;  %v659_v55 = vmul.f32 %v642_v49, %v261_v40  ;;  %v355_v2 = vsel %vm354_vm0, %v350_v46, 0.0 }
 0x101   :  { %v352_v56 = vmul.f32 %v341_v50, %v261_v40  ;;  %v646_v57 = vrot.slane %v636_v51, %v2426_v23  ;;  %v650_v58 = vrot.slane %v637_v52, %v2426_v23  ;;  %v638_v59 = vcombine.high %v636_v51, %v636_v51 }
 0x102   :  { %v353_v60 = vmul.f32 %v345_v54, %v261_v40  ;;  %v358_v4 = vsel %vm354_vm0, %v351_v53, 0.0  ;;  %v664_v6 = vsel %vm663_vm1, %v659_v55, 0.0 }
 0x103   :  { %929 = vrot.lane.b32.xlu1 %v352_v56, %s2292_s2  ;;  %v660_v61 = vmul.f32 %v646_v57, %v261_v40  ;;  %v661_v62 = vmul.f32 %v650_v58, %v261_v40  ;;  %v654_v63 = vrot.slane %v638_v59, %v2426_v23  ;;  %v361_v3 = vsel %vm354_vm0, %v352_v56, 0.0 }
 0x104   :  { %927 = vrot.lane.b32.xlu0 %v351_v53, %s2292_s2  ;;  %v364_v5 = vsel %vm354_vm0, %v353_v60, 0.0 }
 0x105   :  { %v662_v0 = vmul.f32 %v654_v63, %v261_v40  ;;  %v667_v7 = vsel %vm663_vm1, %v660_v61, 0.0  ;;  %v670_v8 = vsel %vm663_vm1, %v661_v62, 0.0 }
 0x107   :  { %931 = vrot.lane.b32.xlu1 %v353_v60, %s2292_s2  ;;  %v673_v9 = vsel %vm663_vm1, %v662_v0, 0.0 }
 0x108   :  { %1193 = vrot.lane.b32.xlu0 %v659_v55, %s2292_s2 }
 0x10b   :  { %1195 = vrot.lane.b32.xlu1 %v660_v61, %s2292_s2 }
 0x10c   :  { %1197 = vrot.lane.b32.xlu0 %v661_v62, %s2292_s2 }
 0x10f   :  { %1199 = vrot.lane.b32.xlu1 %v662_v0, %s2292_s2 }
 0x12b   :  { %356 = vadd.xlane.f32.xlu0 %v355_v2 }
 0x12f   :  { %362 = vadd.xlane.f32.xlu0 %v361_v3 }
 0x133   :  { %359 = vadd.xlane.f32.xlu1 %v358_v4  ;;  %365 = vadd.xlane.f32.xlu0 %v364_v5 }
 0x137   :  { %665 = vadd.xlane.f32.xlu1 %v664_v6  ;;  %668 = vadd.xlane.f32.xlu0 %v667_v7 }
 0x13b   :  { %671 = vadd.xlane.f32.xlu1 %v670_v8  ;;  %674 = vadd.xlane.f32.xlu0 %v673_v9 }
 0x172   :  { %v926_v10 = vpop.permute.xlu0 %925 }
 0x173   :  { %v937_v11 = vsel %vm354_vm0, %v926_v10, 0.0 }
 0x174   :  { %938 = vadd.xlane.f32.xlu1 %v937_v11 }
 0x175   :  { %v930_v12 = vpop.permute.xlu1 %929 }
 0x176   :  { %v928_v13 = vpop.permute.xlu0 %927  ;;  %v943_v14 = vsel %vm354_vm0, %v930_v12, 0.0 }
 0x177   :  { %v940_v15 = vsel %vm354_vm0, %v928_v13, 0.0 }
 0x178   :  { %944 = vadd.xlane.f32.xlu1 %v943_v14  ;;  %941 = vadd.xlane.f32.xlu0 %v940_v15 }
 0x179   :  { %v932_v16 = vpop.permute.xlu1 %931 }
 0x17a   :  { %v1194_v17 = vpop.permute.xlu0 %1193  ;;  %v946_v22 = vsel %vm354_vm0, %v932_v16, 0.0 }
 0x17b   :  { %v1205_v21 = vsel %vm663_vm1, %v1194_v17, 0.0 }
 0x17c   :  { %1206 = vadd.xlane.f32.xlu1 %v1205_v21  ;;  %947 = vadd.xlane.f32.xlu0 %v946_v22 }
 0x17d   :  { %v1196_v25 = vpop.permute.xlu1 %1195 }
 0x17e   :  { %v1198_v26 = vpop.permute.xlu0 %1197  ;;  %v1208_v29 = vsel %vm663_vm1, %v1196_v25, 0.0 }
 0x17f   :  { %v1211_v28 = vsel %vm663_vm1, %v1198_v26, 0.0 }
 0x180   :  { %1212 = vadd.xlane.f32.xlu1 %v1211_v28  ;;  %1209 = vadd.xlane.f32.xlu0 %v1208_v29 }
 0x181   :  { %v1200_v30 = vpop.permute.xlu1 %1199 }
 0x182   :  { %v1214_v31 = vsel %vm663_vm1, %v1200_v30, 0.0 }
 0x184   :  { %1215 = vadd.xlane.f32.xlu0 %v1214_v31 }
 0x1b8   :  { %v357_v32 = vpop.xlane.xlu0 %356 }
 0x1b9   :  { %v2480_v36 = vmul.f32 0.125, %v357_v32 }
 0x1bb   :  { %v380_v19 = vrot.slane %v2480_v36, %v2478_v35 }
 0x1bc   :  { %v363_v34 = vpop.xlane.xlu0 %362 }
 0x1bd   :  { %v2482_v37 = vmul.f32 0.125, %v363_v34 }
 0x1bf   :  { %v388_v44 = vrot.slane %v2482_v37, %v2478_v35 }
 0x1c0   :  { %v360_v38 = vpop.xlane.xlu1 %359  ;;  %v366_v39 = vpop.xlane.xlu0 %365 }
 0x1c1   :  { %v2484_v40 = vmul.f32 0.125, %v360_v38  ;;  %v2486_v41 = vmul.f32 0.125, %v366_v39 }
 0x1c3   :  { %v384_v42 = vrot.slane %v2484_v40, %v2478_v35  ;;  %v392_v43 = vrot.slane %v2486_v41, %v2478_v35 }
 0x1c4   :  { %v666_v45 = vpop.xlane.xlu1 %665  ;;  %v669_v46 = vpop.xlane.xlu0 %668 }
 0x1c5   :  { %v2496_v47 = vmul.f32 0.125, %v666_v45  ;;  %v2498_v48 = vmul.f32 0.125, %v669_v46  ;;  %v394_v49 = vsel %vm393_vm2, %v384_v42, %v380_v19  ;;  %v2561_v45 = vsub.s32 2, %v2423_v20 }
 0x1c6   :  { %v396_v50 = vsel %vm395_vm3, %v388_v44, %v394_v49  ;;  %v2564_v46 = vsub.s32 3, %v2423_v20 }
 0x1c7   :  { %v398_v51 = vsel %vm397_vm4, %v392_v43, %v396_v50  ;;  %v687_v52 = vrot.slane %v2496_v47, %v2478_v35  ;;  %v691_v53 = vrot.slane %v2498_v48, %v2478_v35 }
 0x1c8   :  { %v672_v54 = vpop.xlane.xlu1 %671  ;;  %v401_v55 = vsel %vm400_vm5, %v398_v51, -inf  ;;  %v675_v56 = vpop.xlane.xlu0 %674 }
 0x1c9   :  { %v2508_v57 = vmul.f32 0.125, %v672_v54  ;;  %402 = vmax.xlane.f32.xlu1 %v401_v55  ;;  %v2510_v58 = vmul.f32 0.125, %v675_v56  ;;  %v700_v61 = vsel %vm393_vm2, %v691_v53, %v687_v52 }
 0x1cb   :  { %v695_v59 = vrot.slane %v2508_v57, %v2478_v35  ;;  %v699_v60 = vrot.slane %v2510_v58, %v2478_v35 }
 0x1cd   :  { %v701_v62 = vsel %vm395_vm3, %v695_v59, %v700_v61 }
 0x1ce   :  { %v702_v63 = vsel %vm397_vm4, %v699_v60, %v701_v62 }
 0x1cf   :  { %v705_v0 = vsel %vm704_vm6, %v702_v63, -inf }
 0x1d0   :  { %706 = vmax.xlane.f32.xlu0 %v705_v0 }
 0x201   :  { %v939_v2 = vpop.xlane.xlu1 %938 }
 0x202   :  { %v2520_v3 = vmul.f32 0.125, %v939_v2 }
 0x204   :  { %v960_v8 = vrot.slane %v2520_v3, %v2478_v35 }
 0x205   :  { %v945_v4 = vpop.xlane.xlu1 %944  ;;  %v942_v5 = vpop.xlane.xlu0 %941 }
 0x206   :  { %v2522_v6 = vmul.f32 0.125, %v945_v4  ;;  %v2524_v7 = vmul.f32 0.125, %v942_v5 }
 0x208   :  { %v964_v9 = vrot.slane %v2524_v7, %v2478_v35  ;;  %v968_v10 = vrot.slane %v2522_v6, %v2478_v35 }
 0x209   :  { %v1207_v11 = vpop.xlane.xlu1 %1206  ;;  %v948_v12 = vpop.xlane.xlu0 %947 }
 0x20a   :  { %v2532_v13 = vmul.f32 0.125, %v948_v12  ;;  %v973_v14 = vsel %vm393_vm2, %v964_v9, %v960_v8  ;;  %v2535_v15 = vmul.f32 0.125, %v1207_v11 }
 0x20b   :  { %v974_v22 = vsel %vm395_vm3, %v968_v10, %v973_v14 }
 0x20c   :  { %v972_v16 = vrot.slane %v2532_v13, %v2478_v35  ;;  %v1228_v30 = vrot.slane %v2535_v15, %v2478_v35 }
 0x20d   :  { %v1213_v17 = vpop.xlane.xlu1 %1212  ;;  %v1210_v21 = vpop.xlane.xlu0 %1209 }
 0x20e   :  { %v2540_v25 = vmul.f32 0.125, %v1213_v17  ;;  %v2542_v26 = vmul.f32 0.125, %v1210_v21  ;;  %v975_v28 = vsel %vm397_vm4, %v972_v16, %v974_v22  ;;  %v2293_v22 = vmov 0.0  }
 0x20f   :  { %v977_v29 = vsel %vm400_vm5, %v975_v28, -inf  ;;  %2098 = vmatprep.subr.bf16.mxu1 %v2293_v22  ;;  %2138 = vmatprep.subr.bf16.mxu0 %v2293_v22 }
 0x210   :  { %v1232_v31 = vrot.slane %v2542_v26, %v2478_v35  ;;  %978 = vmax.xlane.f32.xlu1 %v977_v29  ;;  %v1236_v32 = vrot.slane %v2540_v25, %v2478_v35  ;;  %v2190_v29 = vld [vmem:[%s2969_s1 + $0x20] ss:$12 sps:$4 sm:$0xff]   ;;  %2114 = vmatprep.mubr.msk.bf16.mxu1 %vm2294_vm7, %v2293_v22 }
 0x211   :  { %v1216_v34 = vpop.xlane.xlu0 %1215  ;;  %2154 = vmatprep.mubr.msk.bf16.mxu0 %vm2294_vm7, %v2293_v22 }
 0x212   :  { %v2552_v38 = vmul.f32 0.125, %v1216_v34  ;;  %v1241_v39 = vsel %vm393_vm2, %v1232_v31, %v1228_v30  ;;  %v2191_v30 = vld [vmem:[%s2969_s1 + $0x38] ss:$12 sps:$4 sm:$0xff]   ;;  %v2192_v31 = vld [vmem:[%s2969_s1 + $0x50] ss:$12 sps:$4 sm:$0xff]  }
 0x213   :  { %v1242_v42 = vsel %vm395_vm3, %v1236_v32, %v1241_v39  ;;  %v2193_v32 = vld [vmem:[%s2969_s1 + $0x68] ss:$12 sps:$4 sm:$0xff]   ;;  %v2194_v34 = vld [vmem:[%s2969_s1 + $0x80] ss:$12 sps:$4 sm:$0xff]   ;;  %v2195_v39 = vld [vmem:[%s2969_s1 + $0x98] ss:$12 sps:$4 sm:$0xff]  }
 0x214   :  { %v1240_v19 = vrot.slane %v2552_v38, %v2478_v35 }
 0x216   :  { %v1243_v43 = vsel %vm397_vm4, %v1240_v19, %v1242_v42  ;;  %v2196_v19 = vld [vmem:[%s2969_s1 + $0xb0] ss:$12 sps:$4 sm:$0xff]  }
 0x217   :  { %v1245_v44 = vsel %vm704_vm6, %v1243_v43, -inf }
 0x218   :  { %1246 = vmax.xlane.f32.xlu0 %v1245_v44 }
 0x256   :  { %v403_v49 = vpop.xlane.xlu1 %402 }
 0x257   :  { %v408_v50 = vrot.slane %v403_v49, %v2426_v23  ;;  %v412_v51 = vrot.slane %v403_v49, %v2436_v27  ;;  %v416_v52 = vrot.slane %v403_v49, %v2561_v45  ;;  %v420_v53 = vrot.slane %v403_v49, %v2564_v46 }
 0x259   :  { %v425_v54 = vsub.f32 %v2480_v36, %v408_v50  ;;  %v426_v55 = vsub.f32 %v2484_v40, %v412_v51  ;;  %v427_v56 = vsub.f32 %v2482_v37, %v416_v52  ;;  %v428_v61 = vsub.f32 %v2486_v41, %v420_v53 }
 0x25b   :  { %v429_v59 = vmul.f32 1.442695, %v425_v54  ;;  %v431_v60 = vmul.f32 1.442695, %v426_v55  ;;  %v433_v62 = vmul.f32 1.442695, %v427_v56 }
 0x25c   :  { %v435_v2 = vmul.f32 1.442695, %v428_v61 }
 0x25d   :  { %2245 = vpow2.f32 %v429_v59  ;;  %v707_v63 = vpop.xlane.xlu0 %706 }
 0x25e   :  { %2247 = vpow2.f32 %v431_v60  ;;  %v712_v0 = vrot.slane %v707_v63, %v2426_v23  ;;  %v716_v4 = vrot.slane %v707_v63, %v2436_v27  ;;  %v720_v40 = vrot.slane %v707_v63, %v2561_v45 }
 0x25f   :  { %2249 = vpow2.f32 %v433_v62  ;;  %v724_v9 = vrot.slane %v707_v63, %v2564_v46 }
 0x260   :  { %v729_v36 = vsub.f32 %v2496_v47, %v712_v0  ;;  %2251 = vpow2.f32 %v435_v2  ;;  %v730_v37 = vsub.f32 %v2498_v48, %v716_v4  ;;  %v731_v10 = vsub.f32 %v2508_v57, %v720_v40 }
 0x261   :  { %v732_v48 = vsub.f32 %v2510_v58, %v724_v9  ;;  %v2189_v58 = vld [vmem:[%s2969_s1 + $0x8] ss:$12 sps:$4 sm:$0xff]  }
 0x262   :  { %v733_v5 = vmul.f32 1.442695, %v729_v36  ;;  %v735_v11 = vmul.f32 1.442695, %v730_v37  ;;  %v737_v12 = vmul.f32 1.442695, %v731_v10  ;;  %2099 = vmatpush3.bf16.msra.mxu1 %v2189_v58 }
 0x263   :  { %v739_v16 = vmul.f32 1.442695, %v732_v48  ;;  %2100 = vmatprep.subr.bf16.mxu1 %v2293_v22 }
 0x264   :  { %2253 = vpow2.f32 %v733_v5 }
 0x265   :  { %2255 = vpow2.f32 %v735_v11 }
 0x266   :  { %2257 = vpow2.f32 %v737_v12  ;;  %2101 = vmatpush3.bf16.msra.mxu1 %v2190_v29 }
 0x267   :  { %v2579_v8 = vpop.eup %2245  ;;  %2259 = vpow2.f32 %v739_v16  ;;  %2102 = vmatprep.subr.bf16.mxu1 %v2293_v22 }
 0x268   :  { %v2581_v41 = vpop.eup %2247  ;;  %442 = vperm.xlu1 %2163, %v2579_v8  }
 0x269   :  { %445 = vperm.xlu0 %2164, %v2581_v41   ;;  %v2587_v47 = vpop.eup %2249 }
 0x26a   :  { %v2591_v14 = vpop.eup %2251  ;;  %2103 = vmatpush3.bf16.msra.mxu1 %v2191_v30 }
 0x26b   :  { %2104 = vmatprep.subr.bf16.mxu1 %v2293_v22 }
 0x26c   :  { %448 = vperm.xlu1 %2163, %v2587_v47  }
 0x26e   :  { %v2594_v17 = vpop.eup %2253  ;;  %2105 = vmatpush3.bf16.msra.mxu1 %v2192_v31 }
 0x26f   :  { %v2597_v57 = vpop.eup %2255  ;;  %2106 = vmatprep.subr.bf16.mxu1 %v2293_v22 }
 0x270   :  { %451 = vperm.xlu1 %2163, %v2591_v14   ;;  %v2600_v21 = vpop.eup %2257 }
 0x271   :  { %v2608_v28 = vpop.eup %2259 }
 0x272   :  { %2107 = vmatpush3.bf16.msra.mxu1 %v2193_v32 }
 0x273   :  { %2108 = vmatprep.subr.bf16.mxu1 %v2293_v22 }
 0x274   :  { %746 = vperm.xlu1 %2163, %v2594_v17  }
 0x276   :  { %2109 = vmatpush3.bf16.msra.mxu1 %v2194_v34 }
 0x277   :  { %2110 = vmatprep.subr.bf16.mxu1 %v2293_v22 }
 0x278   :  { %749 = vperm.xlu1 %2163, %v2597_v57  }
 0x27a   :  { %2111 = vmatpush3.bf16.msra.mxu1 %v2195_v39 }
 0x27b   :  { %2112 = vmatprep.subr.bf16.mxu1 %v2293_v22 }
 0x27c   :  { %752 = vperm.xlu1 %2163, %v2600_v21  }
 0x27e   :  { %2113 = vmatpush3.bf16.msra.mxu1 %v2196_v19 }
 0x27f   :  { %2118 = vmatprep.subr.mxu1 %v2293_v22 }
 0x280   :  { %755 = vperm.xlu1 %2163, %v2608_v28  }
 0x281   :  { %2115 = vmatmul.mubr.bf16.vlgmr.msra.gmra.mrb[0].mxu1 %v2419_v18 }
 0x282   :  { %2120 = vmatprep.mubr.msk.f32.mxu1 %vm2294_vm7, %v2293_v22 }
 0x29d   :  { %v979_v42 = vpop.xlane.xlu1 %978 }
 0x29e   :  { %v984_v43 = vrot.slane %v979_v42, %v2426_v23  ;;  %v988_v44 = vrot.slane %v979_v42, %v2436_v27  ;;  %v992_v49 = vrot.slane %v979_v42, %v2561_v45  ;;  %v996_v50 = vrot.slane %v979_v42, %v2564_v46 }
 0x2a0   :  { %v1001_v51 = vsub.f32 %v2520_v3, %v984_v43  ;;  %v1002_v52 = vsub.f32 %v2524_v7, %v988_v44  ;;  %v1003_v53 = vsub.f32 %v2522_v6, %v992_v49  ;;  %v1004_v18 = vsub.f32 %v2532_v13, %v996_v50 }
 0x2a1   :  { %v757_v43 = vadd.s32 4, %v2474_v33 }
 0x2a2   :  { %v1005_v54 = vmul.f32 1.442695, %v1001_v51  ;;  %v1009_v55 = vmul.f32 1.442695, %v1003_v53  ;;  %v1007_v56 = vmul.f32 1.442695, %v1002_v52 }
 0x2a3   :  { %v1011_v3 = vmul.f32 1.442695, %v1004_v18  ;;  %v2697_v49 = vsub.s32 %v757_v43, %v2423_v20 }
 0x2a4   :  { %2261 = vpow2.f32 %v1005_v54 }
 0x2a5   :  { %v1247_v59 = vpop.xlane.xlu0 %1246  ;;  %2263 = vpow2.f32 %v1009_v55 }
 0x2a6   :  { %v1252_v60 = vrot.slane %v1247_v59, %v2426_v23  ;;  %v1256_v61 = vrot.slane %v1247_v59, %v2436_v27  ;;  %v1260_v62 = vrot.slane %v1247_v59, %v2561_v45  ;;  %2265 = vpow2.f32 %v1007_v56 }
 0x2a7   :  { %v1264_v7 = vrot.slane %v1247_v59, %v2564_v46  ;;  %2267 = vpow2.f32 %v1011_v3 }
 0x2a8   :  { %v1269_v6 = vsub.f32 %v2535_v15, %v1252_v60  ;;  %v1270_v63 = vsub.f32 %v2542_v26, %v1256_v61  ;;  %v1271_v13 = vsub.f32 %v2540_v25, %v1260_v62 }
 0x2a9   :  { %v1272_v4 = vsub.f32 %v2552_v38, %v1264_v7 }
 0x2aa   :  { %v1273_v0 = vmul.f32 1.442695, %v1269_v6  ;;  %v1275_v2 = vmul.f32 1.442695, %v1270_v63  ;;  %v1277_v36 = vmul.f32 1.442695, %v1271_v13 }
 0x2ab   :  { %v1279_v15 = vmul.f32 1.442695, %v1272_v4 }
 0x2ac   :  { %2269 = vpow2.f32 %v1273_v0 }
 0x2ad   :  { %2271 = vpow2.f32 %v1275_v2 }
 0x2ae   :  { %v2663_v40 = vpop.eup %2261  ;;  %2273 = vpow2.f32 %v1277_v36 }
 0x2af   :  { %1018 = vperm.xlu1 %2163, %v2663_v40   ;;  %v2666_v37 = vpop.eup %2263  ;;  %2275 = vpow2.f32 %v1279_v15 }
 0x2b0   :  { %v2668_v5 = vpop.eup %2265  ;;  %1024 = vperm.xlu0 %2164, %v2666_v37  }
 0x2b1   :  { %v2672_v25 = vpop.eup %2267 }
 0x2b3   :  { %1021 = vperm.xlu1 %2163, %v2668_v5  }
 0x2b6   :  { %v2674_v26 = vpop.eup %2269 }
 0x2b7   :  { %1027 = vperm.xlu1 %2163, %v2672_v25   ;;  %1286 = vperm.xlu0 %2164, %v2674_v26   ;;  %v2678_v38 = vpop.eup %2271 }
 0x2b8   :  { %v2680_v9 = vpop.eup %2273 }
 0x2b9   :  { %v2684_v10 = vpop.eup %2275 }
 0x2bb   :  { %1289 = vperm.xlu1 %2163, %v2678_v38   ;;  %1292 = vperm.xlu0 %2164, %v2680_v9  }
 0x2bf   :  { %1295 = vperm.xlu1 %2163, %v2684_v10  }
 0x2e7   :  { %v443_v11 = vpop.permute.xlu1 %442 }
 0x2e8   :  { %v446_v48 = vpop.permute.xlu0 %445  ;;  %v456_v16 = vrot.slane %v443_v11, %v2478_v35 }
 0x2e9   :  { %v460_v58 = vrot.slane %v446_v48, %v2478_v35 }
 0x2eb   :  { %v449_v12 = vpop.permute.xlu1 %448  ;;  %v469_v31 = vsel %vm393_vm2, %v460_v58, %v456_v16 }
 0x2ec   :  { %v464_v29 = vrot.slane %v449_v12, %v2478_v35 }
 0x2ee   :  { %v470_v34 = vsel %vm395_vm3, %v464_v29, %v469_v31 }
 0x2ef   :  { %v452_v30 = vpop.permute.xlu1 %451 }
 0x2f0   :  { %v468_v32 = vrot.slane %v452_v30, %v2478_v35 }
 0x2f2   :  { %v471_v39 = vsel %vm397_vm4, %v468_v32, %v470_v34 }
 0x2f3   :  { %v747_v19 = vpop.permute.xlu1 %746  ;;  %v473_v42 = vsel %vm400_vm5, %v471_v39, 0.0  ;;  %v92_v39 = vrot.slane %v2431_v24, %v2561_v45 }
 0x2f4   :  { %474 = vadd.xlane.f32.xlu0 %v473_v42  ;;  %v761_v53 = vrot.slane %v747_v19, %v2697_v49 }
 0x2f7   :  { %v750_v44 = vpop.permute.xlu1 %749 }
 0x2f8   :  { %v765_v51 = vrot.slane %v750_v44, %v2697_v49 }
 0x2fa   :  { %v774_v55 = vsel %vm393_vm2, %v765_v51, %v761_v53 }
 0x2fb   :  { %v753_v50 = vpop.permute.xlu1 %752 }
 0x2fc   :  { %v769_v52 = vrot.slane %v753_v50, %v2697_v49 }
 0x2fe   :  { %v775_v56 = vsel %vm395_vm3, %v769_v52, %v774_v55 }
 0x2ff   :  { %v756_v54 = vpop.permute.xlu1 %755 }
 0x300   :  { %v773_v18 = vrot.slane %v756_v54, %v2697_v49 }
 0x302   :  { %v776_v33 = vsel %vm397_vm4, %v773_v18, %v775_v56 }
 0x303   :  { %v778_v59 = vsel %vm400_vm5, %v776_v33, 0.0 }
 0x304   :  { %779 = vadd.xlane.f32.xlu1 %v778_v59 }
 0x32e   :  { %v1019_v20 = vpop.permute.xlu1 %1018 }
 0x32f   :  { %v1025_v60 = vpop.permute.xlu0 %1024  ;;  %v1032_v62 = vrot.slane %v1019_v20, %v2478_v35 }
 0x330   :  { %v1040_v6 = vrot.slane %v1025_v60, %v2478_v35 }
 0x332   :  { %v1022_v61 = vpop.permute.xlu1 %1021 }
 0x333   :  { %v1036_v3 = vrot.slane %v1022_v61, %v2478_v35 }
 0x335   :  { %v1045_v7 = vsel %vm393_vm2, %v1036_v3, %v1032_v62 }
 0x336   :  { %v1028_v63 = vpop.permute.xlu1 %1027  ;;  %v1287_v13 = vpop.permute.xlu0 %1286  ;;  %v1046_v2 = vsel %vm395_vm3, %v1040_v6, %v1045_v7 }
 0x337   :  { %v1044_v0 = vrot.slane %v1028_v63, %v2478_v35  ;;  %v1300_v48 = vrot.slane %v1287_v13, %v2697_v49 }
 0x339   :  { %v1047_v4 = vsel %vm397_vm4, %v1044_v0, %v1046_v2 }
 0x33a   :  { %v1290_v36 = vpop.permute.xlu1 %1289  ;;  %v1293_v15 = vpop.permute.xlu0 %1292  ;;  %v1049_v11 = vsel %vm400_vm5, %v1047_v4, 0.0 }
 0x33b   :  { %v1304_v12 = vrot.slane %v1290_v36, %v2697_v49  ;;  %1050 = vadd.xlane.f32.xlu0 %v1049_v11  ;;  %v1308_v16 = vrot.slane %v1293_v15, %v2697_v49 }
 0x33d   :  { %v1313_v58 = vsel %vm393_vm2, %v1304_v12, %v1300_v48 }
 0x33e   :  { %v1296_v29 = vpop.permute.xlu1 %1295  ;;  %v1314_v31 = vsel %vm395_vm3, %v1308_v16, %v1313_v58 }
 0x33f   :  { %v1312_v30 = vrot.slane %v1296_v29, %v2697_v49 }
 0x341   :  { %v1315_v32 = vsel %vm397_vm4, %v1312_v30, %v1314_v31 }
 0x342   :  { %v1317_v34 = vsel %vm400_vm5, %v1315_v32, 0.0 }
 0x343   :  { %1318 = vadd.xlane.f32.xlu0 %v1317_v34 }
 0x354   :  { %v299_v19 = vpop.f32.mrb[0].mxu1 }
 0x355   :  { %v2725_v42 = vadd.f32 %v299_v19, %v92_v39  ;;  %v2116_v43 = vpop.f32.mrb[1].mxu1 }
 0x356   :  { %v302_v44 = vpop.f32.mrb[2].mxu1 }
 0x357   :  { %v2117_v50 = vpop.f32.mrb[3].mxu1  ;;  %2119 = vmatpush3.msk.msra.mxu1 %vm540_vm8, %v2725_v42  ;;  %v842_v58 = vrot.slane %v2725_v42, 4 }
 0x358   :  { %2123 = vmatprep.subr.mxu1 %v2293_v22 }
 0x381   :  { %v475_v51 = vpop.xlane.xlu0 %474 }
 0x382   :  { %2277 = vrcp.f32 %v475_v51 }
 0x38c   :  { %v2278_v52 = vpop.eup %2277 }
 0x38d   :  { %v485_v53 = vrot.slane %v2278_v52, %v2436_v27  ;;  %v481_v54 = vrot.slane %v2278_v52, %v2426_v23  ;;  %v489_v18 = vrot.slane %v2278_v52, %v2561_v45  ;;  %v493_v59 = vrot.slane %v2278_v52, %v2564_v46 }
 0x38f   :  { %v499_v24 = vmul.f32 %v2581_v41, %v485_v53  ;;  %v498_v55 = vmul.f32 %v2579_v8, %v481_v54  ;;  %v500_v33 = vmul.f32 %v2587_v47, %v489_v18  ;;  %v501_v20 = vmul.f32 %v2591_v14, %v493_v59 }
 0x391   :  { %v780_v56 = vpop.xlane.xlu1 %779  ;;  %510 = vperm.xlu0 %2164, %v499_v24   ;;  %507 = vperm.xlu1 %2163, %v498_v55  }
 0x392   :  { %2279 = vrcp.f32 %v780_v56 }
 0x395   :  { %513 = vperm.xlu1 %2163, %v500_v33  }
 0x399   :  { %516 = vperm.xlu1 %2163, %v501_v20  }
 0x39c   :  { %v2280_v60 = vpop.eup %2279 }
 0x39d   :  { %v786_v61 = vrot.slane %v2280_v60, %v2426_v23  ;;  %v790_v41 = vrot.slane %v2280_v60, %v2436_v27  ;;  %v794_v3 = vrot.slane %v2280_v60, %v2561_v45  ;;  %v798_v7 = vrot.slane %v2280_v60, %v2564_v46 }
 0x39f   :  { %v803_v8 = vmul.f32 %v2594_v17, %v786_v61  ;;  %v804_v62 = vmul.f32 %v2597_v57, %v790_v41  ;;  %v805_v47 = vmul.f32 %v2600_v21, %v794_v3  ;;  %v806_v14 = vmul.f32 %v2608_v28, %v798_v7 }
 0x3a1   :  { %812 = vperm.xlu0 %2164, %v803_v8   ;;  %815 = vperm.xlu1 %2163, %v804_v62  }
 0x3a5   :  { %818 = vperm.xlu0 %2164, %v805_v47   ;;  %821 = vperm.xlu1 %2163, %v806_v14  }
 0x3c8   :  { %v1051_v6 = vpop.xlane.xlu0 %1050 }
 0x3c9   :  { %2281 = vrcp.f32 %v1051_v6 }
 0x3d0   :  { %v1319_v63 = vpop.xlane.xlu0 %1318 }
 0x3d1   :  { %2283 = vrcp.f32 %v1319_v63 }
 0x3d3   :  { %v2282_v13 = vpop.eup %2281 }
 0x3d4   :  { %v1061_v17 = vrot.slane %v2282_v13, %v2436_v27  ;;  %v1057_v57 = vrot.slane %v2282_v13, %v2426_v23  ;;  %v1069_v4 = vrot.slane %v2282_v13, %v2564_v46  ;;  %v1065_v21 = vrot.slane %v2282_v13, %v2561_v45 }
 0x3d6   :  { %v1075_v0 = vmul.f32 %v2668_v5, %v1061_v17  ;;  %v1074_v2 = vmul.f32 %v2663_v40, %v1057_v57  ;;  %v1077_v28 = vmul.f32 %v2672_v25, %v1069_v4  ;;  %v1076_v36 = vmul.f32 %v2666_v37, %v1065_v21  ;;  %v2198_v21 = vld [vmem:[%s2972_s3 + $0x8] sm:$0xff]  }
 0x3d8   :  { %1086 = vperm.xlu1 %2163, %v1075_v0   ;;  %1083 = vperm.xlu0 %2164, %v1074_v2  }
 0x3db   :  { %v2284_v15 = vpop.eup %2283 }
 0x3dc   :  { %1092 = vperm.xlu1 %2163, %v1077_v28   ;;  %1089 = vperm.xlu0 %2164, %v1076_v36   ;;  %v1329_v11 = vrot.slane %v2284_v15, %v2436_v27  ;;  %v1325_v48 = vrot.slane %v2284_v15, %v2426_v23  ;;  %v1337_v12 = vrot.slane %v2284_v15, %v2564_v46  ;;  %v2199_v28 = vld [vmem:[%s2972_s3 + $0x10] sm:$0xff]   ;;  %v2201_v36 = vld [vmem:[%s2972_s3 + $0x20] sm:$0xff]  }
 0x3dd   :  { %v1333_v16 = vrot.slane %v2284_v15, %v2561_v45  ;;  %v2202_v15 = vld [vmem:[%s2972_s3 + $0x28] sm:$0xff]  }
 0x3de   :  { %v1343_v5 = vmul.f32 %v2678_v38, %v1329_v11  ;;  %v1342_v40 = vmul.f32 %v2674_v26, %v1325_v48  ;;  %v1345_v25 = vmul.f32 %v2684_v10, %v1337_v12  ;;  %v2203_v11 = vld [vmem:[%s2972_s3 + $0x30] sm:$0xff]  }
 0x3df   :  { %v1344_v37 = vmul.f32 %v2680_v9, %v1333_v16 }
 0x3e0   :  { %1354 = vperm.xlu1 %2163, %v1343_v5   ;;  %1351 = vperm.xlu0 %2164, %v1342_v40  }
 0x3e4   :  { %1360 = vperm.xlu1 %2163, %v1345_v25   ;;  %1357 = vperm.xlu0 %2164, %v1344_v37   ;;  %v2204_v37 = vld [vmem:[%s2972_s3 + $0x38] sm:$0xff]  }
 0x3e8   :  { %1113 = vrot.lane.b32.xlu0 %v2725_v42, %s2292_s2  ;;  %1381 = vrot.lane.b32.xlu1 %v842_v58, %s2292_s2 }
 0x410   :  { %v508_v26 = vpop.permute.xlu1 %507  ;;  %v511_v38 = vpop.permute.xlu0 %510 }
 0x411   :  { %v521_v45 = vrot.slane %v508_v26, %v2478_v35  ;;  %v525_v29 = vrot.slane %v511_v38, %v2478_v35 }
 0x413   :  { %v534_v9 = vsel %vm393_vm2, %v525_v29, %v521_v45 }
 0x414   :  { %v514_v46 = vpop.permute.xlu1 %513 }
 0x415   :  { %v529_v10 = vrot.slane %v514_v46, %v2478_v35 }
 0x417   :  { %v535_v32 = vsel %vm395_vm3, %v529_v10, %v534_v9 }
 0x418   :  { %v517_v30 = vpop.permute.xlu1 %516 }
 0x419   :  { %v533_v31 = vrot.slane %v517_v30, %v2478_v35 }
 0x41b   :  { %v536_v34 = vsel %vm397_vm4, %v533_v31, %v535_v32  ;;  %v2012_v31 = vld [vmem:[%s2973_s4] ss:$0 sm:$0xff] }
 0x41c   :  { %2121 = vmatmul.mubr.msk.f32.vlgmr.msra.gmra.mrb[4].mxu1 %vm537_vm9, %v536_v34  ;;  %v2289_v32 = vld [vmem:[%s2970_s0] sm:$0xff] }
 0x41d   :  { %2124 = vmatpush3.msk.msra.mxu1 %vm540_vm8, %v842_v58  ;;  %2125 = vmatprep.mubr.msk.f32.mxu1 %vm2294_vm7, %v2293_v22 }
 0x41e   :  { %2128 = vmatprep.subr.mxu1 %v2293_v22 }
 0x420   :  { %v816_v39 = vpop.permute.xlu1 %815  ;;  %v813_v19 = vpop.permute.xlu0 %812 }
 0x421   :  { %v830_v42 = vrot.slane %v816_v39, %v2697_v49  ;;  %v826_v43 = vrot.slane %v813_v19, %v2697_v49 }
 0x423   :  { %v839_v53 = vsel %vm393_vm2, %v830_v42, %v826_v43 }
 0x424   :  { %v822_v44 = vpop.permute.xlu1 %821  ;;  %v819_v50 = vpop.permute.xlu0 %818 }
 0x425   :  { %v838_v51 = vrot.slane %v822_v44, %v2697_v49  ;;  %v834_v52 = vrot.slane %v819_v50, %v2697_v49  ;;  %v2205_v44 = vld [vmem:[%s2974_s7] ss:$8 sps:$4 sm:$0xff]   ;;  %v2207_v50 = vld [vmem:[%s2974_s7 + $0x4] ss:$8 sps:$4 sm:$0xff]  }
 0x427   :  { %v840_v54 = vsel %vm395_vm3, %v834_v52, %v839_v53  ;;  %v2208_v52 = vld [vmem:[%s2974_s7 + $0x10] ss:$8 sps:$4 sm:$0xff]   ;;  %v2213_v53 = vld [vmem:[%s2974_s7 + $0x24] ss:$8 sps:$4 sm:$0xff]  }
 0x428   :  { %v841_v24 = vsel %vm397_vm4, %v838_v51, %v840_v54  ;;  %v2210_v51 = vld [vmem:[%s2974_s7 + $0x14] ss:$8 sps:$4 sm:$0xff]   ;;  %v2211_v54 = vld [vmem:[%s2974_s7 + $0x20] ss:$8 sps:$4 sm:$0xff]  }
 0x429   :  { %2126 = vmatmul.mubr.msk.f32.vlgmr.msra.gmra.mrb[6].mxu1 %vm537_vm9, %v841_v24 }
 0x42a   :  { %2130 = vmatprep.mubr.msk.f32.mxu1 %vm2294_vm7, %v2293_v22 }
 0x457   :  { %v1087_v55 = vpop.permute.xlu1 %1086  ;;  %v1084_v18 = vpop.permute.xlu0 %1083 }
 0x458   :  { %v1101_v60 = vrot.slane %v1087_v55, %v2478_v35  ;;  %v1097_v61 = vrot.slane %v1084_v18, %v2478_v35 }
 0x45a   :  { %v1110_v3 = vsel %vm393_vm2, %v1101_v60, %v1097_v61  ;;  %v2217_v60 = vld [vmem:[%s2974_s7 + $0x40] ss:$8 sps:$4 sm:$0xff]   ;;  %v2222_v61 = vld [vmem:[%s2974_s7 + $0x54] ss:$8 sps:$4 sm:$0xff]  }
 0x45b   :  { %v1093_v56 = vpop.permute.xlu1 %1092  ;;  %v1090_v33 = vpop.permute.xlu0 %1089 }
 0x45c   :  { %v1105_v41 = vrot.slane %v1090_v33, %v2478_v35  ;;  %v1109_v7 = vrot.slane %v1093_v56, %v2478_v35  ;;  %v2216_v33 = vld [vmem:[%s2974_s7 + $0x34] ss:$8 sps:$4 sm:$0xff]  }
 0x45e   :  { %v1111_v6 = vsel %vm395_vm3, %v1105_v41, %v1110_v3  ;;  %v2220_v41 = vld [vmem:[%s2974_s7 + $0x50] ss:$8 sps:$4 sm:$0xff]   ;;  %v2228_v3 = vld [vmem:[%s2974_s7 + $0x74] ss:$8 sps:$4 sm:$0xff]  }
 0x45f   :  { %v1355_v59 = vpop.permute.xlu1 %1354  ;;  %v1352_v20 = vpop.permute.xlu0 %1351  ;;  %v1112_v2 = vsel %vm397_vm4, %v1109_v7, %v1111_v6  ;;  %v2226_v7 = vld [vmem:[%s2974_s7 + $0x70] ss:$8 sps:$4 sm:$0xff]   ;;  %v2231_v6 = vld [vmem:[%s2975_s9 + $0x48] sm:$0xff]  }
 0x460   :  { %v1369_v47 = vrot.slane %v1355_v59, %v2697_v49  ;;  %v1365_v14 = vrot.slane %v1352_v20, %v2697_v49  ;;  %v2214_v59 = vld [vmem:[%s2974_s7 + $0x30] ss:$8 sps:$4 sm:$0xff]   ;;  %v2219_v20 = vld [vmem:[%s2974_s7 + $0x44] ss:$8 sps:$4 sm:$0xff]  }
 0x462   :  { %v1378_v57 = vsel %vm393_vm2, %v1369_v47, %v1365_v14  ;;  %v2229_v47 = vld [vmem:[%s2975_s9 + $0x40] sm:$0xff]  }
 0x463   :  { %v1361_v8 = vpop.permute.xlu1 %1360  ;;  %v1358_v62 = vpop.permute.xlu0 %1357  ;;  %v2230_v14 = vld [vmem:[%s2975_s9] sm:$0xff]  }
 0x464   :  { %v1373_v63 = vrot.slane %v1358_v62, %v2697_v49  ;;  %v1377_v0 = vrot.slane %v1361_v8, %v2697_v49  ;;  %v2197_v49 = vld [vmem:[%s2972_s3] sm:$0xff]  }
 0x465   :  { %2139 = vmatpush3.bf16.msra.mxu0 %v2197_v49  ;;  %v2225_v8 = vld [vmem:[%s2974_s7 + $0x64] ss:$8 sps:$4 sm:$0xff]   ;;  %v2223_v62 = vld [vmem:[%s2974_s7 + $0x60] ss:$8 sps:$4 sm:$0xff]  }
 0x466   :  { %v1379_v35 = vsel %vm395_vm3, %v1373_v63, %v1378_v57  ;;  %2140 = vmatprep.subr.bf16.mxu0 %v2293_v22  ;;  %v2232_v63 = vld [vmem:[%s2975_s9 + $0x8] sm:$0xff]   ;;  %v2235_v57 = vld [vmem:[%s2975_s9 + $0x58] sm:$0xff]  }
 0x467   :  { %v1114_v13 = vpop.permute.xlu0 %1113  ;;  %v1382_v17 = vpop.permute.xlu1 %1381  ;;  %v1380_v4 = vsel %vm397_vm4, %v1377_v0, %v1379_v35  ;;  %v2236_v0 = vld [vmem:[%s2975_s9 + $0x18] sm:$0xff]   ;;  %v2238_v35 = vld [vmem:[%s2975_s9 + $0x20] sm:$0xff]   ;;  %v2240_v49 = vld [vmem:[%s2975_s9 + $0x28] sm:$0xff]  }
 0x468   :  { %2129 = vmatpush3.msk.msra.mxu1 %vm540_vm8, %v1114_v13  ;;  %v2233_v13 = vld [vmem:[%s2975_s9 + $0x50] sm:$0xff]  }
 0x469   :  { %2131 = vmatmul.mubr.msk.f32.vlgmr.msra.gmra.mrb[8].mxu1 %vm537_vm9, %v1112_v2  ;;  %2133 = vmatprep.subr.mxu1 %v2293_v22  ;;  %v2237_v2 = vld [vmem:[%s2975_s9 + $0x60] sm:$0xff]  }
 0x46a   :  { %2134 = vmatpush3.msk.msra.mxu1 %vm540_vm8, %v1382_v17  ;;  %2135 = vmatprep.mubr.msk.f32.mxu1 %vm2294_vm7, %v2293_v22  ;;  %v2234_v17 = vld [vmem:[%s2975_s9 + $0x10] sm:$0xff]  }
 0x46b   :  { %2141 = vmatpush3.bf16.msra.mxu0 %v2198_v21  ;;  %1718 = vmatprep.subr.bf16.mxu1 %v2207_v50 }
 0x46c   :  { %2142 = vmatprep.subr.bf16.mxu0 %v2293_v22 }
 0x46d   :  { %2136 = vmatmul.mubr.msk.f32.vlgmr.msra.gmra.mrb[10].mxu1 %vm537_vm9, %v1380_v4  ;;  %v2239_v4 = vld [vmem:[%s2975_s9 + $0x68] sm:$0xff]  }
 0x46e   :  { %1750 = vmatprep.mubr.bf16.mxu1 %v2290_v1  ;;  %v2200_v1 = vld [vmem:[%s2972_s3 + $0x18] sm:$0xff]   ;;  %1719 = vmatpush1.bf16.msra.mxu1 %v2205_v44 }
 0x46f   :  { %2143 = vmatpush3.bf16.msra.mxu0 %v2199_v28  ;;  %1720 = vmatprep.subr.bf16.mxu1 %v2210_v51 }
 0x470   :  { %2144 = vmatprep.subr.bf16.mxu0 %v2293_v22 }
 0x472   :  { %1721 = vmatpush1.bf16.msra.mxu1 %v2208_v52 }
 0x473   :  { %2145 = vmatpush3.bf16.msra.mxu0 %v2200_v1  ;;  %1722 = vmatprep.subr.bf16.mxu1 %v2213_v53 }
 0x474   :  { %2146 = vmatprep.subr.bf16.mxu0 %v2293_v22 }
 0x476   :  { %1723 = vmatpush1.bf16.msra.mxu1 %v2211_v54 }
 0x477   :  { %2147 = vmatpush3.bf16.msra.mxu0 %v2201_v36  ;;  %1724 = vmatprep.subr.bf16.mxu1 %v2216_v33 }
 0x478   :  { %2148 = vmatprep.subr.bf16.mxu0 %v2293_v22 }
 0x47a   :  { %1725 = vmatpush1.bf16.msra.mxu1 %v2214_v59  ;;  %v2048_v59 = vld [vmem:[%s2980_s11] ss:$0 sm:$0xff] }
 0x47b   :  { %2149 = vmatpush3.bf16.msra.mxu0 %v2202_v15  ;;  %1726 = vmatprep.subr.bf16.mxu1 %v2219_v20  ;;  %v2013_v15 = vld [vmem:[%s2976_s5] ss:$0 sm:$0xff] }
 0x47c   :  { %2150 = vmatprep.subr.bf16.mxu0 %v2293_v22 }
 0x47e   :  { %1727 = vmatpush1.bf16.msra.mxu1 %v2217_v60  ;;  %v2049_v60 = vld [vmem:[%s2981_s12] ss:$0 sm:$0xff] }
 0x47f   :  { %2151 = vmatpush3.bf16.msra.mxu0 %v2203_v11  ;;  %1728 = vmatprep.subr.bf16.mxu1 %v2222_v61 }
 0x480   :  { %2152 = vmatprep.subr.bf16.mxu0 %v2293_v22 }
 0x482   :  { %1729 = vmatpush1.bf16.msra.mxu1 %v2220_v41 }
 0x483   :  { %2153 = vmatpush3.bf16.msra.mxu0 %v2204_v37  ;;  %1730 = vmatprep.subr.bf16.mxu1 %v2225_v8  ;;  %v2243_v37 = vld [vmem:[%s2975_s9 + $0x78] sm:$0xff]  }
 0x484   :  { %2076 = vmatprep.subr.bf16.mxu0 %v2229_v47 }
 0x486   :  { %1731 = vmatpush1.bf16.msra.mxu1 %v2223_v62 }
 0x487   :  { %1732 = vmatprep.subr.bf16.mxu1 %v2228_v3 }
 0x48a   :  { %1733 = vmatpush1.bf16.msra.mxu1 %v2226_v7 }
 0x4ef   :  { %v610_v48 = vpop.f32.mrb[4].mxu1 }
 0x4f0   :  { %v2122_v5 = vpop.f32.mrb[5].mxu1 }
 0x4fc   :  { %v913_v40 = vpop.f32.mrb[6].mxu1 }
 0x4fd   :  { %v918_v12 = vrot.slane %v913_v40, 4  ;;  %v2127_v16 = vpop.f32.mrb[7].mxu1 }
 0x4fe   :  { %v2241_v16 = vld [vmem:[%s2975_s9 + $0x70] sm:$0xff]  }
 0x4ff   :  { %v920_v25 = vsel %vm540_vm8, %v610_v48, %v918_v12  ;;  %v2014_v48 = vld [vmem:[%s2977_s6] ss:$0 sm:$0xff] }
 0x53c   :  { %v1185_v58 = vpop.f32.mrb[8].mxu1 }
 0x53d   :  { %v2132_v26 = vpop.f32.mrb[9].mxu1 }
 0x53e   :  { %v1626_v26 = vld [vmem:[%s2978_s8] sm:$0x3] }
 0x540   :  { %v1453_v38 = vpop.f32.mrb[10].mxu1 }
 0x541   :  { %v1458_v46 = vrot.slane %v1453_v38, 4  ;;  %v2137_v45 = vpop.f32.mrb[11].mxu1  ;;  %v1631_v38 = vrot.slane %v1626_v26, %v2426_v23  ;;  %v2047_v23 = vld [vmem:[%s2979_s10] ss:$0 sm:$0xff] }
 0x543   :  { %v1460_v29 = vsel %vm540_vm8, %v1185_v58, %v1458_v46  ;;  %v2244_v58 = vld [vmem:[%s2975_s9 + $0x38] sm:$0xff]   ;;  %v1635_v46 = vrot.slane %v1626_v26, %v2436_v27 }
 0x544   :  { %1462 = vrot.lane.b32.xlu0 %v1460_v29, %s2292_s2 }
 0x5b6   :  { %v1463_v22 = vpop.permute.xlu0 %1462 }
 0x5b7   :  { %v1466_v10 = vsel %vm1465_vm10, %v920_v25, %v1463_v22  ;;  %v2242_v25 = vld [vmem:[%s2975_s9 + $0x30] sm:$0xff]  }
 0x5b8   :  { %v1483_v30 = vpack.c.bf16 %v1466_v10, %v1466_v10 }
 0x5ba   :  { %2155 = vmatmul.mubr.bf16.vlgmr.msra.gmra.mrb[4].mxu0 %v1483_v30 }
 0x5bb   :  { %2077 = vmatpush3.bf16.msra.mxu0 %v2230_v14 }
 0x5bc   :  { %2078 = vmatprep.subr.bf16.mxu0 %v2231_v6 }
 0x5bf   :  { %2079 = vmatpush3.bf16.msra.mxu0 %v2232_v63 }
 0x5c0   :  { %2080 = vmatprep.subr.bf16.mxu0 %v2233_v13 }
 0x5c3   :  { %2081 = vmatpush3.bf16.msra.mxu0 %v2234_v17 }
 0x5c4   :  { %2082 = vmatprep.subr.bf16.mxu0 %v2235_v57 }
 0x5c7   :  { %2083 = vmatpush3.bf16.msra.mxu0 %v2236_v0 }
 0x5c8   :  { %2084 = vmatprep.subr.bf16.mxu0 %v2237_v2 }
 0x5cb   :  { %2085 = vmatpush3.bf16.msra.mxu0 %v2238_v35 }
 0x5cc   :  { %2086 = vmatprep.subr.bf16.mxu0 %v2239_v4 }
 0x5cf   :  { %2087 = vmatpush3.bf16.msra.mxu0 %v2240_v49 }
 0x5d0   :  { %2088 = vmatprep.subr.bf16.mxu0 %v2241_v16 }
 0x5d3   :  { %2089 = vmatpush3.bf16.msra.mxu0 %v2242_v25 }
 0x5d4   :  { %2090 = vmatprep.subr.bf16.mxu0 %v2243_v37 }
 0x5d7   :  { %2091 = vmatpush3.bf16.msra.mxu0 %v2244_v58 }
 0x68d   :  { %v1566_v9 = vpop.f32.mrb[4].mxu0 }
 0x68e   :  { %v1572_v34 = vadd.f32 %v2289_v32, %v1566_v9  ;;  %v2156_v39 = vpop.f32.mrb[5].mxu0 }
 0x68f   :  { %v1569_v19 = vpop.f32.mrb[6].mxu0 }
 0x690   :  { %v2157_v42 = vpop.f32.mrb[7].mxu0  ;;  %v1580_v43 = vadd.f32 %v2012_v31, %v1572_v34 }
 0x692   :  { %1583 = vadd.xlane.f32.xlu1 %v1580_v43 }
 0x71f   :  { %v1584_v24 = vpop.xlane.xlu1 %1583 }
 0x720   :  { %v1586_v55 = vmul.f32 0.0078125, %v1584_v24 }
 0x722   :  { %v1587_v18 = vsub.f32 %v1580_v43, %v1586_v55 }
 0x724   :  { %v1588_v56 = vmul.f32 %v1587_v18, %v1587_v18 }
 0x726   :  { %1589 = vadd.xlane.f32.xlu0 %v1588_v56 }
 0x7b3   :  { %v1590_v21 = vpop.xlane.xlu0 %1589 }
 0x7b4   :  { %v1591_v28 = vmul.f32 0.0078125, %v1590_v21 }
 0x7b6   :  { %v1592_v1 = vadd.f32 1e-05, %v1591_v28 }
 0x7b8   :  { %2285 = vrsqrt.f32 %v1592_v1 }
 0x7c2   :  { %v2286_v36 = vpop.eup %2285 }
 0x7c3   :  { %v1594_v11 = vmul.f32 %v2286_v36, %v1587_v18 }
 0x7c5   :  { %v1601_v5 = vmul.f32 %v2013_v15, %v1594_v11 }
 0x7c7   :  { %v1608_v40 = vadd.f32 %v2014_v48, %v1601_v5 }
 0x7c9   :  { %v1625_v12 = vpack.c.bf16 %v1608_v40, %v1608_v40 }
 0x7cb   :  { %1751 = vmatmul.mubr.bf16.vlgmr.msra.gmra.mrb[12].mxu1 %v1625_v12 }
 0x89e   :  { %v1752_v45 = vpop.f32.mrb[12].mxu1 }
 0x89f   :  { %v1753_v29 = vadd.f32 %v1752_v45, %v1631_v38  ;;  %v1754_v22 = vpop.f32.mrb[13].mxu1 }
 0x8a0   :  { %v1755_v10 = vadd.f32 %v1754_v22, %v1635_v46  ;;  %v1756_v30 = vpop.f32.mrb[14].mxu1 }
 0x8a1   :  { %v1759_v9 = vmax.f32 %v1753_v29, 0.0  ;;  %v1757_v31 = vpop.f32.mrb[15].mxu1 }
 0x8a2   :  { %v1760_v32 = vmax.f32 %v1755_v10, 0.0 }
 0x8a3   :  { %v1793_v39 = vpack.c.bf16 %v1759_v9, %v1759_v9 }
 0x8a4   :  { %v1794_v34 = vpack.c.bf16 %v1760_v32, %v1760_v32 }
 0x8a6   :  { %1923 = vmatprep.mubr.bf16.mxu0 %v1794_v34 }
 0x8a7   :  { %1924 = vmatmul.mubr.bf16.vlgmr.msra.gmra.mrb[8].mxu0 %v1793_v39 }
 0x97a   :  { %v2092_v19 = vpop.f32.mrb[8].mxu0 }
 0x97b   :  { %v2093_v42 = vpop.f32.mrb[9].mxu0 }
 0x97c   :  { %v2094_v43 = vadd.f32 %v2093_v42, %v2092_v19  ;;  %v2095_v44 = vpop.f32.mrb[10].mxu0 }
 0x97d   :  { %v2096_v50 = vpop.f32.mrb[11].mxu0 }
 0x97e   :  { %v1931_v27 = vadd.f32 %v2094_v43, %v1608_v40 }
 0x980   :  { %v1939_v51 = vadd.f32 %v2047_v23, %v1931_v27 }
 0x982   :  { %1942 = vadd.xlane.f32.xlu0 %v1939_v51 }
 0xa0f   :  { %v1943_v52 = vpop.xlane.xlu0 %1942 }
 0xa10   :  { %v1944_v53 = vmul.f32 0.0078125, %v1943_v52 }
 0xa12   :  { %v1945_v54 = vsub.f32 %v1939_v51, %v1944_v53 }
 0xa14   :  { %v1946_v24 = vmul.f32 %v1945_v54, %v1945_v54 }
 0xa16   :  { %1947 = vadd.xlane.f32.xlu1 %v1946_v24 }
 0xaa3   :  { %v1948_v55 = vpop.xlane.xlu1 %1947 }
 0xaa4   :  { %v1949_v18 = vmul.f32 0.0078125, %v1948_v55 }
 0xaa6   :  { %v1950_v56 = vadd.f32 1e-05, %v1949_v18 }
 0xaa8   :  { %2287 = vrsqrt.f32 %v1950_v56 }
 0xab2   :  { %v2288_v33 = vpop.eup %2287 }
 0xab3   :  { %v1952_v20 = vmul.f32 %v2288_v33, %v1945_v54 }
 0xab5   :  { %v1959_v61 = vmul.f32 %v2048_v59, %v1952_v20 }
 0xab7   :  { %v1966_v41 = vadd.f32 %v2049_v60, %v1959_v61 }
 0xab9   :  { %1967 = vst [vmem:[%s2982_s13] sm:$0xff] %v1966_v41 }

// kernel: forward.5
= control target key start
LH: loop header
LB: loop body
LE: loop exit
PB: predicated region body
PF: predicated region fallthrough
CT: control target
= control target key end

     0   :  { %s4608_s0 = inlined_call_operand.vmem [shape: f32[8,128], index: 0, kind: input, shape index: {}]   ;;  %s4609_s1 = inlined_call_operand.vmem [shape: bf16[128,128], index: 1, kind: input, shape index: {}]   ;;  %s4610_s2 = inlined_call_operand.vmem [shape: f32[1,128], index: 2, kind: input, shape index: {}]   ;;  %s4611_s3 = inlined_call_operand.vmem [shape: bf16[128,128], index: 3, kind: input, shape index: {}]   ;;  %s4612_s4 = inlined_call_operand.vmem [shape: f32[8,128], index: 4, kind: input, shape index: {}]   ;;  %s4613_s5 = inlined_call_operand.vmem [shape: bf16[1,128,384], index: 5, kind: input, shape index: {}]   ;;  %s4614_s6 = inlined_call_operand.vmem [shape: f32[1,1,384], index: 6, kind: input, shape index: {}]   ;;  %s4615_s7 = inlined_call_operand.vmem [shape: bf16[1,128,128], index: 7, kind: input, shape index: {}]   ;;  %s4616_s8 = inlined_call_operand.vmem [shape: f32[1,1,128], index: 8, kind: input, shape index: {}]   ;;  %s4617_s9 = inlined_call_operand.vmem [shape: f32[1,1,128], index: 9, kind: input, shape index: {}]   ;;  %s4618_s10 = inlined_call_operand.vmem [shape: f32[1,1,128], index: 10, kind: input, shape index: {}]   ;;  %s4619_s11 = inlined_call_operand.vmem [shape: bf16[1,128,128], index: 11, kind: input, shape index: {}]   ;;  %s4620_s12 = inlined_call_operand.vmem [shape: f32[1,1,128], index: 12, kind: input, shape index: {}]   ;;  %s4621_s13 = inlined_call_operand.vmem [shape: bf16[1,128,256], index: 13, kind: input, shape index: {}]   ;;  %s4622_s14 = inlined_call_operand.vmem [shape: f32[1,1,256], index: 14, kind: input, shape index: {}]   ;;  %s4623_s15 = inlined_call_operand.vmem [shape: bf16[1,128,128], index: 15, kind: input, shape index: {}]   ;;  %s4624_s16 = inlined_call_operand.vmem [shape: f32[1,1,128], index: 16, kind: input, shape index: {}]   ;;  %s4625_s17 = inlined_call_operand.vmem [shape: f32[1,1,128], index: 17, kind: input, shape index: {}]   ;;  %s4626_s18 = inlined_call_operand.vmem [shape: f32[1,1,128], index: 18, kind: input, shape index: {}]   ;;  %s4627_s19 = inlined_call_operand.vmem [shape: bf16[1,128,256], index: 19, kind: input, shape index: {}]   ;;  %s4628_s20 = inlined_call_operand.vmem [shape: f32[1,1,256], index: 20, kind: input, shape index: {}]   ;;  %s4629_s21 = inlined_call_operand.vmem [shape: bf16[1,256,128], index: 21, kind: input, shape index: {}]   ;;  %s4630_s22 = inlined_call_operand.vmem [shape: f32[1,1,128], index: 22, kind: input, shape index: {}]   ;;  %s4631_s23 = inlined_call_operand.vmem [shape: f32[1,1,128], index: 23, kind: input, shape index: {}]   ;;  %s4632_s24 = inlined_call_operand.hbm [shape: f32[1,1,128], index: 24, kind: input, shape index: {}]   ;;  %s4633_s25 = inlined_call_operand.vmem [shape: bf16[128,128], index: 25, kind: input, shape index: {}]   ;;  %s4634_s26 = inlined_call_operand.hbm [shape: f32[1,128], index: 26, kind: input, shape index: {}]   ;;  %s4635_s27 = inlined_call_operand.vmem [shape: f32[8,2,128], index: 27, kind: output, shape index: {}]  }
   0x1   :  { %4647 = sst [smem:[#allocation13_spill]] %s4608_s0 }
   0x2   :  { %4648 = sst [smem:[#allocation14_spill]] %s4609_s1 }
   0x3   :  { %4649 = sst [smem:[#allocation15_spill]] %s4610_s2 }
   0x4   :  { %4650 = sst [smem:[#allocation16_spill]] %s4611_s3 }
   0x5   :  { %4651 = sst [smem:[#allocation17_spill]] %s4612_s4 }
   0x6   :  { %4652 = sst [smem:[#allocation18_spill]] %s4613_s5 }
   0x7   :  { %4653 = sst [smem:[#allocation19_spill]] %s4614_s6 }
   0x8   :  { %4654 = sst [smem:[#allocation20_spill]] %s4615_s7 }
   0x9   :  { %4655 = sst [smem:[#allocation21_spill]] %s4616_s8 }
   0xa   :  { %4656 = sst [smem:[#allocation22_spill]] %s4617_s9 }
   0xb   :  { %4657 = sst [smem:[#allocation23_spill]] %s4618_s10 }
   0xc   :  { %4658 = sst [smem:[#allocation24_spill]] %s4619_s11 }
   0xd   :  { %32 = vsyncpa [#allocation8], 0 }
   0xe   :  { %33 = vsyncpa [#allocation10], 0  ;;  %s3845_s7 = smov 0  }
   0xf LB: > { %s3851_s4 = sadd.s32 4294967295, %s3692_s7   ;;  %p3015_p0 = scmp.ge.s32.totalorder %s3692_s7, 1  ;;  %s3692_s7 = sphi %s3845_s7, %s39_s7  }
  0x10   : > { %p632_p1 = scmp.lt.s32.totalorder %s3692_s7, 8  ;;  %p4641_p3 = scmp.eq.s32.totalorder %s3851_s4, 0 }
  0x11   : > { %s3694_s30 = smov [#allocation7]   ;;  %s3695_s5 = smov [#allocation9]  }
  0x12   : > { %p3857_p4 = pnand %p3015_p0, %p632_p1  ;;  %s717_s9 = sshll.u32 %s3694_s30, 4  ;;  %s718_s9 = int_to_ptr.vmem [resolvable:$true] %s717_s9 }
  0x13   : > { %s731_s28 = sshll.u32 %s3695_s5, 4  ;;  %s3622_s1 = scalar_lea.hbm %s4632_s24, 16  ;;  %s3869_s28 = int_to_ptr.vmem [resolvable:$true] %s731_s28 }
  0x14   : > { %s4659_s8 = scalar_select %p3857_p4, 1, 0 }
  0x15   : > { %p3420_p5 = pneg %p3857_p4  ;;  %p3623_p7 = scmp.ne.s32.totalorder %s4632_s24, %s3622_s1 }
  0x16   : > { %p3629_p11 = scmp.lt.u32.totalorder %s3622_s1, %s4632_s24 }
  0x17   : > { %p3865_p6 = pnand %p4641_p3, %p3420_p5 }
  0x19   : > { %p3624_p8 = pneg %p3865_p6 }
  0x1b   : > { %p3625_p9 = pnand %p3624_p8, %p3623_p7 }
  0x1d   : > { %p3626_p10 = pneg %p3625_p9 }
  0x1f   : > { %p3631_p12 = pnand %p3629_p11, %p3626_p10 }
  0x21   : > { %3634 = shalt.err (!%p3631_p12)
}
  0x22   : > { %s3635_s30 = scalar_lea.vmem %s718_s9, 16  ;;  %s3642_s5 = scalar_lea.vmem %s718_s9, 32 }
  0x23   : > { %p3636_p13 = scmp.ne.s32.totalorder %s718_s9, %s3635_s30  ;;  %p3643_p5 = scmp.lt.s32.totalorder %s718_s9, %s718_s9 }
  0x24   : > { %p3644_p2 = scmp.lt.s32.totalorder %s3642_s5, %s3635_s30 }
  0x25   : > { %p3638_p0 = pnand %p3636_p13, %p3624_p8 }
  0x26   : > { %p3645_p3 = por %p3644_p2, %p3643_p5 }
  0x27   : > { %p3639_p1 = pneg %p3638_p0 }
  0x29   : > { %p3646_p4 = pnand %p3645_p3, %p3639_p1 }
  0x2b   : > { %3649 = shalt.err (!%p3646_p4)
}
  0x2c   : > { %3423 = dma.hbm_to_vmem [thread:$0]  (!%p3865_p6), %s4632_s24, 16, %s718_s9, [#allocation8]  }
  0x2d   : > { %s3650_s11 = scalar_lea.hbm %s4634_s26, 16 }
  0x2e   : > { %p3651_p7 = scmp.ne.s32.totalorder %s4634_s26, %s3650_s11  ;;  %p3657_p4 = scmp.lt.u32.totalorder %s3650_s11, %s4634_s26 }
  0x30   : > { %p3653_p2 = pnand %p3651_p7, %p3624_p8 }
  0x32   : > { %p3654_p3 = pneg %p3653_p2 }
  0x34   : > { %p3659_p9 = pnand %p3657_p4, %p3654_p3 }
  0x36   : > { %3662 = shalt.err (!%p3659_p9)
}
  0x37   : > { %s3663_s9 = scalar_lea.vmem %s3869_s28, 16  ;;  %s3670_s10 = scalar_lea.vmem %s3869_s28, 32 }
  0x38   : > { %p3664_p10 = scmp.ne.s32.totalorder %s3869_s28, %s3663_s9  ;;  %p3671_p13 = scmp.lt.s32.totalorder %s3869_s28, %s3869_s28 }
  0x39   : > { %p3672_p0 = scmp.lt.s32.totalorder %s3670_s10, %s3663_s9 }
  0x3a   : > { %p3666_p11 = pnand %p3664_p10, %p3624_p8 }
  0x3b   : > { %p3673_p1 = por %p3672_p0, %p3671_p13 }
  0x3c   : > { %p3667_p12 = pneg %p3666_p11 }
  0x3e   : > { %p3674_p5 = pnand %p3673_p1, %p3667_p12 }
  0x40   : > { %3677 = shalt.err (!%p3674_p5)
}
  0x41   : > { %3426 = dma.hbm_to_vmem [thread:$0]  (!%p3865_p6), %s4634_s26, 16, %s3869_s28, [#allocation10]  }
  0x42   : > { %p4661_p7 = scmp.ne.s32.totalorder %s4659_s8, 0 }
  0x43   : > { %p4662_p8 = scmp.eq.s32.totalorder (!%p4661_p7), %s3851_s4, 0 }
  0x44   : > { %744 = sbr.rel (%p4661_p7) target bundleno = 5900 (0x170c), region = 128 }
  0x4b   : > { %3683 = dma.done.wait (%p4662_p8), [#allocation8], 16   ;;  %p4663_p2 = pmov %p4662_p8 }
  0x4d   : > { %3685 = vsyncadd (%p4663_p2), [#allocation8], 4294967280  ;;  %p4664_p3 = pmov %p4663_p2 }
  0x4e   : > { %p4665_p4 = pmov %p4663_p2 }
  0x4f   : > { %3687 = dma.done.wait (%p4664_p3), [#allocation10], 16  }
  0x50   : > { %3689 = vsyncadd (%p4665_p4), [#allocation10], 4294967280  ;;  %p4666_p9 = scmp.ne.s32.totalorder %s3851_s4, 0 }
  0x51   : > { %vm822_vm0 = vcmask (!%p4666_p9), 523264   ;;  %v3696_v0 = vmov (!%p4666_p9), 0.0   ;;  %s4667_s0 = sld [smem:[#allocation14_spill]] (!%p4666_p9)  ;;  %vm3697_vm1 = vmmov (!%p4666_p9), 0   ;;  %v3458_v4 = vld [vmem:[%s4621_s13 + $0x4] ss:$8 sps:$4 sm:$0xff] (!%p4666_p9)   ;;  %v815_v28 = vlaneseq (!%p4666_p9) }
  0x52   : > { %814 = sbr.rel (%p4666_p9) target bundleno = 670 (0x29e), region = 140  ;;  %823 = vst.msk [vmem:[#allocation3] sm:$0xff] (!%p4666_p9), %vm822_vm0, %v3696_v0  ;;  %824 = vst.msk [vmem:[#allocation3 + $0x8] sm:$0xff] (!%p4666_p9), %vm822_vm0, %v3696_v0  ;;  %3272 = vmatprep.subr.bf16.mxu0 (!%p4666_p9), %v3696_v0  ;;  %3288 = vmatprep.mubr.msk.bf16.mxu0 (!%p4666_p9), %vm3697_vm1, %v3696_v0  ;;  %v3460_v5 = vld [vmem:[%s4621_s13] ss:$8 sps:$4 sm:$0xff] (!%p4666_p9)   ;;  %s4668_s2 = sld [smem:[#allocation13_spill]] (!%p4666_p9) }
  0x53   : > { %825 = vst.msk [vmem:[#allocation3 + $0x10] sm:$0xff] (!%p4666_p9), %vm822_vm0, %v3696_v0  ;;  %826 = vst.msk [vmem:[#allocation3 + $0x18] sm:$0xff] (!%p4666_p9), %vm822_vm0, %v3696_v0  ;;  %v3461_v6 = vld [vmem:[%s4621_s13 + $0x14] ss:$8 sps:$4 sm:$0xff] (!%p4666_p9)   ;;  %1053 = vmatprep.subr.bf16.mxu1 (!%p4666_p9), %v3458_v4  ;;  %v3463_v8 = vld [vmem:[%s4621_s13 + $0x10] ss:$8 sps:$4 sm:$0xff] (!%p4666_p9)  }
  0x54   : > { %827 = vst.msk [vmem:[#allocation4] sm:$0xff] (!%p4666_p9), %vm822_vm0, %v3696_v0  ;;  %828 = vst.msk [vmem:[#allocation4 + $0x8] sm:$0xff] (!%p4666_p9), %vm822_vm0, %v3696_v0  ;;  %1054 = vmatpush1.bf16.msra.mxu1 (!%p4666_p9), %v3460_v5  ;;  %v3464_v9 = vld [vmem:[%s4621_s13 + $0x24] ss:$8 sps:$4 sm:$0xff] (!%p4666_p9)   ;;  %v3466_v11 = vld [vmem:[%s4621_s13 + $0x20] ss:$8 sps:$4 sm:$0xff] (!%p4666_p9)  }
  0x55   : > { %829 = vst.msk [vmem:[#allocation4 + $0x10] sm:$0xff] (!%p4666_p9), %vm822_vm0, %v3696_v0  ;;  %830 = vst.msk [vmem:[#allocation4 + $0x18] sm:$0xff] (!%p4666_p9), %vm822_vm0, %v3696_v0  ;;  %1055 = vmatprep.subr.bf16.mxu1 (!%p4666_p9), %v3461_v6  ;;  %v3467_v12 = vld [vmem:[%s4621_s13 + $0x34] ss:$8 sps:$4 sm:$0xff] (!%p4666_p9)   ;;  %v3469_v14 = vld [vmem:[%s4621_s13 + $0x30] ss:$8 sps:$4 sm:$0xff] (!%p4666_p9)  }
  0x56   : > { %v3470_v15 = vld [vmem:[%s4621_s13 + $0x44] ss:$8 sps:$4 sm:$0xff] (!%p4666_p9)   ;;  %v3472_v17 = vld [vmem:[%s4621_s13 + $0x40] ss:$8 sps:$4 sm:$0xff] (!%p4666_p9)   ;;  %v3473_v18 = vld [vmem:[%s4621_s13 + $0x54] ss:$8 sps:$4 sm:$0xff] (!%p4666_p9)  }
  0x57   : > { %v3450_v1 = vld [vmem:[%s4667_s0] sm:$0xff] (!%p4666_p9)   ;;  %v3451_v2 = vld [vmem:[%s4667_s0 + $0x8] sm:$0xff] (!%p4666_p9)   ;;  %v3452_v3 = vld [vmem:[%s4667_s0 + $0x10] sm:$0xff] (!%p4666_p9)   ;;  %v3698_v27 = vmov (!%p4666_p9), 0   ;;  %v816_v29 = vand.u32 (!%p4666_p9), 127, %v815_v28  ;;  %s4669_s5 = sld [smem:[#allocation15_spill]] (!%p4666_p9) }
  0x58   : > { %3273 = vmatpush3.bf16.msra.mxu0 (!%p4666_p9), %v3450_v1  ;;  %v3453_v7 = vld [vmem:[%s4667_s0 + $0x18] sm:$0xff] (!%p4666_p9)   ;;  %v3454_v10 = vld [vmem:[%s4667_s0 + $0x20] sm:$0xff] (!%p4666_p9)   ;;  %1056 = vmatpush1.bf16.msra.mxu1 (!%p4666_p9), %v3463_v8  ;;  %v3455_v13 = vld [vmem:[%s4667_s0 + $0x28] sm:$0xff] (!%p4666_p9)   ;;  %v964_v38 = vshrl.u32 (!%p4666_p9), %v815_v28, 7  ;;  %vm1094_vm3 = vcmask (!%p4666_p9), 519168   ;;  %vm1098_vm4 = vcmask (!%p4666_p9), 523268  }
  0x59   : > { %3274 = vmatprep.subr.bf16.mxu0 %v3696_v0  ;;  %1057 = vmatprep.subr.bf16.mxu1 %v3464_v9  ;;  %v3456_v16 = vld [vmem:[%s4667_s0 + $0x30] sm:$0xff]   ;;  %v3457_v19 = vld [vmem:[%s4667_s0 + $0x38] sm:$0xff]   ;;  %v831_v20 = vld [vmem:[%s4668_s2] sm:$0xff]  ;;  %vm817_vm2 = vcmp.eq.s32.totalorder %v816_v29, 1  ;;  %s3699_s29 = smov 64  }
  0x5a   : > { %v3475_v21 = vld [vmem:[%s4621_s13 + $0x50] ss:$8 sps:$4 sm:$0xff]   ;;  %v3476_v22 = vld [vmem:[%s4621_s13 + $0x64] ss:$8 sps:$4 sm:$0xff]   ;;  %v848_v23 = vpack.c.bf16 %v831_v20, %v831_v20  ;;  %v3478_v24 = vld [vmem:[%s4621_s13 + $0x60] ss:$8 sps:$4 sm:$0xff]   ;;  %1085 = vmatprep.mubr.bf16.mxu1 %v3698_v27 }
  0x5b   : > { %v3479_v25 = vld [vmem:[%s4621_s13 + $0x74] ss:$8 sps:$4 sm:$0xff]   ;;  %v3481_v26 = vld [vmem:[%s4621_s13 + $0x70] ss:$8 sps:$4 sm:$0xff]   ;;  %v3022_v30 = vsel %vm817_vm2, 1.0, %v3696_v0  ;;  %v965_v39 = vsub.s32 0, %v964_v38 }
  0x5c   : > { %3275 = vmatpush3.bf16.msra.mxu0 %v3451_v2  ;;  %1058 = vmatpush1.bf16.msra.mxu1 %v3466_v11  ;;  %820 = vst [vmem:[#allocation2] sm:$0x3] %v3022_v30  ;;  %821 = vst [vmem:[%s4635_s27] sm:$0x3] %v3022_v30  ;;  %v961_v40 = vld [vmem:[%s4622_s14] sm:$0x3]  ;;  %v969_v41 = vsub.s32 1, %v964_v38 }
  0x5d   : > { %3276 = vmatprep.subr.bf16.mxu0 %v3696_v0  ;;  %1059 = vmatprep.subr.bf16.mxu1 %v3467_v12  ;;  %v3023_v31 = vld [vmem:[%s4669_s5] ss:$0 sm:$0xff]  ;;  %v966_v42 = vrot.slane %v961_v40, %v965_v39 }
  0x5e   : > { %v970_v43 = vrot.slane %v961_v40, %v969_v41 }
  0x60   : > { %3277 = vmatpush3.bf16.msra.mxu0 %v3452_v3  ;;  %1060 = vmatpush1.bf16.msra.mxu1 %v3469_v14 }
  0x61   : > { %3278 = vmatprep.subr.bf16.mxu0 %v3696_v0  ;;  %1061 = vmatprep.subr.bf16.mxu1 %v3470_v15 }
  0x64   : > { %3279 = vmatpush3.bf16.msra.mxu0 %v3453_v7  ;;  %1062 = vmatpush1.bf16.msra.mxu1 %v3472_v17 }
  0x65   : > { %3280 = vmatprep.subr.bf16.mxu0 %v3696_v0  ;;  %1063 = vmatprep.subr.bf16.mxu1 %v3473_v18 }
  0x68   : > { %3281 = vmatpush3.bf16.msra.mxu0 %v3454_v10  ;;  %1064 = vmatpush1.bf16.msra.mxu1 %v3475_v21 }
  0x69   : > { %3282 = vmatprep.subr.bf16.mxu0 %v3696_v0  ;;  %1065 = vmatprep.subr.bf16.mxu1 %v3476_v22 }
  0x6c   : > { %3283 = vmatpush3.bf16.msra.mxu0 %v3455_v13  ;;  %1066 = vmatpush1.bf16.msra.mxu1 %v3478_v24 }
  0x6d   : > { %3284 = vmatprep.subr.bf16.mxu0 %v3696_v0  ;;  %1067 = vmatprep.subr.bf16.mxu1 %v3479_v25 }
  0x70   : > { %3285 = vmatpush3.bf16.msra.mxu0 %v3456_v16  ;;  %1068 = vmatpush1.bf16.msra.mxu1 %v3481_v26 }
  0x71   : > { %3286 = vmatprep.subr.bf16.mxu0 %v3696_v0 }
  0x74   : > { %3287 = vmatpush3.bf16.msra.mxu0 %v3457_v19 }
  0x77   : > { %3289 = vmatmul.mubr.bf16.vlgmr.msra.gmra.mrb[0].mxu0 %v848_v23 }
 0x14a   : > { %v938_v32 = vpop.f32.mrb[0].mxu0 }
 0x14b   : > { %v939_v33 = vadd.f32 %v3023_v31, %v938_v32  ;;  %v3290_v34 = vpop.f32.mrb[1].mxu0 }
 0x14c   : > { %v941_v35 = vpop.f32.mrb[2].mxu0 }
 0x14d   : > { %v960_v36 = vpack.c.bf16 %v939_v33, %v939_v33  ;;  %v3291_v37 = vpop.f32.mrb[3].mxu0 }
 0x14f   : > { %1086 = vmatmul.mubr.bf16.vlgmr.msra.gmra.mrb[0].mxu1 %v960_v36 }
 0x222   : > { %v1087_v44 = vpop.f32.mrb[0].mxu1 }
 0x223   : > { %v1088_v45 = vadd.f32 %v1087_v44, %v966_v42  ;;  %v1089_v46 = vpop.f32.mrb[1].mxu1 }
 0x224   : > { %v1090_v47 = vadd.f32 %v1089_v46, %v970_v43  ;;  %v1091_v48 = vpop.f32.mrb[2].mxu1 }
 0x225   : > { %v1092_v49 = vpop.f32.mrb[3].mxu1  ;;  %1103 = vrot.lane.b32.xlu0 %v1088_v45, %s3699_s29  ;;  %1095 = vst.msk [vmem:[#allocation5] sm:$0xf] %vm1094_vm3, %v1088_v45 }
 0x226   : > { %1099 = vst.msk [vmem:[#allocation5] sm:$0xf0] %vm1098_vm4, %v1088_v45  ;;  %1101 = vst.msk [vmem:[#allocation6] sm:$0xf0] %vm1098_vm4, %v1090_v47 }
 0x227   : > { %1096 = vst.msk [vmem:[#allocation6] sm:$0xf] %vm1094_vm3, %v1090_v47 }
 0x229   : > { %1109 = vrot.lane.b32.xlu0 %v1090_v47, %s3699_s29 }
 0x297   : > { %v1104_v50 = vpop.permute.xlu0 %1103 }
 0x298   : > { %1107 = vst.msk [vmem:[#allocation5 + $0x8] sm:$0xf] %vm1094_vm3, %v1104_v50 }
 0x299   : > { %1115 = vst.msk [vmem:[#allocation5 + $0x8] sm:$0xf0] %vm1098_vm4, %v1104_v50 }
 0x29b   : > { %v1110_v51 = vpop.permute.xlu0 %1109 }
 0x29c   : > { %1113 = vst.msk [vmem:[#allocation6 + $0x8] sm:$0xf] %vm1094_vm3, %v1110_v51 }
 0x29d   : > { %1117 = vst.msk [vmem:[#allocation6 + $0x8] sm:$0xf0] %vm1098_vm4, %v1110_v51 }
 0x29e PF: > { %s4670_s28 = sld [smem:[#allocation16_spill]]  ;;  %v3700_v53 = vmov 0.0   ;;  %vm3701_vm5 = vmmov 0   ;;  %s4671_s9 = sld [smem:[#allocation18_spill]]  ;;  %v1118_v8 = vld [vmem:[#allocation2] sm:$0x3]  ;;  %v1267_v32 = vlaneseq }
 0x29f   : > { %3292 = vmatprep.subr.bf16.mxu0 %v3700_v53  ;;  %3308 = vmatprep.mubr.msk.bf16.mxu0 %vm3701_vm5, %v3700_v53  ;;  %v1135_v12 = vpack.c.bf16 %v1118_v8, %v1118_v8  ;;  %v3702_v23 = vmov 0   ;;  %s4672_s30 = sld [smem:[#allocation17_spill]]  ;;  %v3703_v34 = vmov 1966171168   ;;  %s4673_s1 = sld [smem:[#allocation19_spill]]  ;;  %vm1519_vm6 = vcmask 516096  }
 0x2a0   : > { %1442 = vmatprep.mubr.bf16.mxu1 %v3702_v23  ;;  %3483 = vset.pattern.permute.xlu1 %v3702_v23  ;;  %v4175_v33 = vshrl.u32 %v1267_v32, 7  ;;  %v1495_v35 = vunpack.c.l.s4 %v3703_v34  ;;  %s4198_s8 = scalar_lea.vmem [#allocation4], %s3692_s7  ;;  %s3169_s6 = scalar_lea.vmem [#allocation3], %s3692_s7  ;;  %vm1589_vm7 = vcmask 523264   ;;  %vm1610_vm8 = vcmask 1041409  }
 0x2a1   : > { %3482 = vset.pattern.permute.xlu0 %v3702_v23  ;;  %s4643_s11 = smov 64   ;;  %vm1614_vm10 = vcmask 58368   ;;  %vm1904_vm11 = vcmask 1041408   ;;  %s4677_s29 = smov 64   ;;  %vm2084_vm12 = vcmask 519168   ;;  %vm2105_vm13 = vcmask 25600  }
 0x2a2   : > { %v1277_v36 = vsub.s32 2, %v4175_v33  ;;  %v4182_v38 = vsub.s32 1, %v4175_v33  ;;  %v1496_v39 = vunpack.c.0.s8 %v1495_v35  ;;  %s4678_s2 = sld [smem:[#allocation22_spill]] }
 0x2a4   : > { %v3484_v52 = vld [vmem:[%s4670_s28] sm:$0xff]   ;;  %v3485_v54 = vld [vmem:[%s4670_s28 + $0x8] sm:$0xff]   ;;  %v3486_v55 = vld [vmem:[%s4670_s28 + $0x10] sm:$0xff]   ;;  %v4186_v42 = vsub.s32 %v1496_v39, %v4175_v33 }
 0x2a5   : > { %3293 = vmatpush3.bf16.msra.mxu0 %v3484_v52  ;;  %v3492_v56 = vld [vmem:[%s4671_s9 + $0x4] ss:$12 sps:$4 sm:$0xff]   ;;  %v3494_v57 = vld [vmem:[%s4671_s9] ss:$12 sps:$4 sm:$0xff]   ;;  %v3487_v58 = vld [vmem:[%s4670_s28 + $0x18] sm:$0xff]   ;;  %s1225_s5 = scalar_lea.vmem %s4672_s30, %s3851_s4  ;;  %s4674_s30 = sld [smem:[#allocation20_spill]] }
 0x2a6   : > { %3294 = vmatprep.subr.bf16.mxu0 %v3700_v53  ;;  %1410 = vmatprep.subr.bf16.mxu1 %v3492_v56  ;;  %v3496_v59 = vld [vmem:[%s4671_s9 + $0x1c] ss:$12 sps:$4 sm:$0xff]   ;;  %v3498_v60 = vld [vmem:[%s4671_s9 + $0x18] ss:$12 sps:$4 sm:$0xff]   ;;  %v3500_v61 = vld [vmem:[%s4671_s9 + $0x34] ss:$12 sps:$4 sm:$0xff]  }
 0x2a7   : > { %1411 = vmatpush1.bf16.msra.mxu1 %v3494_v57  ;;  %v3488_v62 = vld [vmem:[%s4670_s28 + $0x20] sm:$0xff]   ;;  %v3502_v63 = vld [vmem:[%s4671_s9 + $0x30] ss:$12 sps:$4 sm:$0xff]   ;;  %v3504_v0 = vld [vmem:[%s4671_s9 + $0x4c] ss:$12 sps:$4 sm:$0xff]  }
 0x2a8   : > { %1412 = vmatprep.subr.bf16.mxu1 %v3496_v59  ;;  %v3489_v1 = vld [vmem:[%s4670_s28 + $0x28] sm:$0xff]   ;;  %v3490_v2 = vld [vmem:[%s4670_s28 + $0x30] sm:$0xff]   ;;  %v3491_v7 = vld [vmem:[%s4670_s28 + $0x38] sm:$0xff]  }
 0x2a9   : > { %3295 = vmatpush3.bf16.msra.mxu0 %v3485_v54  ;;  %v3506_v3 = vld [vmem:[%s4671_s9 + $0x48] ss:$12 sps:$4 sm:$0xff]   ;;  %v3508_v4 = vld [vmem:[%s4671_s9 + $0x64] ss:$12 sps:$4 sm:$0xff]   ;;  %v3510_v5 = vld [vmem:[%s4671_s9 + $0x60] ss:$12 sps:$4 sm:$0xff]  }
 0x2aa   : > { %3296 = vmatprep.subr.bf16.mxu0 %v3700_v53  ;;  %v3512_v6 = vld [vmem:[%s4671_s9 + $0x7c] ss:$12 sps:$4 sm:$0xff]   ;;  %v3514_v9 = vld [vmem:[%s4671_s9 + $0x78] ss:$12 sps:$4 sm:$0xff]   ;;  %v3516_v10 = vld [vmem:[%s4671_s9 + $0x94] ss:$12 sps:$4 sm:$0xff]  }
 0x2ab   : > { %1413 = vmatpush1.bf16.msra.mxu1 %v3498_v60  ;;  %v3495_v11 = vld [vmem:[%s4671_s9 + $0x8] ss:$12 sps:$4 sm:$0xff]   ;;  %v3499_v13 = vld [vmem:[%s4671_s9 + $0x20] ss:$12 sps:$4 sm:$0xff]   ;;  %v3503_v14 = vld [vmem:[%s4671_s9 + $0x38] ss:$12 sps:$4 sm:$0xff]  }
 0x2ac   : > { %1414 = vmatprep.subr.bf16.mxu1 %v3500_v61  ;;  %v3507_v15 = vld [vmem:[%s4671_s9 + $0x50] ss:$12 sps:$4 sm:$0xff]   ;;  %v3511_v16 = vld [vmem:[%s4671_s9 + $0x68] ss:$12 sps:$4 sm:$0xff]   ;;  %v3515_v17 = vld [vmem:[%s4671_s9 + $0x80] ss:$12 sps:$4 sm:$0xff]  }
 0x2ad   : > { %3297 = vmatpush3.bf16.msra.mxu0 %v3486_v55  ;;  %v3518_v18 = vld [vmem:[%s4671_s9 + $0x90] ss:$12 sps:$4 sm:$0xff]   ;;  %v3519_v19 = vld [vmem:[%s4671_s9 + $0x98] ss:$12 sps:$4 sm:$0xff]   ;;  %v3522_v21 = vld [vmem:[%s4671_s9 + $0xa8] ss:$12 sps:$4 sm:$0xff]  }
 0x2ae   : > { %3298 = vmatprep.subr.bf16.mxu0 %v3700_v53  ;;  %v3520_v20 = vld [vmem:[%s4671_s9 + $0xac] ss:$12 sps:$4 sm:$0xff]   ;;  %v3523_v22 = vld [vmem:[%s4671_s9 + $0xb0] ss:$12 sps:$4 sm:$0xff]   ;;  %v3056_v25 = vld [vmem:[%s1225_s5] ss:$0 sm:$0xff] }
 0x2af   : > { %1415 = vmatpush1.bf16.msra.mxu1 %v3502_v63  ;;  %v1265_v37 = vld [vmem:[%s4673_s1] sm:$0x7]  ;;  %s4675_s5 = sld [smem:[#allocation21_spill]]  ;;  %s4676_s1 = sld [smem:[#allocation24_spill]] }
 0x2b0   : > { %1416 = vmatprep.subr.bf16.mxu1 %v3504_v0  ;;  %v1278_v40 = vrot.slane %v1265_v37, %v1277_v36  ;;  %v1274_v41 = vrot.slane %v1265_v37, %v4182_v38 }
 0x2b1   : > { %3299 = vmatpush3.bf16.msra.mxu0 %v3487_v58  ;;  %v4194_v58 = vsub.s32 0, %v4175_v33 }
 0x2b2   : > { %3300 = vmatprep.subr.bf16.mxu0 %v3700_v53 }
 0x2b3   : > { %1417 = vmatpush1.bf16.msra.mxu1 %v3506_v3 }
 0x2b4   : > { %1418 = vmatprep.subr.bf16.mxu1 %v3508_v4 }
 0x2b5   : > { %3301 = vmatpush3.bf16.msra.mxu0 %v3488_v62 }
 0x2b6   : > { %3302 = vmatprep.subr.bf16.mxu0 %v3700_v53 }
 0x2b7   : > { %1419 = vmatpush1.bf16.msra.mxu1 %v3510_v5 }
 0x2b8   : > { %1420 = vmatprep.subr.bf16.mxu1 %v3512_v6 }
 0x2b9   : > { %3303 = vmatpush3.bf16.msra.mxu0 %v3489_v1 }
 0x2ba   : > { %3304 = vmatprep.subr.bf16.mxu0 %v3700_v53 }
 0x2bb   : > { %1421 = vmatpush1.bf16.msra.mxu1 %v3514_v9 }
 0x2bc   : > { %1422 = vmatprep.subr.bf16.mxu1 %v3516_v10 }
 0x2bd   : > { %3305 = vmatpush3.bf16.msra.mxu0 %v3490_v2 }
 0x2be   : > { %3306 = vmatprep.subr.bf16.mxu0 %v3700_v53 }
 0x2bf   : > { %1423 = vmatpush1.bf16.msra.mxu1 %v3518_v18 }
 0x2c0   : > { %1424 = vmatprep.subr.bf16.mxu1 %v3520_v20 }
 0x2c1   : > { %3307 = vmatpush3.bf16.msra.mxu0 %v3491_v7  ;;  %v1270_v7 = vrot.slane %v1265_v37, %v4194_v58  ;;  %v1598_v37 = vstv %s3851_s4 }
 0x2c2   : > { %3312 = vmatprep.subr.bf16.mxu0 %v3700_v53 }
 0x2c3   : > { %1425 = vmatpush1.bf16.msra.mxu1 %v3522_v21 }
 0x2c4   : > { %3309 = vmatmul.mubr.bf16.vlgmr.msra.gmra.mrb[0].mxu0 %v1135_v12  ;;  %3332 = vmatprep.subr.bf16.mxu1 %v3700_v53 }
 0x2c5   : > { %3313 = vmatpush3.bf16.msra.mxu0 %v3495_v11  ;;  %3328 = vmatprep.mubr.msk.bf16.mxu0 %vm3701_vm5, %v3700_v53 }
 0x2c6   : > { %3314 = vmatprep.subr.bf16.mxu0 %v3700_v53 }
 0x2c9   : > { %3315 = vmatpush3.bf16.msra.mxu0 %v3499_v13 }
 0x2ca   : > { %3316 = vmatprep.subr.bf16.mxu0 %v3700_v53 }
 0x2cd   : > { %3317 = vmatpush3.bf16.msra.mxu0 %v3503_v14 }
 0x2ce   : > { %3318 = vmatprep.subr.bf16.mxu0 %v3700_v53 }
 0x2d1   : > { %3319 = vmatpush3.bf16.msra.mxu0 %v3507_v15 }
 0x2d2   : > { %3320 = vmatprep.subr.bf16.mxu0 %v3700_v53 }
 0x2d5   : > { %3321 = vmatpush3.bf16.msra.mxu0 %v3511_v16 }
 0x2d6   : > { %3322 = vmatprep.subr.bf16.mxu0 %v3700_v53 }
 0x2d9   : > { %3323 = vmatpush3.bf16.msra.mxu0 %v3515_v17 }
 0x2da   : > { %3324 = vmatprep.subr.bf16.mxu0 %v3700_v53 }
 0x2dd   : > { %3325 = vmatpush3.bf16.msra.mxu0 %v3519_v19 }
 0x2de   : > { %3326 = vmatprep.subr.bf16.mxu0 %v3700_v53 }
 0x2e1   : > { %3327 = vmatpush3.bf16.msra.mxu0 %v3523_v22 }
 0x2e2   : > { %3352 = vmatprep.subr.bf16.mxu0 %v3700_v53 }
 0x397   : > { %v1218_v24 = vpop.f32.mrb[0].mxu0 }
 0x398   : > { %v1224_v26 = vmul.f32 16.0, %v1218_v24  ;;  %v3310_v27 = vpop.f32.mrb[1].mxu0 }
 0x399   : > { %v1221_v28 = vpop.f32.mrb[2].mxu0 }
 0x39a   : > { %v4166_v29 = vadd.f32 %v3056_v25, %v1224_v26  ;;  %v3311_v30 = vpop.f32.mrb[3].mxu0  ;;  %v4234_v28 = vand.u32 127, %v1267_v32 }
 0x39c   : > { %v1264_v31 = vpack.c.bf16 %v4166_v29, %v4166_v29  ;;  %vm1599_vm9 = vcmp.le.s32.totalorder %v4234_v28, %v1598_v37 }
 0x39e   : > { %1443 = vmatmul.mubr.bf16.vlgmr.msra.gmra.mrb[0].mxu1 %v1264_v31  ;;  %3329 = vmatmul.mubr.bf16.vlgmr.msra.gmra.mrb[4].mxu0 %v1264_v31  ;;  %v4238_v31 = vsub.s32 %v4234_v28, %v4175_v33 }
 0x39f   : > { %3348 = vmatprep.mubr.msk.bf16.mxu1 %vm3701_vm5, %v3700_v53  ;;  %3368 = vmatprep.mubr.msk.bf16.mxu0 %vm3701_vm5, %v3700_v53 }
 0x471   : > { %v1444_v43 = vpop.f32.mrb[0].mxu1  ;;  %v1485_v44 = vpop.f32.mrb[4].mxu0 }
 0x472   : > { %v1486_v45 = vadd.f32 %v1485_v44, %v1278_v40  ;;  %v1446_v46 = vpop.f32.mrb[1].mxu1  ;;  %v3330_v47 = vpop.f32.mrb[5].mxu0  ;;  %v1445_v8 = vadd.f32 %v1444_v43, %v1270_v7 }
 0x473   : > { %v1447_v48 = vadd.f32 %v1446_v46, %v1274_v41  ;;  %v1448_v49 = vpop.f32.mrb[2].mxu1  ;;  %v1488_v50 = vpop.f32.mrb[6].mxu0 }
 0x474   : > { %v1529_v51 = vrot.slane %v1486_v45, %v4186_v42  ;;  %v1449_v52 = vpop.f32.mrb[3].mxu1  ;;  %v3331_v54 = vpop.f32.mrb[7].mxu0  ;;  %v1561_v9 = vrot.slane %v1445_v8, %v4186_v42 }
 0x475   : > { %v1500_v55 = vrot.slane %v1447_v48, %v4186_v42 }
 0x476   : > { %v1530_v56 = vcombine.high %v1529_v51, %v1529_v51  ;;  %v4191_v57 = vrot.slane %v1529_v51, %v4186_v42  ;;  %v1562_v10 = vcombine.high %v1561_v9, %v1561_v9  ;;  %v1569_v11 = vrot.slane %v1561_v9, %v4186_v42 }
 0x477   : > { %v1501_v59 = vcombine.high %v1500_v55, %v1500_v55  ;;  %v1508_v60 = vrot.slane %v1500_v55, %v4186_v42 }
 0x478   : > { %3175 = vst.msk [vmem:[%s4198_s8 - $0x1] sm:$0x1] %vm1519_vm6, %v4191_v57  ;;  %v4204_v61 = vrot.slane %v1530_v56, %v4186_v42  ;;  %v1580_v12 = vrot.slane %v1569_v11, %v4194_v58  ;;  %v1576_v13 = vrot.slane %v1562_v10, %v4186_v42 }
 0x479   : > { %v1659_v62 = vrot.slane %v1508_v60, %v4194_v58  ;;  %3171 = vst.msk [vmem:[%s3169_s6 - $0x1] sm:$0x1] %vm1519_vm6, %v1508_v60  ;;  %v1515_v63 = vrot.slane %v1501_v59, %v4186_v42 }
 0x47a   : > { %3176 = vst.msk [vmem:[%s4198_s8 + $0x7] sm:$0x1] %vm1519_vm6, %v4204_v61  ;;  %v1584_v16 = vrot.slane %v1576_v13, %v4194_v58 }
 0x47b   : > { %1664 = vrot.lane.b32.xlu0 %v1659_v62, %s4643_s11  ;;  %3172 = vst.msk [vmem:[%s3169_s6 + $0x7] sm:$0x1] %vm1519_vm6, %v1515_v63  ;;  %v1663_v0 = vrot.slane %v1515_v63, %v4194_v58 }
 0x47f   : > { %1666 = vrot.lane.b32.xlu0 %v1663_v0, %s4643_s11 }
 0x481   : > { %v4258_v7 = vld [vmem:[#allocation4] sm:$0xff]  ;;  %v4260_v8 = vld [vmem:[#allocation4 + $0x8] sm:$0xff] }
 0x482   : > { %v1550_v2 = vld [vmem:[#allocation3] sm:$0xff]  ;;  %v1551_v3 = vld [vmem:[#allocation3 + $0x8] sm:$0xff] }
 0x483   : > { %v1587_v21 = vmul.f32 %v1580_v12, %v1550_v2  ;;  %v1588_v26 = vmul.f32 %v1584_v16, %v1551_v3  ;;  %v1677_v2 = vrot.slane %v4191_v57, %v4194_v58  ;;  %v1681_v3 = vrot.slane %v4204_v61, %v4194_v58 }
 0x485   : > { %v1590_v24 = vsel %vm1589_vm7, %v1587_v21, 0.0  ;;  %v1593_v27 = vsel %vm1589_vm7, %v1588_v26, 0.0  ;;  %v3529_v21 = vld [vmem:[%s4674_s30 + $0x28] sm:$0xff]  }
 0x4ed   : > { %v1665_v1 = vpop.permute.xlu0 %1664 }
 0x4ee   : > { %3180 = vst.msk [vmem:[%s3169_s6 + $0xf] sm:$0x1] %vm1519_vm6, %v1665_v1 }
 0x4f1   : > { %v1667_v4 = vpop.permute.xlu0 %1666 }
 0x4f2   : > { %3181 = vst.msk [vmem:[%s3169_s6 + $0x17] sm:$0x1] %vm1519_vm6, %v1667_v4 }
 0x4f9   : > { %v1692_v5 = vld [vmem:[#allocation3 + $0x10] sm:$0xff]  ;;  %v1693_v6 = vld [vmem:[#allocation3 + $0x18] sm:$0xff] }
 0x4fa   : > { %1699 = vrot.lane.b32.xlu1 %v1692_v5, %s4643_s11 }
 0x4fe   : > { %1701 = vrot.lane.b32.xlu1 %v1693_v6, %s4643_s11 }
 0x56c   : > { %v1700_v14 = vpop.permute.xlu1 %1699 }
 0x56d   : > { %v1705_v15 = vmul.f32 %v1700_v14, %v1580_v12 }
 0x56f   : > { %1709 = vrot.lane.b32.xlu0 %v1705_v15, %s4643_s11 }
 0x570   : > { %v1702_v17 = vpop.permute.xlu1 %1701 }
 0x571   : > { %v1706_v18 = vmul.f32 %v1702_v17, %v1584_v16  ;;  %v3524_v16 = vld [vmem:[%s4674_s30] sm:$0xff]   ;;  %v3525_v17 = vld [vmem:[%s4674_s30 + $0x8] sm:$0xff]  }
 0x572   : > { %3333 = vmatpush3.bf16.msra.mxu1 %v3524_v16 }
 0x573   : > { %1711 = vrot.lane.b32.xlu1 %v1706_v18, %s4643_s11  ;;  %3334 = vmatprep.subr.bf16.mxu1 %v3700_v53  ;;  %v3526_v18 = vld [vmem:[%s4674_s30 + $0x10] sm:$0xff]  }
 0x576   : > { %3335 = vmatpush3.bf16.msra.mxu1 %v3525_v17 }
 0x577   : > { %3336 = vmatprep.subr.bf16.mxu1 %v3700_v53 }
 0x57a   : > { %3337 = vmatpush3.bf16.msra.mxu1 %v3526_v18 }
 0x57b   : > { %3338 = vmatprep.subr.bf16.mxu1 %v3700_v53 }
 0x5e1   : > { %v1710_v19 = vpop.permute.xlu0 %1709 }
 0x5e2   : > { %v1715_v20 = vsel %vm1589_vm7, %v1710_v19, 0.0  ;;  %v3527_v19 = vld [vmem:[%s4674_s30 + $0x18] sm:$0xff]  }
 0x5e3   : > { %1716 = vadd.xlane.f32.xlu0 %v1715_v20  ;;  %3339 = vmatpush3.bf16.msra.mxu1 %v3527_v19  ;;  %v3528_v20 = vld [vmem:[%s4674_s30 + $0x20] sm:$0xff]  }
 0x5e4   : > { %3340 = vmatprep.subr.bf16.mxu1 %v3700_v53  ;;  %v3532_v19 = vld [vmem:[%s4676_s1] sm:$0xff]  }
 0x5e5   : > { %v1712_v22 = vpop.permute.xlu1 %1711  ;;  %3353 = vmatpush3.bf16.msra.mxu0 %v3532_v19 }
 0x5e6   : > { %v1718_v25 = vsel %vm1589_vm7, %v1712_v22, 0.0  ;;  %v3530_v22 = vld [vmem:[%s4674_s30 + $0x30] sm:$0xff]   ;;  %3354 = vmatprep.subr.bf16.mxu0 %v3700_v53 }
 0x5e7   : > { %1591 = vadd.xlane.f32.xlu0 %v1590_v24  ;;  %1719 = vadd.xlane.f32.xlu1 %v1718_v25 }
 0x5e8   : > { %3341 = vmatpush3.bf16.msra.mxu1 %v3528_v20  ;;  %v3533_v20 = vld [vmem:[%s4676_s1 + $0x8] sm:$0xff]  }
 0x5e9   : > { %3342 = vmatprep.subr.bf16.mxu1 %v3700_v53  ;;  %3355 = vmatpush3.bf16.msra.mxu0 %v3533_v20 }
 0x5ea   : > { %3356 = vmatprep.subr.bf16.mxu0 %v3700_v53 }
 0x5eb   : > { %1594 = vadd.xlane.f32.xlu0 %v1593_v27 }
 0x5ec   : > { %3343 = vmatpush3.bf16.msra.mxu1 %v3529_v21 }
 0x5ed   : > { %3344 = vmatprep.subr.bf16.mxu1 %v3700_v53 }
 0x5f0   : > { %3345 = vmatpush3.bf16.msra.mxu1 %v3530_v22 }
 0x5f1   : > { %3346 = vmatprep.subr.bf16.mxu1 %v3700_v53 }
 0x670   : > { %v1717_v30 = vpop.xlane.xlu0 %1716 }
 0x671   : > { %v1721_v34 = vmul.f32 0.125, %v1717_v30 }
 0x673   : > { %v1728_v40 = vrot.slane %v1721_v34, %v4238_v31 }
 0x674   : > { %v1592_v35 = vpop.xlane.xlu0 %1591  ;;  %v1720_v36 = vpop.xlane.xlu1 %1719 }
 0x675   : > { %v1722_v39 = vmul.f32 0.125, %v1720_v36  ;;  %v1596_v41 = vmul.f32 0.125, %v1592_v35 }
 0x677   : > { %v1732_v43 = vrot.slane %v1722_v39, %v4238_v31  ;;  %v1605_v46 = vrot.slane %v1596_v41, %v4238_v31  ;;  %v3531_v39 = vld [vmem:[%s4674_s30 + $0x38] sm:$0xff]  }
 0x678   : > { %v1595_v32 = vpop.xlane.xlu0 %1594  ;;  %3347 = vmatpush3.bf16.msra.mxu1 %v3531_v39  ;;  %v2189_v39 = vld [vmem:[#allocation5 + $0xc] sm:$0xf] }
 0x679   : > { %v1597_v44 = vmul.f32 0.125, %v1595_v32  ;;  %v1733_v45 = vsel %vm1610_vm8, %v1732_v43, %v1728_v40  ;;  %3372 = vmatprep.subr.bf16.mxu1 %v3700_v53 }
 0x67a   : > { %v1735_v33 = vsel %vm1599_vm9, %v1733_v45, -1e+30 }
 0x67b   : > { %v1609_v47 = vrot.slane %v1597_v44, %v4238_v31  ;;  %v1736_v48 = vsel %vm1614_vm10, %v1735_v33, -inf }
 0x67c   : > { %1737 = vmax.xlane.f32.xlu1 %v1736_v48 }
 0x67d   : > { %v1611_v49 = vsel %vm1610_vm8, %v1609_v47, %v1605_v46 }
 0x67e   : > { %v1613_v50 = vsel %vm1599_vm9, %v1611_v49, -1e+30 }
 0x67f   : > { %v1615_v51 = vsel %vm1614_vm10, %v1613_v50, -inf }
 0x680   : > { %1616 = vmax.xlane.f32.xlu0 %v1615_v51 }
 0x709   : > { %v1738_v52 = vpop.xlane.xlu1 %1737 }
 0x70a   : > { %v1739_v54 = vsub.f32 %v1735_v33, %v1738_v52 }
 0x70c   : > { %v1740_v55 = vmul.f32 1.442695, %v1739_v54 }
 0x70d   : > { %v1617_v56 = vpop.xlane.xlu0 %1616 }
 0x70e   : > { %3596 = vpow2.f32 %v1740_v55  ;;  %v1618_v59 = vsub.f32 %v1613_v50, %v1617_v56 }
 0x710   : > { %v1619_v60 = vmul.f32 1.442695, %v1618_v59 }
 0x712   : > { %3598 = vpow2.f32 %v1619_v60 }
 0x718   : > { %v3597_v62 = vpop.eup %3596 }
 0x719   : > { %v1742_v63 = vsel %vm1614_vm10, %v3597_v62, 0.0 }
 0x71a   : > { %1743 = vadd.xlane.f32.xlu1 %v1742_v63 }
 0x71c   : > { %v3599_v0 = vpop.eup %3598 }
 0x71d   : > { %v1621_v1 = vsel %vm1614_vm10, %v3599_v0, 0.0 }
 0x71e   : > { %1622 = vadd.xlane.f32.xlu0 %v1621_v1 }
 0x72b   : > { %1682 = vrot.lane.b32.xlu1 %v1677_v2, %s4643_s11 }
 0x734   : > { %1684 = vrot.lane.b32.xlu0 %v1681_v3, %s4643_s11 }
 0x7a7   : > { %v1744_v4 = vpop.xlane.xlu1 %1743 }
 0x7a8   : > { %3600 = vrcp.f32 %v1744_v4 }
 0x7ab   : > { %v1623_v5 = vpop.xlane.xlu0 %1622  ;;  %v1683_v6 = vpop.permute.xlu1 %1682 }
 0x7ac   : > { %3602 = vrcp.f32 %v1623_v5  ;;  %3185 = vst.msk [vmem:[%s4198_s8 + $0xf] sm:$0x1] %vm1519_vm6, %v1683_v6 }
 0x7af   : > { %v1685_v9 = vpop.permute.xlu0 %1684 }
 0x7b0   : > { %3186 = vst.msk [vmem:[%s4198_s8 + $0x17] sm:$0x1] %vm1519_vm6, %v1685_v9  ;;  %s3165_s8 = sshll.u32 %s3851_s4, 1 }
 0x7b2   : > { %v3601_v57 = vpop.eup %3600 }
 0x7b3   : > { %v1746_v10 = vmul.f32 %v3601_v57, %v3597_v62 }
 0x7b5   : > { %v1750_v61 = vrot.slane %v1746_v10, %v4194_v58  ;;  %v1757_v13 = vrot.slane %v1746_v10, %v4182_v38 }
 0x7b6   : > { %v3603_v11 = vpop.eup %3602 }
 0x7b7   : > { %1752 = vbcast.lane.b32.xlu1 %v1750_v61, 256  ;;  %v1625_v12 = vmul.f32 %v3603_v11, %v3599_v0  ;;  %v1695_v25 = vld [vmem:[#allocation4 + $0x10] sm:$0xff]  ;;  %v1696_v35 = vld [vmem:[#allocation4 + $0x18] sm:$0xff] }
 0x7b9   : > { %v1629_v14 = vrot.slane %v1625_v12, %v4194_v58  ;;  %v1636_v15 = vrot.slane %v1625_v12, %v4182_v38  ;;  %v3097_v12 = vld [vmem:[%s4675_s5] ss:$0 sm:$0xff]  ;;  %s4679_s5 = sld [smem:[#allocation23_spill]] }
 0x7bb   : > { %1759 = vbcast.lane.b32.xlu1 %v1757_v13, 256  ;;  %1631 = vbcast.lane.b32.xlu0 %v1629_v14, 256 }
 0x7bf   : > { %1638 = vbcast.lane.b32.xlu1 %v1636_v15, 256 }
 0x829   : > { %v1753_v24 = vpop.permute.xlu1 %1752 }
 0x82a   : > { %v1761_v26 = vmul.f32 %v1753_v24, %v1695_v25 }
 0x82c   : > { %v1763_v27 = vsel %vm1589_vm7, %v1761_v26, 0.0  ;;  %v3534_v26 = vld [vmem:[%s4676_s1 + $0x10] sm:$0xff]  }
 0x82d   : > { %v1764_v30 = vrot.slane %v1763_v27, 4  ;;  %v1760_v34 = vpop.permute.xlu1 %1759  ;;  %v1632_v52 = vpop.permute.xlu0 %1631  ;;  %3357 = vmatpush3.bf16.msra.mxu0 %v3534_v26 }
 0x82e   : > { %v1762_v36 = vmul.f32 %v1760_v34, %v1696_v35  ;;  %v1640_v55 = vmul.f32 %v1632_v52, %v4258_v7  ;;  %3358 = vmatprep.subr.bf16.mxu0 %v3700_v53  ;;  %v3537_v34 = vld [vmem:[%s4676_s1 + $0x28] sm:$0xff]   ;;  %v3538_v35 = vld [vmem:[%s4676_s1 + $0x30] sm:$0xff]  }
 0x82f   : > { %v1765_v37 = vadd.f32 %v1764_v30, %v1763_v27  ;;  %v3535_v27 = vld [vmem:[%s4676_s1 + $0x18] sm:$0xff]   ;;  %v3536_v30 = vld [vmem:[%s4676_s1 + $0x20] sm:$0xff]  }
 0x830   : > { %v1770_v40 = vsel %vm1589_vm7, %v1762_v36, 0.0  ;;  %v1642_v59 = vsel %vm1589_vm7, %v1640_v55, 0.0  ;;  %v3539_v36 = vld [vmem:[%s4676_s1 + $0x38] sm:$0xff]  }
 0x831   : > { %v1766_v41 = vrot.slane %v1765_v37, 2  ;;  %v1771_v43 = vrot.slane %v1770_v40, 4  ;;  %v1639_v51 = vpop.permute.xlu1 %1638  ;;  %v1643_v62 = vrot.slane %v1642_v59, 4  ;;  %3359 = vmatpush3.bf16.msra.mxu0 %v3535_v27 }
 0x832   : > { %v1641_v54 = vmul.f32 %v1639_v51, %v4260_v8  ;;  %3360 = vmatprep.subr.bf16.mxu0 %v3700_v53 }
 0x833   : > { %v1767_v32 = vadd.f32 %v1766_v41, %v1765_v37  ;;  %v1772_v44 = vadd.f32 %v1771_v43, %v1770_v40  ;;  %v1644_v0 = vadd.f32 %v1643_v62, %v1642_v59  ;;  %v2188_v37 = vld [vmem:[#allocation5 + $0x8] sm:$0xf] }
 0x834   : > { %v1649_v56 = vsel %vm1589_vm7, %v1641_v54, 0.0 }
 0x835   : > { %v1773_v45 = vrot.slane %v1772_v44, 2  ;;  %v1768_v33 = vrot.slane %v1767_v32, 1  ;;  %v1650_v60 = vrot.slane %v1649_v56, 4  ;;  %v1645_v2 = vrot.slane %v1644_v0, 2  ;;  %3361 = vmatpush3.bf16.msra.mxu0 %v3536_v30 }
 0x836   : > { %3362 = vmatprep.subr.bf16.mxu0 %v3700_v53 }
 0x837   : > { %v1774_v46 = vadd.f32 %v1773_v45, %v1772_v44  ;;  %v1769_v48 = vadd.f32 %v1768_v33, %v1767_v32  ;;  %v1651_v63 = vadd.f32 %v1650_v60, %v1649_v56  ;;  %v1646_v4 = vadd.f32 %v1645_v2, %v1644_v0  ;;  %v3098_v44 = vld [vmem:[%s4678_s2] ss:$0 sm:$0xff] }
 0x838   : > { %v3099_v33 = vld [vmem:[%s4679_s5] ss:$0 sm:$0xff] }
 0x839   : > { %v1775_v47 = vrot.slane %v1774_v46, 1  ;;  %v1652_v1 = vrot.slane %v1651_v63, 2  ;;  %v1647_v6 = vrot.slane %v1646_v4, 1  ;;  %3363 = vmatpush3.bf16.msra.mxu0 %v3537_v34 }
 0x83a   : > { %3364 = vmatprep.subr.bf16.mxu0 %v3700_v53 }
 0x83b   : > { %v1776_v49 = vadd.f32 %v1775_v47, %v1774_v46  ;;  %v1653_v3 = vadd.f32 %v1652_v1, %v1651_v63  ;;  %v1648_v57 = vadd.f32 %v1647_v6, %v1646_v4  ;;  %v2046_v4 = vld [vmem:[#allocation5 + $0x4] sm:$0xf]  ;;  %v2045_v6 = vld [vmem:[#allocation5] sm:$0xf] }
 0x83d   : > { %v1783_v50 = vsel %vm1610_vm8, %v1776_v49, %v1769_v48  ;;  %v1654_v5 = vrot.slane %v1653_v3, 1  ;;  %3365 = vmatpush3.bf16.msra.mxu0 %v3538_v35  ;;  %v3100_v49 = vld [vmem:[%s4620_s12] ss:$0 sm:$0xff] }
 0x83e   : > { %1784 = vrot.lane.b32.xlu0 %v1783_v50, %s4643_s11  ;;  %3366 = vmatprep.subr.bf16.mxu0 %v3700_v53  ;;  %s2989_s11 = scalar_lea.vmem %s4635_s27, %s3165_s8 }
 0x83f   : > { %v1655_v9 = vadd.f32 %v1654_v5, %v1653_v3 }
 0x841   : > { %v1779_v8 = vsel %vm1610_vm8, %v1655_v9, %v1648_v57  ;;  %3367 = vmatpush3.bf16.msra.mxu0 %v3539_v36 }
 0x8b0   : > { %v1785_v10 = vpop.permute.xlu0 %1784 }
 0x8b1   : > { %v1787_v7 = vsel %vm1589_vm7, %v1779_v8, %v1785_v10 }
 0x8b2   : > { %v1804_v61 = vpack.c.bf16 %v1787_v7, %v1787_v7 }
 0x8b4   : > { %3349 = vmatmul.mubr.bf16.vlgmr.msra.gmra.mrb[4].mxu1 %v1804_v61 }
 0x8b5   : > { %3388 = vmatprep.mubr.msk.bf16.mxu1 %vm3701_vm5, %v3700_v53 }
 0x987   : > { %v1887_v11 = vpop.f32.mrb[4].mxu1 }
 0x988   : > { %v1893_v13 = vadd.f32 %v1887_v11, %v4166_v29  ;;  %v3350_v14 = vpop.f32.mrb[5].mxu1 }
 0x989   : > { %v1890_v15 = vpop.f32.mrb[6].mxu1 }
 0x98a   : > { %v3351_v16 = vpop.f32.mrb[7].mxu1  ;;  %v1901_v17 = vadd.f32 %v3097_v12, %v1893_v13 }
 0x98c   : > { %v1905_v18 = vsel %vm1904_vm11, %v1901_v17, 0.0 }
 0x98d   : > { %1906 = vadd.xlane.f32.xlu1 %v1905_v18 }
 0x99e   : > { %2197 = vrot.lane.b32.xlu1 %v2189_v39, %s4677_s29 }
 0xa1a   : > { %v1907_v29 = vpop.xlane.xlu1 %1906 }
 0xa1b   : > { %v1909_v21 = vmul.f32 0.0078125, %v1907_v29 }
 0xa1d   : > { %v1910_v22 = vsub.f32 %v1901_v17, %v1909_v21 }
 0xa1f   : > { %v1911_v24 = vmul.f32 %v1910_v22, %v1910_v22 }
 0xa21   : > { %v1912_v25 = vsel %vm1904_vm11, %v1911_v24, 0.0 }
 0xa22   : > { %1913 = vadd.xlane.f32.xlu0 %v1912_v25 }
 0xa38   : > { %2195 = vrot.lane.b32.xlu0 %v2188_v37, %s4677_s29 }
 0xaaf   : > { %v1914_v40 = vpop.xlane.xlu0 %1913 }
 0xab0   : > { %v1915_v41 = vmul.f32 0.0078125, %v1914_v40 }
 0xab2   : > { %v1916_v43 = vadd.f32 1e-05, %v1915_v41 }
 0xab3   : > { %v2196_v62 = vpop.permute.xlu0 %2195 }
 0xab4   : > { %3604 = vrsqrt.f32 %v1916_v43 }
 0xabe   : > { %v3605_v32 = vpop.eup %3604 }
 0xabf   : > { %v1918_v45 = vmul.f32 %v3605_v32, %v1910_v22 }
 0xac1   : > { %v1925_v46 = vmul.f32 %v3098_v44, %v1918_v45 }
 0xac3   : > { %v4359_v47 = vadd.f32 %v3099_v33, %v1925_v46 }
 0xac5   : > { %v1949_v48 = vpack.c.bf16 %v4359_v47, %v4359_v47 }
 0xac7   : > { %3369 = vmatmul.mubr.bf16.vlgmr.msra.gmra.mrb[8].mxu0 %v1949_v48 }
 0xac8   : > { %2607 = vmatprep.mubr.bf16.mxu0 %v3702_v23  ;;  %v2198_v23 = vpop.permute.xlu1 %2197 }
 0xb9a   : > { %v2039_v50 = vpop.f32.mrb[8].mxu0 }
 0xb9b   : > { %v2040_v51 = vadd.f32 %v3100_v49, %v2039_v50  ;;  %v3370_v52 = vpop.f32.mrb[9].mxu0 }
 0xb9c   : > { %v2042_v54 = vpop.f32.mrb[10].mxu0 }
 0xb9d   : > { %v2056_v55 = vrot.slane %v2040_v51, %v4186_v42  ;;  %v3371_v56 = vpop.f32.mrb[11].mxu0 }
 0xb9f   : > { %v2057_v59 = vcombine.high %v2056_v55, %v2056_v55  ;;  %v2064_v60 = vrot.slane %v2056_v55, %v4186_v42 }
 0xba1   : > { %v2075_v63 = vrot.slane %v2064_v60, %v4194_v58  ;;  %v2071_v0 = vrot.slane %v2057_v59, %v4186_v42 }
 0xba3   : > { %v2201_v1 = vmul.f32 %v2196_v62, %v2075_v63  ;;  %v2079_v2 = vrot.slane %v2071_v0, %v4194_v58  ;;  %v2082_v8 = vmul.f32 %v2075_v63, %v2045_v6 }
 0xba5   : > { %v2202_v3 = vmul.f32 %v2198_v23, %v2079_v2  ;;  %2205 = vrot.lane.b32.xlu1 %v2201_v1, %s4677_s29  ;;  %v2083_v57 = vmul.f32 %v2079_v2, %v2046_v4  ;;  %v2085_v61 = vsel %vm2084_vm12, %v2082_v8, 0.0 }
 0xba7   : > { %2207 = vrot.lane.b32.xlu0 %v2202_v3, %s4677_s29  ;;  %v2088_v7 = vsel %vm2084_vm12, %v2083_v57, 0.0 }
 0xc17   : > { %v2206_v5 = vpop.permute.xlu1 %2205 }
 0xc18   : > { %v2211_v9 = vsel %vm2084_vm12, %v2206_v5, 0.0 }
 0xc19   : > { %2212 = vadd.xlane.f32.xlu1 %v2211_v9  ;;  %v2208_v10 = vpop.permute.xlu0 %2207 }
 0xc1a   : > { %v2214_v42 = vsel %vm2084_vm12, %v2208_v10, 0.0 }
 0xc1b   : > { %2215 = vadd.xlane.f32.xlu0 %v2214_v42 }
 0xc1d   : > { %2089 = vadd.xlane.f32.xlu1 %v2088_v7 }
 0xc1f   : > { %2086 = vadd.xlane.f32.xlu0 %v2085_v61  ;;  %v3540_v61 = vld [vmem:[%s4623_s15] sm:$0xff]  }
 0xc20   : > { %3373 = vmatpush3.bf16.msra.mxu1 %v3540_v61 }
 0xc21   : > { %3374 = vmatprep.subr.bf16.mxu1 %v3700_v53 }
 0xca6   : > { %v2213_v11 = vpop.xlane.xlu1 %2212 }
 0xca7   : > { %v2217_v12 = vmul.f32 0.125, %v2213_v11  ;;  %v3541_v11 = vld [vmem:[%s4623_s15 + $0x8] sm:$0xff]  }
 0xca8   : > { %v2216_v13 = vpop.xlane.xlu0 %2215  ;;  %3375 = vmatpush3.bf16.msra.mxu1 %v3541_v11 }
 0xca9   : > { %v2218_v14 = vmul.f32 0.125, %v2216_v13  ;;  %v2224_v16 = vrot.slane %v2217_v12, %v4238_v31  ;;  %3376 = vmatprep.subr.bf16.mxu1 %v3700_v53  ;;  %v3543_v13 = vld [vmem:[%s4623_s15 + $0x18] sm:$0xff]  }
 0xcaa   : > { %v2090_v15 = vpop.xlane.xlu1 %2089 }
 0xcab   : > { %v2228_v17 = vrot.slane %v2218_v14, %v4238_v31  ;;  %v2092_v18 = vmul.f32 0.125, %v2090_v15  ;;  %v3545_v15 = vld [vmem:[%s4623_s15 + $0x28] sm:$0xff]  }
 0xcac   : > { %v2087_v19 = vpop.xlane.xlu0 %2086 }
 0xcad   : > { %v2091_v20 = vmul.f32 0.125, %v2087_v19  ;;  %v2229_v29 = vsel %vm1610_vm8, %v2228_v17, %v2224_v16  ;;  %v2102_v22 = vrot.slane %v2092_v18, %v4238_v31  ;;  %v3546_v16 = vld [vmem:[%s4623_s15 + $0x30] sm:$0xff]   ;;  %v2192_v17 = vld [vmem:[#allocation6 + $0xc] sm:$0xf] }
 0xcae   : > { %v2231_v21 = vsel %vm2105_vm13, %v2229_v29, -inf }
 0xcaf   : > { %v2098_v24 = vrot.slane %v2091_v20, %v4238_v31  ;;  %2232 = vmax.xlane.f32.xlu0 %v2231_v21 }
 0xcb1   : > { %v2103_v25 = vsel %vm1610_vm8, %v2102_v22, %v2098_v24  ;;  %v3547_v22 = vld [vmem:[%s4623_s15 + $0x38] sm:$0xff]  }
 0xcb2   : > { %v2106_v26 = vsel %vm2105_vm13, %v2103_v25, -inf }
 0xcb3   : > { %2107 = vmax.xlane.f32.xlu1 %v2106_v26 }
 0xd3c   : > { %v2233_v27 = vpop.xlane.xlu0 %2232 }
 0xd3d   : > { %v2238_v30 = vrot.slane %v2233_v27, %v4194_v58  ;;  %v2242_v34 = vrot.slane %v2233_v27, %v4182_v38 }
 0xd3f   : > { %v2245_v35 = vsub.f32 %v2217_v12, %v2238_v30  ;;  %v2246_v36 = vsub.f32 %v2218_v14, %v2242_v34  ;;  %v3542_v12 = vld [vmem:[%s4623_s15 + $0x10] sm:$0xff]   ;;  %v3544_v14 = vld [vmem:[%s4623_s15 + $0x20] sm:$0xff]  }
 0xd40   : > { %v2108_v37 = vpop.xlane.xlu1 %2107  ;;  %3377 = vmatpush3.bf16.msra.mxu1 %v3542_v12  ;;  %v3548_v12 = vld [vmem:[%s4627_s19] ss:$8 sps:$4 sm:$0xff]  }
 0xd41   : > { %v2247_v39 = vmul.f32 1.442695, %v2245_v35  ;;  %v2249_v40 = vmul.f32 1.442695, %v2246_v36  ;;  %v2113_v41 = vrot.slane %v2108_v37, %v4194_v58  ;;  %v2117_v43 = vrot.slane %v2108_v37, %v4182_v38  ;;  %3378 = vmatprep.subr.bf16.mxu1 %v3700_v53 }
 0xd43   : > { %3606 = vpow2.f32 %v2247_v39  ;;  %v2120_v32 = vsub.f32 %v2091_v20, %v2113_v41  ;;  %v2121_v44 = vsub.f32 %v2092_v18, %v2117_v43  ;;  %v2191_v18 = vld [vmem:[#allocation6 + $0x8] sm:$0xf] }
 0xd44   : > { %3608 = vpow2.f32 %v2249_v40  ;;  %3379 = vmatpush3.bf16.msra.mxu1 %v3543_v13  ;;  %v3550_v13 = vld [vmem:[%s4627_s19 + $0x4] ss:$8 sps:$4 sm:$0xff]  }
 0xd45   : > { %v2122_v45 = vmul.f32 1.442695, %v2120_v32  ;;  %v2124_v33 = vmul.f32 1.442695, %v2121_v44  ;;  %3380 = vmatprep.subr.bf16.mxu1 %v3700_v53  ;;  %2575 = vmatprep.subr.bf16.mxu0 %v3550_v13 }
 0xd46   : > { %2576 = vmatpush1.bf16.msra.mxu0 %v3548_v12 }
 0xd47   : > { %3610 = vpow2.f32 %v2122_v45 }
 0xd48   : > { %3612 = vpow2.f32 %v2124_v33  ;;  %3381 = vmatpush3.bf16.msra.mxu1 %v3544_v14  ;;  %v2048_v33 = vld [vmem:[#allocation6 + $0x4] sm:$0xf] }
 0xd49   : > { %3382 = vmatprep.subr.bf16.mxu1 %v3700_v53  ;;  %v3553_v14 = vld [vmem:[%s4627_s19 + $0x14] ss:$8 sps:$4 sm:$0xff]  }
 0xd4a   : > { %2577 = vmatprep.subr.bf16.mxu0 %v3553_v14 }
 0xd4c   : > { %3383 = vmatpush3.bf16.msra.mxu1 %v3545_v15  ;;  %v3556_v15 = vld [vmem:[%s4627_s19 + $0x24] ss:$8 sps:$4 sm:$0xff]  }
 0xd4d   : > { %v3607_v46 = vpop.eup %3606  ;;  %3384 = vmatprep.subr.bf16.mxu1 %v3700_v53 }
 0xd4e   : > { %v3609_v48 = vpop.eup %3608  ;;  %2254 = vperm.xlu0 %3482, %v3607_v46  }
 0xd4f   : > { %2257 = vperm.xlu1 %3483, %v3609_v48  }
 0xd50   : > { %3385 = vmatpush3.bf16.msra.mxu1 %v3546_v16  ;;  %v3554_v16 = vld [vmem:[%s4627_s19 + $0x20] ss:$8 sps:$4 sm:$0xff]  }
 0xd51   : > { %v3611_v49 = vpop.eup %3610  ;;  %3386 = vmatprep.subr.bf16.mxu1 %v3700_v53 }
 0xd52   : > { %v3613_v50 = vpop.eup %3612 }
 0xd53   : > { %2129 = vperm.xlu1 %3483, %v3611_v49  }
 0xd54   : > { %3387 = vmatpush3.bf16.msra.mxu1 %v3547_v22  ;;  %v3557_v22 = vld [vmem:[%s4627_s19 + $0x30] ss:$8 sps:$4 sm:$0xff]  }
 0xd57   : > { %2132 = vperm.xlu1 %3483, %v3613_v50  }
 0xdcd   : > { %v2255_v51 = vpop.permute.xlu0 %2254 }
 0xdce   : > { %v2262_v52 = vrot.slane %v2255_v51, %v4238_v31  ;;  %v2258_v54 = vpop.permute.xlu1 %2257 }
 0xdcf   : > { %v2266_v55 = vrot.slane %v2258_v54, %v4238_v31 }
 0xdd1   : > { %v2267_v56 = vsel %vm1610_vm8, %v2266_v55, %v2262_v52 }
 0xdd2   : > { %v2130_v59 = vpop.permute.xlu1 %2129  ;;  %v2269_v60 = vsel %vm2105_vm13, %v2267_v56, 0.0 }
 0xdd3   : > { %2270 = vadd.xlane.f32.xlu1 %v2269_v60  ;;  %v2137_v63 = vrot.slane %v2130_v59, %v4238_v31 }
 0xdd6   : > { %v2133_v62 = vpop.permute.xlu1 %2132 }
 0xdd7   : > { %v2141_v0 = vrot.slane %v2133_v62, %v4238_v31 }
 0xdd9   : > { %v2142_v23 = vsel %vm1610_vm8, %v2141_v0, %v2137_v63 }
 0xdda   : > { %v2144_v1 = vsel %vm2105_vm13, %v2142_v23, 0.0 }
 0xddb   : > { %2145 = vadd.xlane.f32.xlu0 %v2144_v1 }
 0xe60   : > { %v2271_v2 = vpop.xlane.xlu1 %2270 }
 0xe61   : > { %3614 = vrcp.f32 %v2271_v2 }
 0xe68   : > { %v2146_v3 = vpop.xlane.xlu0 %2145 }
 0xe69   : > { %3616 = vrcp.f32 %v2146_v3 }
 0xe6b   : > { %v3615_v4 = vpop.eup %3614 }
 0xe6c   : > { %v2281_v5 = vrot.slane %v3615_v4, %v4182_v38  ;;  %v2277_v6 = vrot.slane %v3615_v4, %v4194_v58 }
 0xe6e   : > { %v2285_v9 = vmul.f32 %v3609_v48, %v2281_v5  ;;  %v2284_v57 = vmul.f32 %v3607_v46, %v2277_v6  ;;  %v2047_v48 = vld [vmem:[#allocation6] sm:$0xf] }
 0xe70   : > { %2293 = vperm.xlu0 %3482, %v2285_v9   ;;  %2288 = vperm.xlu1 %3483, %v2284_v57  }
 0xe73   : > { %v3617_v10 = vpop.eup %3616 }
 0xe74   : > { %v2152_v31 = vrot.slane %v3617_v10, %v4194_v58  ;;  %v2156_v8 = vrot.slane %v3617_v10, %v4182_v38  ;;  %v3117_v10 = vld [vmem:[%s4624_s16] ss:$0 sm:$0xff] }
 0xe76   : > { %v2159_v42 = vmul.f32 %v3611_v49, %v2152_v31  ;;  %v2160_v7 = vmul.f32 %v3613_v50, %v2156_v8 }
 0xe78   : > { %2163 = vperm.xlu1 %3483, %v2159_v42  }
 0xe7c   : > { %2168 = vperm.xlu1 %3483, %v2160_v7  }
 0xeef   : > { %v2294_v19 = vpop.permute.xlu0 %2293  ;;  %v2289_v20 = vpop.permute.xlu1 %2288 }
 0xef0   : > { %v2297_v29 = vmul.f32 %v2294_v19, %v2192_v17  ;;  %v2296_v21 = vmul.f32 %v2289_v20, %v2191_v18 }
 0xef2   : > { %v2305_v24 = vsel %vm2084_vm12, %v2297_v29, 0.0  ;;  %v2298_v25 = vsel %vm2084_vm12, %v2296_v21, 0.0  ;;  %v3559_v21 = vld [vmem:[%s4627_s19 + $0x34] ss:$8 sps:$4 sm:$0xff]  }
 0xef3   : > { %v2306_v26 = vrot.slane %v2305_v24, 4  ;;  %v2299_v27 = vrot.slane %v2298_v25, 4 }
 0xef5   : > { %v2307_v30 = vadd.f32 %v2306_v26, %v2305_v24  ;;  %v2300_v34 = vadd.f32 %v2299_v27, %v2298_v25  ;;  %v3562_v24 = vld [vmem:[%s4627_s19 + $0x44] ss:$8 sps:$4 sm:$0xff]   ;;  %v3560_v25 = vld [vmem:[%s4627_s19 + $0x40] ss:$8 sps:$4 sm:$0xff]   ;;  %v3565_v26 = vld [vmem:[%s4627_s19 + $0x54] ss:$8 sps:$4 sm:$0xff]  }
 0xef6   : > { %v3563_v27 = vld [vmem:[%s4627_s19 + $0x50] ss:$8 sps:$4 sm:$0xff]  }
 0xef7   : > { %v2308_v35 = vrot.slane %v2307_v30, 2  ;;  %v2301_v36 = vrot.slane %v2300_v34, 2  ;;  %v2164_v45 = vpop.permute.xlu1 %2163 }
 0xef8   : > { %v2171_v50 = vmul.f32 %v2164_v45, %v2047_v48  ;;  %v3579_v45 = vld [vmem:[%s4629_s21 + $0x18] sm:$0xff]   ;;  %v3582_v48 = vld [vmem:[%s4629_s21 + $0x68] sm:$0xff]  }
 0xef9   : > { %v2309_v37 = vadd.f32 %v2308_v35, %v2307_v30  ;;  %v2302_v39 = vadd.f32 %v2301_v36, %v2300_v34  ;;  %v3568_v30 = vld [vmem:[%s4627_s19 + $0x64] ss:$8 sps:$4 sm:$0xff]   ;;  %v3566_v34 = vld [vmem:[%s4627_s19 + $0x60] ss:$8 sps:$4 sm:$0xff]   ;;  %v3571_v35 = vld [vmem:[%s4627_s19 + $0x74] ss:$8 sps:$4 sm:$0xff]  }
 0xefa   : > { %v2173_v52 = vsel %vm2084_vm12, %v2171_v50, 0.0  ;;  %v3569_v36 = vld [vmem:[%s4627_s19 + $0x70] ss:$8 sps:$4 sm:$0xff]  }
 0xefb   : > { %v2310_v40 = vrot.slane %v2309_v37, 1  ;;  %v2303_v41 = vrot.slane %v2302_v39, 1  ;;  %v2169_v46 = vpop.permute.xlu1 %2168  ;;  %v2174_v55 = vrot.slane %v2173_v52, 4 }
 0xefc   : > { %v2172_v49 = vmul.f32 %v2169_v46, %v2048_v33  ;;  %v3580_v33 = vld [vmem:[%s4629_s21 + $0x60] sm:$0xff]  }
 0xefd   : > { %v2304_v43 = vadd.f32 %v2303_v41, %v2302_v39  ;;  %v2311_v32 = vadd.f32 %v2310_v40, %v2309_v37  ;;  %v2175_v59 = vadd.f32 %v2174_v55, %v2173_v52  ;;  %v3572_v37 = vld [vmem:[%s4629_s21 + $0x40] sm:$0xff]   ;;  %v3574_v40 = vld [vmem:[%s4629_s21 + $0x48] sm:$0xff]  }
 0xefe   : > { %v2180_v51 = vsel %vm2084_vm12, %v2172_v49, 0.0  ;;  %v3573_v39 = vld [vmem:[%s4629_s21] sm:$0xff]   ;;  %3241 = vmatprep.subr.bf16.mxu1 %v3572_v37  ;;  %v3575_v41 = vld [vmem:[%s4629_s21 + $0x8] sm:$0xff]  }
 0xeff   : > { %v2318_v44 = vsel %vm1610_vm8, %v2311_v32, %v2304_v43  ;;  %v2181_v54 = vrot.slane %v2180_v51, 4  ;;  %v2176_v62 = vrot.slane %v2175_v59, 2  ;;  %v3576_v43 = vld [vmem:[%s4629_s21 + $0x50] sm:$0xff]   ;;  %v3581_v46 = vld [vmem:[%s4629_s21 + $0x20] sm:$0xff]   ;;  %v3583_v49 = vld [vmem:[%s4629_s21 + $0x28] sm:$0xff]  }
 0xf00   : > { %2319 = vrot.lane.b32.xlu1 %v2318_v44, %s4677_s29  ;;  %v3577_v32 = vld [vmem:[%s4629_s21 + $0x10] sm:$0xff]   ;;  %v3578_v44 = vld [vmem:[%s4629_s21 + $0x58] sm:$0xff]   ;;  %v3118_v55 = vld [vmem:[%s4625_s17] ss:$0 sm:$0xff] }
 0xf01   : > { %v2182_v56 = vadd.f32 %v2181_v54, %v2180_v51  ;;  %v2177_v0 = vadd.f32 %v2176_v62, %v2175_v59  ;;  %v3119_v59 = vld [vmem:[%s4626_s18] ss:$0 sm:$0xff] }
 0xf03   : > { %v2183_v60 = vrot.slane %v2182_v56, 2  ;;  %v2178_v1 = vrot.slane %v2177_v0, 1 }
 0xf05   : > { %v2184_v63 = vadd.f32 %v2183_v60, %v2182_v56  ;;  %v2179_v3 = vadd.f32 %v2178_v1, %v2177_v0  ;;  %v3584_v0 = vld [vmem:[%s4629_s21 + $0x70] sm:$0xff]   ;;  %v3586_v1 = vld [vmem:[%s4629_s21 + $0x78] sm:$0xff]  }
 0xf07   : > { %v2185_v23 = vrot.slane %v2184_v63, 1 }
 0xf09   : > { %v2186_v2 = vadd.f32 %v2185_v23, %v2184_v63  ;;  %v3585_v23 = vld [vmem:[%s4629_s21 + $0x30] sm:$0xff]  }
 0xf0b   : > { %v2314_v4 = vsel %vm1610_vm8, %v2186_v2, %v2179_v3  ;;  %v3587_v2 = vld [vmem:[%s4629_s21 + $0x38] sm:$0xff]   ;;  %v2483_v3 = vld [vmem:[%s4628_s20] sm:$0x3] }
 0xf72   : > { %v2320_v5 = vpop.permute.xlu1 %2319 }
 0xf73   : > { %v2322_v6 = vsel %vm1589_vm7, %v2314_v4, %v2320_v5  ;;  %v2488_v4 = vrot.slane %v2483_v3, %v4194_v58  ;;  %v2492_v5 = vrot.slane %v2483_v3, %v4182_v38  ;;  %v3152_v38 = vld [vmem:[%s4630_s22] ss:$0 sm:$0xff] }
 0xf74   : > { %v2339_v9 = vpack.c.bf16 %v2322_v6, %v2322_v6 }
 0xf76   : > { %3389 = vmatmul.mubr.bf16.vlgmr.msra.gmra.mrb[8].mxu1 %v2339_v9 }
 0xf77   : > { %3242 = vmatpush3.bf16.msra.mxu1 %v3573_v39 }
 0xf78   : > { %3243 = vmatprep.subr.bf16.mxu1 %v3574_v40 }
 0xf7b   : > { %3244 = vmatpush3.bf16.msra.mxu1 %v3575_v41  ;;  %v3153_v41 = vld [vmem:[%s4631_s23] ss:$0 sm:$0xff] }
 0xf7c   : > { %3245 = vmatprep.subr.bf16.mxu1 %v3576_v43 }
 0xf7f   : > { %3246 = vmatpush3.bf16.msra.mxu1 %v3577_v32  ;;  %v3154_v32 = vld [vmem:[#allocation7] ss:$0 sm:$0xff] }
 0xf80   : > { %3247 = vmatprep.subr.bf16.mxu1 %v3578_v44 }
 0xf83   : > { %3248 = vmatpush3.bf16.msra.mxu1 %v3579_v45 }
 0xf84   : > { %3249 = vmatprep.subr.bf16.mxu1 %v3580_v33 }
 0xf87   : > { %3250 = vmatpush3.bf16.msra.mxu1 %v3581_v46  ;;  %v3155_v46 = vld [vmem:[#allocation9] ss:$0 sm:$0xff] }
 0xf88   : > { %3251 = vmatprep.subr.bf16.mxu1 %v3582_v48 }
 0xf8b   : > { %3252 = vmatpush3.bf16.msra.mxu1 %v3583_v49 }
 0xf8c   : > { %3253 = vmatprep.subr.bf16.mxu1 %v3584_v0 }
 0xf8f   : > { %3254 = vmatpush3.bf16.msra.mxu1 %v3585_v23 }
 0xf90   : > { %3255 = vmatprep.subr.bf16.mxu1 %v3586_v1 }
 0xf93   : > { %3256 = vmatpush3.bf16.msra.mxu1 %v3587_v2 }
0x1049   : > { %v2422_v57 = vpop.f32.mrb[8].mxu1 }
0x104a   : > { %v2428_v31 = vadd.f32 %v2422_v57, %v4359_v47  ;;  %v3390_v42 = vpop.f32.mrb[9].mxu1  ;;  %v3551_v47 = vld [vmem:[%s4627_s19 + $0x10] ss:$8 sps:$4 sm:$0xff]  }
0x104b   : > { %v2425_v8 = vpop.f32.mrb[10].mxu1  ;;  %2578 = vmatpush1.bf16.msra.mxu0 %v3551_v47 }
0x104c   : > { %v3391_v7 = vpop.f32.mrb[11].mxu1  ;;  %v2436_v61 = vadd.f32 %v3117_v10, %v2428_v31  ;;  %2579 = vmatprep.subr.bf16.mxu0 %v3556_v15 }
0x104e   : > { %v2439_v11 = vsel %vm1904_vm11, %v2436_v61, 0.0 }
0x104f   : > { %2440 = vadd.xlane.f32.xlu1 %v2439_v11  ;;  %2580 = vmatpush1.bf16.msra.mxu0 %v3554_v16 }
0x1050   : > { %2581 = vmatprep.subr.bf16.mxu0 %v3559_v21 }
0x1053   : > { %2582 = vmatpush1.bf16.msra.mxu0 %v3557_v22 }
0x1054   : > { %2583 = vmatprep.subr.bf16.mxu0 %v3562_v24 }
0x1057   : > { %2584 = vmatpush1.bf16.msra.mxu0 %v3560_v25  ;;  %v3590_v25 = vld [vmem:[%s4633_s25 + $0x10] sm:$0xff]  }
0x1058   : > { %2585 = vmatprep.subr.bf16.mxu0 %v3565_v26  ;;  %v3591_v26 = vld [vmem:[%s4633_s25 + $0x18] sm:$0xff]  }
0x105b   : > { %2586 = vmatpush1.bf16.msra.mxu0 %v3563_v27  ;;  %v3592_v27 = vld [vmem:[%s4633_s25 + $0x20] sm:$0xff]  }
0x105c   : > { %2587 = vmatprep.subr.bf16.mxu0 %v3568_v30  ;;  %v3593_v30 = vld [vmem:[%s4633_s25 + $0x28] sm:$0xff]  }
0x105f   : > { %2588 = vmatpush1.bf16.msra.mxu0 %v3566_v34  ;;  %v3594_v34 = vld [vmem:[%s4633_s25 + $0x30] sm:$0xff]  }
0x1060   : > { %2589 = vmatprep.subr.bf16.mxu0 %v3571_v35  ;;  %v3595_v35 = vld [vmem:[%s4633_s25 + $0x38] sm:$0xff]  }
0x1063   : > { %2590 = vmatpush1.bf16.msra.mxu0 %v3569_v36 }
0x1064   : > { %3392 = vmatprep.subr.bf16.mxu0 %v3700_v53 }
0x10dc   : > { %v2441_v17 = vpop.xlane.xlu1 %2440 }
0x10dd   : > { %v2442_v18 = vmul.f32 0.0078125, %v2441_v17 }
0x10df   : > { %v2443_v19 = vsub.f32 %v2436_v61, %v2442_v18  ;;  %v3588_v18 = vld [vmem:[%s4633_s25] sm:$0xff]  }
0x10e1   : > { %v2444_v20 = vmul.f32 %v2443_v19, %v2443_v19 }
0x10e3   : > { %v2445_v29 = vsel %vm1904_vm11, %v2444_v20, 0.0 }
0x10e4   : > { %2446 = vadd.xlane.f32.xlu0 %v2445_v29 }
0x1171   : > { %v2447_v50 = vpop.xlane.xlu0 %2446 }
0x1172   : > { %v2448_v51 = vmul.f32 0.0078125, %v2447_v50 }
0x1174   : > { %v2449_v52 = vadd.f32 1e-05, %v2448_v51 }
0x1176   : > { %3618 = vrsqrt.f32 %v2449_v52 }
0x1180   : > { %v3619_v54 = vpop.eup %3618 }
0x1181   : > { %v2451_v56 = vmul.f32 %v3619_v54, %v2443_v19  ;;  %v3589_v19 = vld [vmem:[%s4633_s25 + $0x8] sm:$0xff]  }
0x1183   : > { %v2458_v60 = vmul.f32 %v3118_v55, %v2451_v56 }
0x1185   : > { %v2465_v62 = vadd.f32 %v3119_v59, %v2458_v60 }
0x1187   : > { %v2482_v63 = vpack.c.bf16 %v2465_v62, %v2465_v62 }
0x1189   : > { %2608 = vmatmul.mubr.bf16.vlgmr.msra.gmra.mrb[12].mxu0 %v2482_v63 }
0x118a   : > { %3408 = vmatprep.mubr.msk.bf16.mxu0 %vm3701_vm5, %v3700_v53  ;;  %3393 = vmatpush3.bf16.msra.mxu0 %v3588_v18 }
0x118b   : > { %3394 = vmatprep.subr.bf16.mxu0 %v3700_v53 }
0x118e   : > { %3395 = vmatpush3.bf16.msra.mxu0 %v3589_v19 }
0x118f   : > { %3396 = vmatprep.subr.bf16.mxu0 %v3700_v53 }
0x1192   : > { %3397 = vmatpush3.bf16.msra.mxu0 %v3590_v25 }
0x1193   : > { %3398 = vmatprep.subr.bf16.mxu0 %v3700_v53 }
0x1196   : > { %3399 = vmatpush3.bf16.msra.mxu0 %v3591_v26 }
0x1197   : > { %3400 = vmatprep.subr.bf16.mxu0 %v3700_v53 }
0x119a   : > { %3401 = vmatpush3.bf16.msra.mxu0 %v3592_v27 }
0x119b   : > { %3402 = vmatprep.subr.bf16.mxu0 %v3700_v53 }
0x119e   : > { %3403 = vmatpush3.bf16.msra.mxu0 %v3593_v30 }
0x119f   : > { %3404 = vmatprep.subr.bf16.mxu0 %v3700_v53 }
0x11a2   : > { %3405 = vmatpush3.bf16.msra.mxu0 %v3594_v34 }
0x11a3   : > { %3406 = vmatprep.subr.bf16.mxu0 %v3700_v53 }
0x11a6   : > { %3407 = vmatpush3.bf16.msra.mxu0 %v3595_v35 }
0x125c   : > { %v2609_v6 = vpop.f32.mrb[12].mxu0 }
0x125d   : > { %v2610_v9 = vadd.f32 %v2609_v6, %v2488_v4  ;;  %v2611_v57 = vpop.f32.mrb[13].mxu0 }
0x125e   : > { %v2612_v10 = vadd.f32 %v2611_v57, %v2492_v5  ;;  %v2613_v31 = vpop.f32.mrb[14].mxu0 }
0x125f   : > { %v2616_v42 = vmax.f32 %v2610_v9, 0.0  ;;  %v2614_v8 = vpop.f32.mrb[15].mxu0 }
0x1260   : > { %v2617_v7 = vmax.f32 %v2612_v10, 0.0 }
0x1261   : > { %v2650_v11 = vpack.c.bf16 %v2616_v42, %v2616_v42 }
0x1262   : > { %v2651_v61 = vpack.c.bf16 %v2617_v7, %v2617_v7 }
0x1264   : > { %2780 = vmatprep.mubr.bf16.mxu1 %v2651_v61 }
0x1265   : > { %2781 = vmatmul.mubr.bf16.vlgmr.msra.gmra.mrb[12].mxu1 %v2650_v11 }
0x1338   : > { %v3257_v12 = vpop.f32.mrb[12].mxu1 }
0x1339   : > { %v3258_v13 = vpop.f32.mrb[13].mxu1 }
0x133a   : > { %v3259_v14 = vadd.f32 %v3258_v13, %v3257_v12  ;;  %v3260_v47 = vpop.f32.mrb[14].mxu1 }
0x133b   : > { %v3261_v15 = vpop.f32.mrb[15].mxu1 }
0x133c   : > { %v2788_v58 = vadd.f32 %v3259_v14, %v2465_v62 }
0x133e   : > { %v2796_v16 = vadd.f32 %v3152_v38, %v2788_v58 }
0x1340   : > { %v2799_v17 = vsel %vm1904_vm11, %v2796_v16, 0.0 }
0x1341   : > { %2800 = vadd.xlane.f32.xlu1 %v2799_v17 }
0x13ce   : > { %v2801_v20 = vpop.xlane.xlu1 %2800 }
0x13cf   : > { %v2802_v29 = vmul.f32 0.0078125, %v2801_v20 }
0x13d1   : > { %v2803_v21 = vsub.f32 %v2796_v16, %v2802_v29 }
0x13d3   : > { %v2804_v22 = vmul.f32 %v2803_v21, %v2803_v21 }
0x13d5   : > { %v2805_v24 = vsel %vm1904_vm11, %v2804_v22, 0.0 }
0x13d6   : > { %2806 = vadd.xlane.f32.xlu0 %v2805_v24 }
0x1463   : > { %v2807_v36 = vpop.xlane.xlu0 %2806 }
0x1464   : > { %v2808_v37 = vmul.f32 0.0078125, %v2807_v36 }
0x1466   : > { %v2809_v39 = vadd.f32 1e-05, %v2808_v37 }
0x1468   : > { %3620 = vrsqrt.f32 %v2809_v39 }
0x1472   : > { %v3621_v40 = vpop.eup %3620 }
0x1473   : > { %v2811_v43 = vmul.f32 %v3621_v40, %v2803_v21 }
0x1475   : > { %v2818_v44 = vmul.f32 %v3153_v41, %v2811_v43 }
0x1477   : > { %v2825_v45 = vadd.f32 %v3154_v32, %v2818_v44 }
0x1479   : > { %v2842_v33 = vpack.c.bf16 %v2825_v45, %v2825_v45 }
0x147b   : > { %3409 = vmatmul.mubr.bf16.vlgmr.msra.gmra.mrb[16].mxu0 %v2842_v33 }
0x154e   : > { %v2932_v48 = vpop.f32.mrb[16].mxu0 }
0x154f   : > { %v2933_v49 = vadd.f32 %v3155_v46, %v2932_v48  ;;  %v3410_v50 = vpop.f32.mrb[17].mxu0 }
0x1550   : > { %v2935_v51 = vpop.f32.mrb[18].mxu0 }
0x1551   : > { %v3411_v52 = vpop.f32.mrb[19].mxu0  ;;  %v2938_v54 = vsel %vm1904_vm11, %v2933_v49, -inf }
0x1552   : > { %2939 = vmax.xlane.f32.xlu1 %v2938_v54 }
0x15df   : > { %v2940_v55 = vpop.xlane.xlu1 %2939 }
0x15e0   : > { %vm2941_vm14 = vcmp.ge.f32.partialorder %v2933_v49, %v2940_v55 }
0x15e1   : > { %v2942_v56 = vsel %vm2941_vm14, %v4234_v28, 128 }
0x15e2   : > { %v2943_v59 = vsel %vm1904_vm11, %v2942_v56, 2147483647 }
0x15e3   : > { %v2945_v60 = vshra.s32 %v2943_v59, 16  ;;  %v2944_v63 = vand.u32 65535, %v2943_v59 }
0x15e5   : > { %v2947_v62 = vcvt.s32.f32 %v2945_v60  ;;  %v2946_v23 = vcvt.s32.f32 %v2944_v63 }
0x15e7   : > { %2948 = vmin.xlane.f32.xlu0 %v2947_v62 }
0x1674   : > { %v2949_v0 = vpop.xlane.xlu0 %2948 }
0x1675   : > { %vm2950_vm15 = vcmp.eq.f32.partialorder %v2947_v62, %v2949_v0  ;;  %v2955_v2 = vcvt.f32.s32 %v2949_v0 }
0x1676   : > { %v2951_v1 = vsel %vm2950_vm15, %v2946_v23, inf }
0x1677   : > { %2952 = vmin.xlane.f32.xlu1 %v2951_v1  ;;  %v2956_v4 = vshll.u32 %v2955_v2, 16 }
0x1704   : > { %v2953_v3 = vpop.xlane.xlu1 %2952 }
0x1705   : > { %v2954_v5 = vcvt.f32.s32 %v2953_v3 }
0x1707   : > { %v2957_v6 = vadd.s32 %v2956_v4, %v2954_v5 }
0x1709   : > { %vm2958_vm0 = vcmp.eq.s32.totalorder %v4234_v28, %v2957_v6 }
0x170a   : > { %v3164_v9 = vsel %vm2958_vm0, 1.0, %v3700_v53 }
0x170b   : > { %2961 = vst [vmem:[#allocation2] sm:$0x3] %v3164_v9  ;;  %3166 = vst [vmem:[%s2989_s11 + $0x2] sm:$0x3] %v3164_v9 }
0x170c PF: > { %s39_s7 = sadd.s32 1, %s3692_s7  }
0x170d   : > { %p36_p6 = scmp.ge.s32.totalorder %s39_s7, 9  }
0x170f   :  { %38 = sbr.rel (!%p36_p6) target bundleno = 15 (0xf), region = 180 }
0x1716   :  { %2977 = vsyncpa [#allocation8], 1 }
0x1717   :  { %2979 = vsyncpa [#allocation8 + $0x1], 1 }
0x1718   :  { %2980 = vsyncpa [#allocation10], 1 }

</bundles_post_ra>
